<compile_context>
chip_gen: v7x
topology: tpu7x:2x2x1
jax: 0.10.0
libtpu: 0.0.40
codegen_flags: <defaults>
</compile_context>

<pallas_src>
import functools
import math

import jax
import jax.numpy as jnp
from jax import lax
from jax.experimental import pallas as pl
from jax.experimental.pallas import tpu as pltpu

KSIZE = 7
PAD = (KSIZE - 1) // 2  # 3


def _spatial_gate_kernel(x_ref, w_ref, bn_ref, out_ref, pad_ref, *, h, w):
    """One block of B_blk batch samples per grid step.

    x_ref:   (B, C, H*W)            VMEM  - lane-dense input block (native dtype)
    w_ref:   (98,)                  SMEM  - conv weights flattened [c*49 + ki*7 + kj]
    bn_ref:  (2,)                   SMEM  - folded BatchNorm (scale, bias)
    out_ref: (B, C, H*W)            VMEM
    pad_ref: (B, 2, H+6, W+6) f32   VMEM scratch (zero-padded pooled maps)
    """
    b_blk, c, hw = x_ref.shape
    hp = h + 2 * PAD
    wp = w + 2 * PAD

    x = x_ref[...]                                        # (B, C, H*W) native dtype

    # --- ChannelPool: max in the input dtype, mean accumulated in f32 ---
    x_max = jnp.max(x, axis=1)                            # (B, H*W) native dtype
    x_mean = jnp.sum(x, axis=1, dtype=jnp.float32) * jnp.float32(1.0 / c)

    # --- zero only the 3-wide borders of the padded scratch (interior is
    #     fully overwritten below); done every step (scratch is per-core). ---
    pad_ref[:, :, pl.ds(0, PAD), :] = jnp.zeros((b_blk, 2, PAD, wp), jnp.float32)
    pad_ref[:, :, pl.ds(PAD + h, PAD), :] = jnp.zeros((b_blk, 2, PAD, wp), jnp.float32)
    pad_ref[:, :, :, pl.ds(0, PAD)] = jnp.zeros((b_blk, 2, hp, PAD), jnp.float32)
    pad_ref[:, :, :, pl.ds(PAD + w, PAD)] = jnp.zeros((b_blk, 2, hp, PAD), jnp.float32)

    # --- pooled maps -> padded scratch: one reshape + one 2-D store each ---
    pad_ref[:, 0, pl.ds(PAD, h), pl.ds(PAD, w)] = (
        x_max.reshape(b_blk, h, w).astype(jnp.float32))
    pad_ref[:, 1, pl.ds(PAD, h), pl.ds(PAD, w)] = x_mean.reshape(b_blk, h, w)

    # --- 7x7 conv, 2 -> 1 channels, no bias, kept on the VPU.
    #     Lane shifts hoisted per (channel, kj); inner ki loop is sublane-only. ---
    acc = jnp.zeros((b_blk, h, w), jnp.float32)
    for ch in range(2):
        for kj in range(KSIZE):
            shifted = pad_ref[:, ch, :, pl.ds(kj, w)]     # (B, H+6, W): one lane shift
            for ki in range(KSIZE):
                wt = w_ref[ch * KSIZE * KSIZE + ki * KSIZE + kj]   # SMEM scalar
                acc = acc + wt * shifted[:, ki:ki + h, :]          # sublane offset only

    # --- folded BatchNorm (eval), no ReLU, sigmoid; rebuild lane-dense gate ---
    gate = jax.nn.sigmoid(acc * bn_ref[0] + bn_ref[1])    # (B, H, W) f32
    gate_flat = gate.reshape(b_blk, 1, hw)                # single relayout

    # --- broadcast multiply in the input dtype, full-lane store ---
    out_ref[...] = (x * gate_flat.astype(x.dtype)).astype(out_ref.dtype)


def _round_up(value, multiple):
    return (value + multiple - 1) // multiple * multiple


def spatial_gate(x, conv_w, bn_gamma, bn_beta, bn_mean, bn_var, eps=1e-5):
    """x: (N, C, H, W); conv_w: (1, 2, 7, 7) OIHW; BN params for the 1 out channel."""
    n, c, h, w = x.shape
    hw = h * w

    # Fold BN into scalar scale/bias (glue, plain JAX).
    bn_scale = bn_gamma / jnp.sqrt(bn_var + eps)
    bn_bias = bn_beta - bn_mean * bn_scale
    bn_params = jnp.stack([bn_scale, bn_bias]).reshape(2).astype(jnp.float32)   # (2,)
    w_flat = conv_w.astype(jnp.float32).reshape(2 * KSIZE * KSIZE)              # (98,)

    x_flat = x.reshape(n, c, hw)   # free wrapper-side reshape -> lane-dense layout

    # --- generation-aware VMEM limit (v7x has only 64 MiB physical VMEM) ---
    try:
        vmem_cap = int(pltpu.get_tpu_info().vmem_capacity_bytes)
    except Exception:  # pragma: no cover - conservative fallback
        vmem_cap = 128 * 1024 * 1024
    vmem_limit = min(64 * 1024 * 1024, (vmem_cap * 3) // 4)

    # --- samples per grid step: aim for >= ~2 MB blocks, keep >= 2 grid steps
    #     (pipelining / 2-TC balance), stay well inside the VMEM limit. ---
    itemsize = jnp.dtype(x.dtype).itemsize
    sublanes = max(8, 32 // max(itemsize, 1))   # 8 for f32, 16 for bf16, 32 for int8
    block_bytes_per_sample = (
        _round_up(c, sublanes) * _round_up(hw, 128) * itemsize            # x / out tile
        + 2 * _round_up(h + 2 * PAD, 8) * _round_up(w + 2 * PAD, 128) * 4)  # pad scratch
    b_blk = max(1, (2 * 1024 * 1024) // block_bytes_per_sample)
    b_blk = min(b_blk, n)
    if n >= 2:
        b_blk = max(1, min(b_blk, n // 2))
    # in (2x double-buffered) + out (2x) + scratch + f32 temporaries headroom
    b_blk = min(b_blk, max(1, (vmem_limit // 8) // block_bytes_per_sample))
    while n % b_blk:
        b_blk -= 1

    kernel = functools.partial(_spatial_gate_kernel, h=h, w=w)
    out_flat = pl.pallas_call(
        kernel,
        out_shape=jax.ShapeDtypeStruct((n, c, hw), x.dtype),
        grid=(n // b_blk,),
        in_specs=[
            pl.BlockSpec((b_blk, c, hw), lambda b: (b, 0, 0)),          # x (VMEM)
            pl.BlockSpec(memory_space=pltpu.MemorySpace.SMEM),          # conv weights
            pl.BlockSpec(memory_space=pltpu.MemorySpace.SMEM),          # bn scale/bias
        ],
        out_specs=pl.BlockSpec((b_blk, c, hw), lambda b: (b, 0, 0)),
        scratch_shapes=[
            pltpu.VMEM((b_blk, 2, h + 2 * PAD, w + 2 * PAD), jnp.float32)],
        compiler_params=pltpu.CompilerParams(
            dimension_semantics=("parallel",),
            vmem_limit_bytes=vmem_limit,
        ),
    )(x_flat, w_flat, bn_params)
    return out_flat.reshape(n, c, h, w)


def spatial_gate_reference(x, conv_w, bn_gamma, bn_beta, bn_mean, bn_var, eps=1e-5):
    """Plain-JAX reference for sanity checking."""
    pooled = jnp.concatenate(
        [jnp.max(x, axis=1, keepdims=True), jnp.mean(x, axis=1, keepdims=True)],
        axis=1)
    conv = lax.conv_general_dilated(
        pooled, conv_w, window_strides=(1, 1),
        padding=[(PAD, PAD), (PAD, PAD)],
        dimension_numbers=("NCHW", "OIHW", "NCHW"))
    bn = (conv - bn_mean) / jnp.sqrt(bn_var + eps) * bn_gamma + bn_beta
    return x * jax.nn.sigmoid(bn)


if __name__ == "__main__":
    key = jax.random.PRNGKey(0)
    kx, kw = jax.random.split(key)

    N, C, H, W = 2, 4, 16, 16
    x = jax.random.normal(kx, (N, C, H, W), dtype=jnp.float32)

    # Deterministic parameter init (shapes from BasicConv(2, 1, 7, padding=3,
    # relu=False, bn=True, bias=False)): conv weight (1, 2, 7, 7), BN on 1 ch.
    fan_in = 2 * KSIZE * KSIZE
    bound = 1.0 / math.sqrt(fan_in)
    conv_w = jax.random.uniform(
        kw, (1, 2, KSIZE, KSIZE), dtype=jnp.float32, minval=-bound, maxval=bound)
    bn_gamma = jnp.float32(1.0)
    bn_beta = jnp.float32(0.0)
    bn_mean = jnp.float32(0.0)
    bn_var = jnp.float32(1.0)

    out = spatial_gate(x, conv_w, bn_gamma, bn_beta, bn_mean, bn_var)
    out = jax.block_until_ready(out)

    ref = spatial_gate_reference(x, conv_w, bn_gamma, bn_beta, bn_mean, bn_var)
    assert out.shape == x.shape and out.dtype == x.dtype
    assert jnp.max(jnp.abs(out - ref)) < 1e-4, "mismatch vs reference"

    print("KERNEL_OK")
</pallas_src>

<mosaic_0001>
module attributes {stable_mosaic.version = 11 : i64} {
  func.func @_spatial_gate_kernel(%arg0: i32, %arg1: memref<1x4x256xf32, #tpu.memory_space<vmem>>, %arg2: memref<98xf32, #tpu.memory_space<smem>>, %arg3: memref<2xf32, #tpu.memory_space<smem>>, %arg4: memref<1x4x256xf32, #tpu.memory_space<vmem>>, %arg5: memref<1x2x22x22xf32, #tpu.memory_space<vmem>>) attributes {dimension_semantics = [#tpu.dimension_semantics<parallel>], iteration_bounds = array<i64: 2>, scalar_prefetch = 0 : i64, scratch_operands = 1 : i64, tpu.core_type = #tpu.core_type<tc>, window_params = [{transform_indices = @transform_0, window_bounds = array<i64: 1, 4, 256>}, {transform_indices = @transform_1, window_bounds = array<i64: 98>}, {transform_indices = @transform_2, window_bounds = array<i64: 2>}, {transform_indices = @transform_3, window_bounds = array<i64: 1, 4, 256>}]} {
    %c0 = arith.constant 0 : index
    %c0_0 = arith.constant 0 : index
    %c0_1 = arith.constant 0 : index
    %0 = vector.load %arg1[%c0, %c0_0, %c0_1] : memref<1x4x256xf32, #tpu.memory_space<vmem>>, vector<1x4x256xf32>
    %cst = arith.constant dense<0xFF800000> : vector<1x256xf32>
    %1 = vector.multi_reduction <maximumf>, %0, %cst [1] : vector<1x4x256xf32> to vector<1x256xf32>
    %cst_2 = arith.constant dense<0.000000e+00> : vector<1x256xf32>
    %2 = vector.multi_reduction <add>, %0, %cst_2 [1] : vector<1x4x256xf32> to vector<1x256xf32>
    %cst_3 = arith.constant 2.500000e-01 : f32
    %3 = vector.broadcast %cst_3 : f32 to vector<1x256xf32>
    %4 = arith.mulf %2, %3 : vector<1x256xf32>
    %cst_4 = arith.constant 0.000000e+00 : f32
    %5 = vector.broadcast %cst_4 : f32 to vector<1x2x3x22xf32>
    %c0_5 = arith.constant 0 : index
    %c0_6 = arith.constant 0 : index
    %c0_7 = arith.constant 0 : index
    %c0_8 = arith.constant 0 : index
    %6 = vector.load %arg5[%c0_5, %c0_6, %c0_7, %c0_8] : memref<1x2x22x22xf32, #tpu.memory_space<vmem>>, vector<1x2x3x22xf32>
    tpu.vector_store %arg5[%c0_5, %c0_6, %c0_7, %c0_8], %5 {strides = array<i32>} : memref<1x2x22x22xf32, #tpu.memory_space<vmem>>, vector<1x2x3x22xf32>,
    %cst_9 = arith.constant 0.000000e+00 : f32
    %7 = vector.broadcast %cst_9 : f32 to vector<1x2x3x22xf32>
    %c0_10 = arith.constant 0 : index
    %c0_11 = arith.constant 0 : index
    %c19 = arith.constant 19 : index
    %c0_12 = arith.constant 0 : index
    %8 = vector.load %arg5[%c0_10, %c0_11, %c19, %c0_12] : memref<1x2x22x22xf32, #tpu.memory_space<vmem>>, vector<1x2x3x22xf32>
    tpu.vector_store %arg5[%c0_10, %c0_11, %c19, %c0_12], %7 {strides = array<i32>} : memref<1x2x22x22xf32, #tpu.memory_space<vmem>>, vector<1x2x3x22xf32>,
    %cst_13 = arith.constant 0.000000e+00 : f32
    %9 = vector.broadcast %cst_13 : f32 to vector<1x2x22x3xf32>
    %c0_14 = arith.constant 0 : index
    %c0_15 = arith.constant 0 : index
    %c0_16 = arith.constant 0 : index
    %c0_17 = arith.constant 0 : index
    %10 = vector.load %arg5[%c0_14, %c0_15, %c0_16, %c0_17] : memref<1x2x22x22xf32, #tpu.memory_space<vmem>>, vector<1x2x22x3xf32>
    tpu.vector_store %arg5[%c0_14, %c0_15, %c0_16, %c0_17], %9 {strides = array<i32>} : memref<1x2x22x22xf32, #tpu.memory_space<vmem>>, vector<1x2x22x3xf32>,
    %cst_18 = arith.constant 0.000000e+00 : f32
    %11 = vector.broadcast %cst_18 : f32 to vector<1x2x22x3xf32>
    %c0_19 = arith.constant 0 : index
    %c0_20 = arith.constant 0 : index
    %c0_21 = arith.constant 0 : index
    %c19_22 = arith.constant 19 : index
    %12 = vector.load %arg5[%c0_19, %c0_20, %c0_21, %c19_22] : memref<1x2x22x22xf32, #tpu.memory_space<vmem>>, vector<1x2x22x3xf32>
    tpu.vector_store %arg5[%c0_19, %c0_20, %c0_21, %c19_22], %11 {strides = array<i32>} : memref<1x2x22x22xf32, #tpu.memory_space<vmem>>, vector<1x2x22x3xf32>,
    %13 = vector.shape_cast %1 : vector<1x256xf32> to vector<1x16x16xf32>
    %c0_23 = arith.constant 0 : index
    %c0_24 = arith.constant 0 : index
    %c3 = arith.constant 3 : index
    %c3_25 = arith.constant 3 : index
    %14 = vector.load %arg5[%c0_23, %c0_24, %c3, %c3_25] : memref<1x2x22x22xf32, #tpu.memory_space<vmem>>, vector<1x1x16x16xf32>
    %15 = vector.shape_cast %14 : vector<1x1x16x16xf32> to vector<1x16x16xf32>
    %16 = vector.shape_cast %13 : vector<1x16x16xf32> to vector<1x1x16x16xf32>
    tpu.vector_store %arg5[%c0_23, %c0_24, %c3, %c3_25], %16 {strides = array<i32>} : memref<1x2x22x22xf32, #tpu.memory_space<vmem>>, vector<1x1x16x16xf32>,
    %17 = vector.shape_cast %4 : vector<1x256xf32> to vector<1x16x16xf32>
    %c0_26 = arith.constant 0 : index
    %c1 = arith.constant 1 : index
    %c3_27 = arith.constant 3 : index
    %c3_28 = arith.constant 3 : index
    %18 = vector.load %arg5[%c0_26, %c1, %c3_27, %c3_28] : memref<1x2x22x22xf32, #tpu.memory_space<vmem>>, vector<1x1x16x16xf32>
    %19 = vector.shape_cast %18 : vector<1x1x16x16xf32> to vector<1x16x16xf32>
    %20 = vector.shape_cast %17 : vector<1x16x16xf32> to vector<1x1x16x16xf32>
    tpu.vector_store %arg5[%c0_26, %c1, %c3_27, %c3_28], %20 {strides = array<i32>} : memref<1x2x22x22xf32, #tpu.memory_space<vmem>>, vector<1x1x16x16xf32>,
    %cst_29 = arith.constant 0.000000e+00 : f32
    %21 = vector.broadcast %cst_29 : f32 to vector<1x16x16xf32>
    %c0_30 = arith.constant 0 : index
    %c0_31 = arith.constant 0 : index
    %c0_32 = arith.constant 0 : index
    %c0_33 = arith.constant 0 : index
    %22 = vector.load %arg5[%c0_30, %c0_31, %c0_32, %c0_33] : memref<1x2x22x22xf32, #tpu.memory_space<vmem>>, vector<1x1x22x16xf32>
    %23 = vector.shape_cast %22 : vector<1x1x22x16xf32> to vector<1x22x16xf32>
    %c0_34 = arith.constant 0 : index
    %24 = memref.load %arg2[%c0_34] : memref<98xf32, #tpu.memory_space<smem>>
    %25 = vector.extract_strided_slice %23 {offsets = [0, 0, 0], sizes = [1, 16, 16], strides = [1, 1, 1]} : vector<1x22x16xf32> to vector<1x16x16xf32>
    %26 = vector.broadcast %24 : f32 to vector<1x16x16xf32>
    %27 = arith.mulf %26, %25 : vector<1x16x16xf32>
    %28 = arith.addf %21, %27 : vector<1x16x16xf32>
    %c7 = arith.constant 7 : index
    %29 = memref.load %arg2[%c7] : memref<98xf32, #tpu.memory_space<smem>>
    %30 = vector.extract_strided_slice %23 {offsets = [0, 1, 0], sizes = [1, 16, 16], strides = [1, 1, 1]} : vector<1x22x16xf32> to vector<1x16x16xf32>
    %31 = vector.broadcast %29 : f32 to vector<1x16x16xf32>
    %32 = arith.mulf %31, %30 : vector<1x16x16xf32>
    %33 = arith.addf %28, %32 : vector<1x16x16xf32>
    %c14 = arith.constant 14 : index
    %34 = memref.load %arg2[%c14] : memref<98xf32, #tpu.memory_space<smem>>
    %35 = vector.extract_strided_slice %23 {offsets = [0, 2, 0], sizes = [1, 16, 16], strides = [1, 1, 1]} : vector<1x22x16xf32> to vector<1x16x16xf32>
    %36 = vector.broadcast %34 : f32 to vector<1x16x16xf32>
    %37 = arith.mulf %36, %35 : vector<1x16x16xf32>
    %38 = arith.addf %33, %37 : vector<1x16x16xf32>
    %c21 = arith.constant 21 : index
    %39 = memref.load %arg2[%c21] : memref<98xf32, #tpu.memory_space<smem>>
    %40 = vector.extract_strided_slice %23 {offsets = [0, 3, 0], sizes = [1, 16, 16], strides = [1, 1, 1]} : vector<1x22x16xf32> to vector<1x16x16xf32>
    %41 = vector.broadcast %39 : f32 to vector<1x16x16xf32>
    %42 = arith.mulf %41, %40 : vector<1x16x16xf32>
    %43 = arith.addf %38, %42 : vector<1x16x16xf32>
    %c28 = arith.constant 28 : index
    %44 = memref.load %arg2[%c28] : memref<98xf32, #tpu.memory_space<smem>>
    %45 = vector.extract_strided_slice %23 {offsets = [0, 4, 0], sizes = [1, 16, 16], strides = [1, 1, 1]} : vector<1x22x16xf32> to vector<1x16x16xf32>
    %46 = vector.broadcast %44 : f32 to vector<1x16x16xf32>
    %47 = arith.mulf %46, %45 : vector<1x16x16xf32>
    %48 = arith.addf %43, %47 : vector<1x16x16xf32>
    %c35 = arith.constant 35 : index
    %49 = memref.load %arg2[%c35] : memref<98xf32, #tpu.memory_space<smem>>
    %50 = vector.extract_strided_slice %23 {offsets = [0, 5, 0], sizes = [1, 16, 16], strides = [1, 1, 1]} : vector<1x22x16xf32> to vector<1x16x16xf32>
    %51 = vector.broadcast %49 : f32 to vector<1x16x16xf32>
    %52 = arith.mulf %51, %50 : vector<1x16x16xf32>
    %53 = arith.addf %48, %52 : vector<1x16x16xf32>
    %c42 = arith.constant 42 : index
    %54 = memref.load %arg2[%c42] : memref<98xf32, #tpu.memory_space<smem>>
    %55 = vector.extract_strided_slice %23 {offsets = [0, 6, 0], sizes = [1, 16, 16], strides = [1, 1, 1]} : vector<1x22x16xf32> to vector<1x16x16xf32>
    %56 = vector.broadcast %54 : f32 to vector<1x16x16xf32>
    %57 = arith.mulf %56, %55 : vector<1x16x16xf32>
    %58 = arith.addf %53, %57 : vector<1x16x16xf32>
    %c0_35 = arith.constant 0 : index
    %c0_36 = arith.constant 0 : index
    %c0_37 = arith.constant 0 : index
    %c1_38 = arith.constant 1 : index
    %59 = vector.load %arg5[%c0_35, %c0_36, %c0_37, %c1_38] : memref<1x2x22x22xf32, #tpu.memory_space<vmem>>, vector<1x1x22x16xf32>
    %60 = vector.shape_cast %59 : vector<1x1x22x16xf32> to vector<1x22x16xf32>
    %c1_39 = arith.constant 1 : index
    %61 = memref.load %arg2[%c1_39] : memref<98xf32, #tpu.memory_space<smem>>
    %62 = vector.extract_strided_slice %60 {offsets = [0, 0, 0], sizes = [1, 16, 16], strides = [1, 1, 1]} : vector<1x22x16xf32> to vector<1x16x16xf32>
    %63 = vector.broadcast %61 : f32 to vector<1x16x16xf32>
    %64 = arith.mulf %63, %62 : vector<1x16x16xf32>
    %65 = arith.addf %58, %64 : vector<1x16x16xf32>
    %c8 = arith.constant 8 : index
    %66 = memref.load %arg2[%c8] : memref<98xf32, #tpu.memory_space<smem>>
    %67 = vector.extract_strided_slice %60 {offsets = [0, 1, 0], sizes = [1, 16, 16], strides = [1, 1, 1]} : vector<1x22x16xf32> to vector<1x16x16xf32>
    %68 = vector.broadcast %66 : f32 to vector<1x16x16xf32>
    %69 = arith.mulf %68, %67 : vector<1x16x16xf32>
    %70 = arith.addf %65, %69 : vector<1x16x16xf32>
    %c15 = arith.constant 15 : index
    %71 = memref.load %arg2[%c15] : memref<98xf32, #tpu.memory_space<smem>>
    %72 = vector.extract_strided_slice %60 {offsets = [0, 2, 0], sizes = [1, 16, 16], strides = [1, 1, 1]} : vector<1x22x16xf32> to vector<1x16x16xf32>
    %73 = vector.broadcast %71 : f32 to vector<1x16x16xf32>
    %74 = arith.mulf %73, %72 : vector<1x16x16xf32>
    %75 = arith.addf %70, %74 : vector<1x16x16xf32>
    %c22 = arith.constant 22 : index
    %76 = memref.load %arg2[%c22] : memref<98xf32, #tpu.memory_space<smem>>
    %77 = vector.extract_strided_slice %60 {offsets = [0, 3, 0], sizes = [1, 16, 16], strides = [1, 1, 1]} : vector<1x22x16xf32> to vector<1x16x16xf32>
    %78 = vector.broadcast %76 : f32 to vector<1x16x16xf32>
    %79 = arith.mulf %78, %77 : vector<1x16x16xf32>
    %80 = arith.addf %75, %79 : vector<1x16x16xf32>
    %c29 = arith.constant 29 : index
    %81 = memref.load %arg2[%c29] : memref<98xf32, #tpu.memory_space<smem>>
    %82 = vector.extract_strided_slice %60 {offsets = [0, 4, 0], sizes = [1, 16, 16], strides = [1, 1, 1]} : vector<1x22x16xf32> to vector<1x16x16xf32>
    %83 = vector.broadcast %81 : f32 to vector<1x16x16xf32>
    %84 = arith.mulf %83, %82 : vector<1x16x16xf32>
    %85 = arith.addf %80, %84 : vector<1x16x16xf32>
    %c36 = arith.constant 36 : index
    %86 = memref.load %arg2[%c36] : memref<98xf32, #tpu.memory_space<smem>>
    %87 = vector.extract_strided_slice %60 {offsets = [0, 5, 0], sizes = [1, 16, 16], strides = [1, 1, 1]} : vector<1x22x16xf32> to vector<1x16x16xf32>
    %88 = vector.broadcast %86 : f32 to vector<1x16x16xf32>
    %89 = arith.mulf %88, %87 : vector<1x16x16xf32>
    %90 = arith.addf %85, %89 : vector<1x16x16xf32>
    %c43 = arith.constant 43 : index
    %91 = memref.load %arg2[%c43] : memref<98xf32, #tpu.memory_space<smem>>
    %92 = vector.extract_strided_slice %60 {offsets = [0, 6, 0], sizes = [1, 16, 16], strides = [1, 1, 1]} : vector<1x22x16xf32> to vector<1x16x16xf32>
    %93 = vector.broadcast %91 : f32 to vector<1x16x16xf32>
    %94 = arith.mulf %93, %92 : vector<1x16x16xf32>
    %95 = arith.addf %90, %94 : vector<1x16x16xf32>
    %c0_40 = arith.constant 0 : index
    %c0_41 = arith.constant 0 : index
    %c0_42 = arith.constant 0 : index
    %c2 = arith.constant 2 : index
    %96 = vector.load %arg5[%c0_40, %c0_41, %c0_42, %c2] : memref<1x2x22x22xf32, #tpu.memory_space<vmem>>, vector<1x1x22x16xf32>
    %97 = vector.shape_cast %96 : vector<1x1x22x16xf32> to vector<1x22x16xf32>
    %c2_43 = arith.constant 2 : index
    %98 = memref.load %arg2[%c2_43] : memref<98xf32, #tpu.memory_space<smem>>
    %99 = vector.extract_strided_slice %97 {offsets = [0, 0, 0], sizes = [1, 16, 16], strides = [1, 1, 1]} : vector<1x22x16xf32> to vector<1x16x16xf32>
    %100 = vector.broadcast %98 : f32 to vector<1x16x16xf32>
    %101 = arith.mulf %100, %99 : vector<1x16x16xf32>
    %102 = arith.addf %95, %101 : vector<1x16x16xf32>
    %c9 = arith.constant 9 : index
    %103 = memref.load %arg2[%c9] : memref<98xf32, #tpu.memory_space<smem>>
    %104 = vector.extract_strided_slice %97 {offsets = [0, 1, 0], sizes = [1, 16, 16], strides = [1, 1, 1]} : vector<1x22x16xf32> to vector<1x16x16xf32>
    %105 = vector.broadcast %103 : f32 to vector<1x16x16xf32>
    %106 = arith.mulf %105, %104 : vector<1x16x16xf32>
    %107 = arith.addf %102, %106 : vector<1x16x16xf32>
    %c16 = arith.constant 16 : index
    %108 = memref.load %arg2[%c16] : memref<98xf32, #tpu.memory_space<smem>>
    %109 = vector.extract_strided_slice %97 {offsets = [0, 2, 0], sizes = [1, 16, 16], strides = [1, 1, 1]} : vector<1x22x16xf32> to vector<1x16x16xf32>
    %110 = vector.broadcast %108 : f32 to vector<1x16x16xf32>
    %111 = arith.mulf %110, %109 : vector<1x16x16xf32>
    %112 = arith.addf %107, %111 : vector<1x16x16xf32>
    %c23 = arith.constant 23 : index
    %113 = memref.load %arg2[%c23] : memref<98xf32, #tpu.memory_space<smem>>
    %114 = vector.extract_strided_slice %97 {offsets = [0, 3, 0], sizes = [1, 16, 16], strides = [1, 1, 1]} : vector<1x22x16xf32> to vector<1x16x16xf32>
    %115 = vector.broadcast %113 : f32 to vector<1x16x16xf32>
    %116 = arith.mulf %115, %114 : vector<1x16x16xf32>
    %117 = arith.addf %112, %116 : vector<1x16x16xf32>
    %c30 = arith.constant 30 : index
    %118 = memref.load %arg2[%c30] : memref<98xf32, #tpu.memory_space<smem>>
    %119 = vector.extract_strided_slice %97 {offsets = [0, 4, 0], sizes = [1, 16, 16], strides = [1, 1, 1]} : vector<1x22x16xf32> to vector<1x16x16xf32>
    %120 = vector.broadcast %118 : f32 to vector<1x16x16xf32>
    %121 = arith.mulf %120, %119 : vector<1x16x16xf32>
    %122 = arith.addf %117, %121 : vector<1x16x16xf32>
    %c37 = arith.constant 37 : index
    %123 = memref.load %arg2[%c37] : memref<98xf32, #tpu.memory_space<smem>>
    %124 = vector.extract_strided_slice %97 {offsets = [0, 5, 0], sizes = [1, 16, 16], strides = [1, 1, 1]} : vector<1x22x16xf32> to vector<1x16x16xf32>
    %125 = vector.broadcast %123 : f32 to vector<1x16x16xf32>
    %126 = arith.mulf %125, %124 : vector<1x16x16xf32>
    %127 = arith.addf %122, %126 : vector<1x16x16xf32>
    %c44 = arith.constant 44 : index
    %128 = memref.load %arg2[%c44] : memref<98xf32, #tpu.memory_space<smem>>
    %129 = vector.extract_strided_slice %97 {offsets = [0, 6, 0], sizes = [1, 16, 16], strides = [1, 1, 1]} : vector<1x22x16xf32> to vector<1x16x16xf32>
    %130 = vector.broadcast %128 : f32 to vector<1x16x16xf32>
    %131 = arith.mulf %130, %129 : vector<1x16x16xf32>
    %132 = arith.addf %127, %131 : vector<1x16x16xf32>
    %c0_44 = arith.constant 0 : index
    %c0_45 = arith.constant 0 : index
    %c0_46 = arith.constant 0 : index
    %c3_47 = arith.constant 3 : index
    %133 = vector.load %arg5[%c0_44, %c0_45, %c0_46, %c3_47] : memref<1x2x22x22xf32, #tpu.memory_space<vmem>>, vector<1x1x22x16xf32>
    %134 = vector.shape_cast %133 : vector<1x1x22x16xf32> to vector<1x22x16xf32>
    %c3_48 = arith.constant 3 : index
    %135 = memref.load %arg2[%c3_48] : memref<98xf32, #tpu.memory_space<smem>>
    %136 = vector.extract_strided_slice %134 {offsets = [0, 0, 0], sizes = [1, 16, 16], strides = [1, 1, 1]} : vector<1x22x16xf32> to vector<1x16x16xf32>
    %137 = vector.broadcast %135 : f32 to vector<1x16x16xf32>
    %138 = arith.mulf %137, %136 : vector<1x16x16xf32>
    %139 = arith.addf %132, %138 : vector<1x16x16xf32>
    %c10 = arith.constant 10 : index
    %140 = memref.load %arg2[%c10] : memref<98xf32, #tpu.memory_space<smem>>
    %141 = vector.extract_strided_slice %134 {offsets = [0, 1, 0], sizes = [1, 16, 16], strides = [1, 1, 1]} : vector<1x22x16xf32> to vector<1x16x16xf32>
    %142 = vector.broadcast %140 : f32 to vector<1x16x16xf32>
    %143 = arith.mulf %142, %141 : vector<1x16x16xf32>
    %144 = arith.addf %139, %143 : vector<1x16x16xf32>
    %c17 = arith.constant 17 : index
    %145 = memref.load %arg2[%c17] : memref<98xf32, #tpu.memory_space<smem>>
    %146 = vector.extract_strided_slice %134 {offsets = [0, 2, 0], sizes = [1, 16, 16], strides = [1, 1, 1]} : vector<1x22x16xf32> to vector<1x16x16xf32>
    %147 = vector.broadcast %145 : f32 to vector<1x16x16xf32>
    %148 = arith.mulf %147, %146 : vector<1x16x16xf32>
    %149 = arith.addf %144, %148 : vector<1x16x16xf32>
    %c24 = arith.constant 24 : index
    %150 = memref.load %arg2[%c24] : memref<98xf32, #tpu.memory_space<smem>>
    %151 = vector.extract_strided_slice %134 {offsets = [0, 3, 0], sizes = [1, 16, 16], strides = [1, 1, 1]} : vector<1x22x16xf32> to vector<1x16x16xf32>
    %152 = vector.broadcast %150 : f32 to vector<1x16x16xf32>
    %153 = arith.mulf %152, %151 : vector<1x16x16xf32>
    %154 = arith.addf %149, %153 : vector<1x16x16xf32>
    %c31 = arith.constant 31 : index
    %155 = memref.load %arg2[%c31] : memref<98xf32, #tpu.memory_space<smem>>
    %156 = vector.extract_strided_slice %134 {offsets = [0, 4, 0], sizes = [1, 16, 16], strides = [1, 1, 1]} : vector<1x22x16xf32> to vector<1x16x16xf32>
    %157 = vector.broadcast %155 : f32 to vector<1x16x16xf32>
    %158 = arith.mulf %157, %156 : vector<1x16x16xf32>
    %159 = arith.addf %154, %158 : vector<1x16x16xf32>
    %c38 = arith.constant 38 : index
    %160 = memref.load %arg2[%c38] : memref<98xf32, #tpu.memory_space<smem>>
    %161 = vector.extract_strided_slice %134 {offsets = [0, 5, 0], sizes = [1, 16, 16], strides = [1, 1, 1]} : vector<1x22x16xf32> to vector<1x16x16xf32>
    %162 = vector.broadcast %160 : f32 to vector<1x16x16xf32>
    %163 = arith.mulf %162, %161 : vector<1x16x16xf32>
    %164 = arith.addf %159, %163 : vector<1x16x16xf32>
    %c45 = arith.constant 45 : index
    %165 = memref.load %arg2[%c45] : memref<98xf32, #tpu.memory_space<smem>>
    %166 = vector.extract_strided_slice %134 {offsets = [0, 6, 0], sizes = [1, 16, 16], strides = [1, 1, 1]} : vector<1x22x16xf32> to vector<1x16x16xf32>
    %167 = vector.broadcast %165 : f32 to vector<1x16x16xf32>
    %168 = arith.mulf %167, %166 : vector<1x16x16xf32>
    %169 = arith.addf %164, %168 : vector<1x16x16xf32>
    %c0_49 = arith.constant 0 : index
    %c0_50 = arith.constant 0 : index
    %c0_51 = arith.constant 0 : index
    %c4 = arith.constant 4 : index
    %170 = vector.load %arg5[%c0_49, %c0_50, %c0_51, %c4] : memref<1x2x22x22xf32, #tpu.memory_space<vmem>>, vector<1x1x22x16xf32>
    %171 = vector.shape_cast %170 : vector<1x1x22x16xf32> to vector<1x22x16xf32>
    %c4_52 = arith.constant 4 : index
    %172 = memref.load %arg2[%c4_52] : memref<98xf32, #tpu.memory_space<smem>>
    %173 = vector.extract_strided_slice %171 {offsets = [0, 0, 0], sizes = [1, 16, 16], strides = [1, 1, 1]} : vector<1x22x16xf32> to vector<1x16x16xf32>
    %174 = vector.broadcast %172 : f32 to vector<1x16x16xf32>
    %175 = arith.mulf %174, %173 : vector<1x16x16xf32>
    %176 = arith.addf %169, %175 : vector<1x16x16xf32>
    %c11 = arith.constant 11 : index
    %177 = memref.load %arg2[%c11] : memref<98xf32, #tpu.memory_space<smem>>
    %178 = vector.extract_strided_slice %171 {offsets = [0, 1, 0], sizes = [1, 16, 16], strides = [1, 1, 1]} : vector<1x22x16xf32> to vector<1x16x16xf32>
    %179 = vector.broadcast %177 : f32 to vector<1x16x16xf32>
    %180 = arith.mulf %179, %178 : vector<1x16x16xf32>
    %181 = arith.addf %176, %180 : vector<1x16x16xf32>
    %c18 = arith.constant 18 : index
    %182 = memref.load %arg2[%c18] : memref<98xf32, #tpu.memory_space<smem>>
    %183 = vector.extract_strided_slice %171 {offsets = [0, 2, 0], sizes = [1, 16, 16], strides = [1, 1, 1]} : vector<1x22x16xf32> to vector<1x16x16xf32>
    %184 = vector.broadcast %182 : f32 to vector<1x16x16xf32>
    %185 = arith.mulf %184, %183 : vector<1x16x16xf32>
    %186 = arith.addf %181, %185 : vector<1x16x16xf32>
    %c25 = arith.constant 25 : index
    %187 = memref.load %arg2[%c25] : memref<98xf32, #tpu.memory_space<smem>>
    %188 = vector.extract_strided_slice %171 {offsets = [0, 3, 0], sizes = [1, 16, 16], strides = [1, 1, 1]} : vector<1x22x16xf32> to vector<1x16x16xf32>
    %189 = vector.broadcast %187 : f32 to vector<1x16x16xf32>
    %190 = arith.mulf %189, %188 : vector<1x16x16xf32>
    %191 = arith.addf %186, %190 : vector<1x16x16xf32>
    %c32 = arith.constant 32 : index
    %192 = memref.load %arg2[%c32] : memref<98xf32, #tpu.memory_space<smem>>
    %193 = vector.extract_strided_slice %171 {offsets = [0, 4, 0], sizes = [1, 16, 16], strides = [1, 1, 1]} : vector<1x22x16xf32> to vector<1x16x16xf32>
    %194 = vector.broadcast %192 : f32 to vector<1x16x16xf32>
    %195 = arith.mulf %194, %193 : vector<1x16x16xf32>
    %196 = arith.addf %191, %195 : vector<1x16x16xf32>
    %c39 = arith.constant 39 : index
    %197 = memref.load %arg2[%c39] : memref<98xf32, #tpu.memory_space<smem>>
    %198 = vector.extract_strided_slice %171 {offsets = [0, 5, 0], sizes = [1, 16, 16], strides = [1, 1, 1]} : vector<1x22x16xf32> to vector<1x16x16xf32>
    %199 = vector.broadcast %197 : f32 to vector<1x16x16xf32>
    %200 = arith.mulf %199, %198 : vector<1x16x16xf32>
    %201 = arith.addf %196, %200 : vector<1x16x16xf32>
    %c46 = arith.constant 46 : index
    %202 = memref.load %arg2[%c46] : memref<98xf32, #tpu.memory_space<smem>>
    %203 = vector.extract_strided_slice %171 {offsets = [0, 6, 0], sizes = [1, 16, 16], strides = [1, 1, 1]} : vector<1x22x16xf32> to vector<1x16x16xf32>
    %204 = vector.broadcast %202 : f32 to vector<1x16x16xf32>
    %205 = arith.mulf %204, %203 : vector<1x16x16xf32>
    %206 = arith.addf %201, %205 : vector<1x16x16xf32>
    %c0_53 = arith.constant 0 : index
    %c0_54 = arith.constant 0 : index
    %c0_55 = arith.constant 0 : index
    %c5 = arith.constant 5 : index
    %207 = vector.load %arg5[%c0_53, %c0_54, %c0_55, %c5] : memref<1x2x22x22xf32, #tpu.memory_space<vmem>>, vector<1x1x22x16xf32>
    %208 = vector.shape_cast %207 : vector<1x1x22x16xf32> to vector<1x22x16xf32>
    %c5_56 = arith.constant 5 : index
    %209 = memref.load %arg2[%c5_56] : memref<98xf32, #tpu.memory_space<smem>>
    %210 = vector.extract_strided_slice %208 {offsets = [0, 0, 0], sizes = [1, 16, 16], strides = [1, 1, 1]} : vector<1x22x16xf32> to vector<1x16x16xf32>
    %211 = vector.broadcast %209 : f32 to vector<1x16x16xf32>
    %212 = arith.mulf %211, %210 : vector<1x16x16xf32>
    %213 = arith.addf %206, %212 : vector<1x16x16xf32>
    %c12 = arith.constant 12 : index
    %214 = memref.load %arg2[%c12] : memref<98xf32, #tpu.memory_space<smem>>
    %215 = vector.extract_strided_slice %208 {offsets = [0, 1, 0], sizes = [1, 16, 16], strides = [1, 1, 1]} : vector<1x22x16xf32> to vector<1x16x16xf32>
    %216 = vector.broadcast %214 : f32 to vector<1x16x16xf32>
    %217 = arith.mulf %216, %215 : vector<1x16x16xf32>
    %218 = arith.addf %213, %217 : vector<1x16x16xf32>
    %c19_57 = arith.constant 19 : index
    %219 = memref.load %arg2[%c19_57] : memref<98xf32, #tpu.memory_space<smem>>
    %220 = vector.extract_strided_slice %208 {offsets = [0, 2, 0], sizes = [1, 16, 16], strides = [1, 1, 1]} : vector<1x22x16xf32> to vector<1x16x16xf32>
    %221 = vector.broadcast %219 : f32 to vector<1x16x16xf32>
    %222 = arith.mulf %221, %220 : vector<1x16x16xf32>
    %223 = arith.addf %218, %222 : vector<1x16x16xf32>
    %c26 = arith.constant 26 : index
    %224 = memref.load %arg2[%c26] : memref<98xf32, #tpu.memory_space<smem>>
    %225 = vector.extract_strided_slice %208 {offsets = [0, 3, 0], sizes = [1, 16, 16], strides = [1, 1, 1]} : vector<1x22x16xf32> to vector<1x16x16xf32>
    %226 = vector.broadcast %224 : f32 to vector<1x16x16xf32>
    %227 = arith.mulf %226, %225 : vector<1x16x16xf32>
    %228 = arith.addf %223, %227 : vector<1x16x16xf32>
    %c33 = arith.constant 33 : index
    %229 = memref.load %arg2[%c33] : memref<98xf32, #tpu.memory_space<smem>>
    %230 = vector.extract_strided_slice %208 {offsets = [0, 4, 0], sizes = [1, 16, 16], strides = [1, 1, 1]} : vector<1x22x16xf32> to vector<1x16x16xf32>
    %231 = vector.broadcast %229 : f32 to vector<1x16x16xf32>
    %232 = arith.mulf %231, %230 : vector<1x16x16xf32>
    %233 = arith.addf %228, %232 : vector<1x16x16xf32>
    %c40 = arith.constant 40 : index
    %234 = memref.load %arg2[%c40] : memref<98xf32, #tpu.memory_space<smem>>
    %235 = vector.extract_strided_slice %208 {offsets = [0, 5, 0], sizes = [1, 16, 16], strides = [1, 1, 1]} : vector<1x22x16xf32> to vector<1x16x16xf32>
    %236 = vector.broadcast %234 : f32 to vector<1x16x16xf32>
    %237 = arith.mulf %236, %235 : vector<1x16x16xf32>
    %238 = arith.addf %233, %237 : vector<1x16x16xf32>
    %c47 = arith.constant 47 : index
    %239 = memref.load %arg2[%c47] : memref<98xf32, #tpu.memory_space<smem>>
    %240 = vector.extract_strided_slice %208 {offsets = [0, 6, 0], sizes = [1, 16, 16], strides = [1, 1, 1]} : vector<1x22x16xf32> to vector<1x16x16xf32>
    %241 = vector.broadcast %239 : f32 to vector<1x16x16xf32>
    %242 = arith.mulf %241, %240 : vector<1x16x16xf32>
    %243 = arith.addf %238, %242 : vector<1x16x16xf32>
    %c0_58 = arith.constant 0 : index
    %c0_59 = arith.constant 0 : index
    %c0_60 = arith.constant 0 : index
    %c6 = arith.constant 6 : index
    %244 = vector.load %arg5[%c0_58, %c0_59, %c0_60, %c6] : memref<1x2x22x22xf32, #tpu.memory_space<vmem>>, vector<1x1x22x16xf32>
    %245 = vector.shape_cast %244 : vector<1x1x22x16xf32> to vector<1x22x16xf32>
    %c6_61 = arith.constant 6 : index
    %246 = memref.load %arg2[%c6_61] : memref<98xf32, #tpu.memory_space<smem>>
    %247 = vector.extract_strided_slice %245 {offsets = [0, 0, 0], sizes = [1, 16, 16], strides = [1, 1, 1]} : vector<1x22x16xf32> to vector<1x16x16xf32>
    %248 = vector.broadcast %246 : f32 to vector<1x16x16xf32>
    %249 = arith.mulf %248, %247 : vector<1x16x16xf32>
    %250 = arith.addf %243, %249 : vector<1x16x16xf32>
    %c13 = arith.constant 13 : index
    %251 = memref.load %arg2[%c13] : memref<98xf32, #tpu.memory_space<smem>>
    %252 = vector.extract_strided_slice %245 {offsets = [0, 1, 0], sizes = [1, 16, 16], strides = [1, 1, 1]} : vector<1x22x16xf32> to vector<1x16x16xf32>
    %253 = vector.broadcast %251 : f32 to vector<1x16x16xf32>
    %254 = arith.mulf %253, %252 : vector<1x16x16xf32>
    %255 = arith.addf %250, %254 : vector<1x16x16xf32>
    %c20 = arith.constant 20 : index
    %256 = memref.load %arg2[%c20] : memref<98xf32, #tpu.memory_space<smem>>
    %257 = vector.extract_strided_slice %245 {offsets = [0, 2, 0], sizes = [1, 16, 16], strides = [1, 1, 1]} : vector<1x22x16xf32> to vector<1x16x16xf32>
    %258 = vector.broadcast %256 : f32 to vector<1x16x16xf32>
    %259 = arith.mulf %258, %257 : vector<1x16x16xf32>
    %260 = arith.addf %255, %259 : vector<1x16x16xf32>
    %c27 = arith.constant 27 : index
    %261 = memref.load %arg2[%c27] : memref<98xf32, #tpu.memory_space<smem>>
    %262 = vector.extract_strided_slice %245 {offsets = [0, 3, 0], sizes = [1, 16, 16], strides = [1, 1, 1]} : vector<1x22x16xf32> to vector<1x16x16xf32>
    %263 = vector.broadcast %261 : f32 to vector<1x16x16xf32>
    %264 = arith.mulf %263, %262 : vector<1x16x16xf32>
    %265 = arith.addf %260, %264 : vector<1x16x16xf32>
    %c34 = arith.constant 34 : index
    %266 = memref.load %arg2[%c34] : memref<98xf32, #tpu.memory_space<smem>>
    %267 = vector.extract_strided_slice %245 {offsets = [0, 4, 0], sizes = [1, 16, 16], strides = [1, 1, 1]} : vector<1x22x16xf32> to vector<1x16x16xf32>
    %268 = vector.broadcast %266 : f32 to vector<1x16x16xf32>
    %269 = arith.mulf %268, %267 : vector<1x16x16xf32>
    %270 = arith.addf %265, %269 : vector<1x16x16xf32>
    %c41 = arith.constant 41 : index
    %271 = memref.load %arg2[%c41] : memref<98xf32, #tpu.memory_space<smem>>
    %272 = vector.extract_strided_slice %245 {offsets = [0, 5, 0], sizes = [1, 16, 16], strides = [1, 1, 1]} : vector<1x22x16xf32> to vector<1x16x16xf32>
    %273 = vector.broadcast %271 : f32 to vector<1x16x16xf32>
    %274 = arith.mulf %273, %272 : vector<1x16x16xf32>
    %275 = arith.addf %270, %274 : vector<1x16x16xf32>
    %c48 = arith.constant 48 : index
    %276 = memref.load %arg2[%c48] : memref<98xf32, #tpu.memory_space<smem>>
    %277 = vector.extract_strided_slice %245 {offsets = [0, 6, 0], sizes = [1, 16, 16], strides = [1, 1, 1]} : vector<1x22x16xf32> to vector<1x16x16xf32>
    %278 = vector.broadcast %276 : f32 to vector<1x16x16xf32>
    %279 = arith.mulf %278, %277 : vector<1x16x16xf32>
    %280 = arith.addf %275, %279 : vector<1x16x16xf32>
    %c0_62 = arith.constant 0 : index
    %c1_63 = arith.constant 1 : index
    %c0_64 = arith.constant 0 : index
    %c0_65 = arith.constant 0 : index
    %281 = vector.load %arg5[%c0_62, %c1_63, %c0_64, %c0_65] : memref<1x2x22x22xf32, #tpu.memory_space<vmem>>, vector<1x1x22x16xf32>
    %282 = vector.shape_cast %281 : vector<1x1x22x16xf32> to vector<1x22x16xf32>
    %c49 = arith.constant 49 : index
    %283 = memref.load %arg2[%c49] : memref<98xf32, #tpu.memory_space<smem>>
    %284 = vector.extract_strided_slice %282 {offsets = [0, 0, 0], sizes = [1, 16, 16], strides = [1, 1, 1]} : vector<1x22x16xf32> to vector<1x16x16xf32>
    %285 = vector.broadcast %283 : f32 to vector<1x16x16xf32>
    %286 = arith.mulf %285, %284 : vector<1x16x16xf32>
    %287 = arith.addf %280, %286 : vector<1x16x16xf32>
    %c56 = arith.constant 56 : index
    %288 = memref.load %arg2[%c56] : memref<98xf32, #tpu.memory_space<smem>>
    %289 = vector.extract_strided_slice %282 {offsets = [0, 1, 0], sizes = [1, 16, 16], strides = [1, 1, 1]} : vector<1x22x16xf32> to vector<1x16x16xf32>
    %290 = vector.broadcast %288 : f32 to vector<1x16x16xf32>
    %291 = arith.mulf %290, %289 : vector<1x16x16xf32>
    %292 = arith.addf %287, %291 : vector<1x16x16xf32>
    %c63 = arith.constant 63 : index
    %293 = memref.load %arg2[%c63] : memref<98xf32, #tpu.memory_space<smem>>
    %294 = vector.extract_strided_slice %282 {offsets = [0, 2, 0], sizes = [1, 16, 16], strides = [1, 1, 1]} : vector<1x22x16xf32> to vector<1x16x16xf32>
    %295 = vector.broadcast %293 : f32 to vector<1x16x16xf32>
    %296 = arith.mulf %295, %294 : vector<1x16x16xf32>
    %297 = arith.addf %292, %296 : vector<1x16x16xf32>
    %c70 = arith.constant 70 : index
    %298 = memref.load %arg2[%c70] : memref<98xf32, #tpu.memory_space<smem>>
    %299 = vector.extract_strided_slice %282 {offsets = [0, 3, 0], sizes = [1, 16, 16], strides = [1, 1, 1]} : vector<1x22x16xf32> to vector<1x16x16xf32>
    %300 = vector.broadcast %298 : f32 to vector<1x16x16xf32>
    %301 = arith.mulf %300, %299 : vector<1x16x16xf32>
    %302 = arith.addf %297, %301 : vector<1x16x16xf32>
    %c77 = arith.constant 77 : index
    %303 = memref.load %arg2[%c77] : memref<98xf32, #tpu.memory_space<smem>>
    %304 = vector.extract_strided_slice %282 {offsets = [0, 4, 0], sizes = [1, 16, 16], strides = [1, 1, 1]} : vector<1x22x16xf32> to vector<1x16x16xf32>
    %305 = vector.broadcast %303 : f32 to vector<1x16x16xf32>
    %306 = arith.mulf %305, %304 : vector<1x16x16xf32>
    %307 = arith.addf %302, %306 : vector<1x16x16xf32>
    %c84 = arith.constant 84 : index
    %308 = memref.load %arg2[%c84] : memref<98xf32, #tpu.memory_space<smem>>
    %309 = vector.extract_strided_slice %282 {offsets = [0, 5, 0], sizes = [1, 16, 16], strides = [1, 1, 1]} : vector<1x22x16xf32> to vector<1x16x16xf32>
    %310 = vector.broadcast %308 : f32 to vector<1x16x16xf32>
    %311 = arith.mulf %310, %309 : vector<1x16x16xf32>
    %312 = arith.addf %307, %311 : vector<1x16x16xf32>
    %c91 = arith.constant 91 : index
    %313 = memref.load %arg2[%c91] : memref<98xf32, #tpu.memory_space<smem>>
    %314 = vector.extract_strided_slice %282 {offsets = [0, 6, 0], sizes = [1, 16, 16], strides = [1, 1, 1]} : vector<1x22x16xf32> to vector<1x16x16xf32>
    %315 = vector.broadcast %313 : f32 to vector<1x16x16xf32>
    %316 = arith.mulf %315, %314 : vector<1x16x16xf32>
    %317 = arith.addf %312, %316 : vector<1x16x16xf32>
    %c0_66 = arith.constant 0 : index
    %c1_67 = arith.constant 1 : index
    %c0_68 = arith.constant 0 : index
    %c1_69 = arith.constant 1 : index
    %318 = vector.load %arg5[%c0_66, %c1_67, %c0_68, %c1_69] : memref<1x2x22x22xf32, #tpu.memory_space<vmem>>, vector<1x1x22x16xf32>
    %319 = vector.shape_cast %318 : vector<1x1x22x16xf32> to vector<1x22x16xf32>
    %c50 = arith.constant 50 : index
    %320 = memref.load %arg2[%c50] : memref<98xf32, #tpu.memory_space<smem>>
    %321 = vector.extract_strided_slice %319 {offsets = [0, 0, 0], sizes = [1, 16, 16], strides = [1, 1, 1]} : vector<1x22x16xf32> to vector<1x16x16xf32>
    %322 = vector.broadcast %320 : f32 to vector<1x16x16xf32>
    %323 = arith.mulf %322, %321 : vector<1x16x16xf32>
    %324 = arith.addf %317, %323 : vector<1x16x16xf32>
    %c57 = arith.constant 57 : index
    %325 = memref.load %arg2[%c57] : memref<98xf32, #tpu.memory_space<smem>>
    %326 = vector.extract_strided_slice %319 {offsets = [0, 1, 0], sizes = [1, 16, 16], strides = [1, 1, 1]} : vector<1x22x16xf32> to vector<1x16x16xf32>
    %327 = vector.broadcast %325 : f32 to vector<1x16x16xf32>
    %328 = arith.mulf %327, %326 : vector<1x16x16xf32>
    %329 = arith.addf %324, %328 : vector<1x16x16xf32>
    %c64 = arith.constant 64 : index
    %330 = memref.load %arg2[%c64] : memref<98xf32, #tpu.memory_space<smem>>
    %331 = vector.extract_strided_slice %319 {offsets = [0, 2, 0], sizes = [1, 16, 16], strides = [1, 1, 1]} : vector<1x22x16xf32> to vector<1x16x16xf32>
    %332 = vector.broadcast %330 : f32 to vector<1x16x16xf32>
    %333 = arith.mulf %332, %331 : vector<1x16x16xf32>
    %334 = arith.addf %329, %333 : vector<1x16x16xf32>
    %c71 = arith.constant 71 : index
    %335 = memref.load %arg2[%c71] : memref<98xf32, #tpu.memory_space<smem>>
    %336 = vector.extract_strided_slice %319 {offsets = [0, 3, 0], sizes = [1, 16, 16], strides = [1, 1, 1]} : vector<1x22x16xf32> to vector<1x16x16xf32>
    %337 = vector.broadcast %335 : f32 to vector<1x16x16xf32>
    %338 = arith.mulf %337, %336 : vector<1x16x16xf32>
    %339 = arith.addf %334, %338 : vector<1x16x16xf32>
    %c78 = arith.constant 78 : index
    %340 = memref.load %arg2[%c78] : memref<98xf32, #tpu.memory_space<smem>>
    %341 = vector.extract_strided_slice %319 {offsets = [0, 4, 0], sizes = [1, 16, 16], strides = [1, 1, 1]} : vector<1x22x16xf32> to vector<1x16x16xf32>
    %342 = vector.broadcast %340 : f32 to vector<1x16x16xf32>
    %343 = arith.mulf %342, %341 : vector<1x16x16xf32>
    %344 = arith.addf %339, %343 : vector<1x16x16xf32>
    %c85 = arith.constant 85 : index
    %345 = memref.load %arg2[%c85] : memref<98xf32, #tpu.memory_space<smem>>
    %346 = vector.extract_strided_slice %319 {offsets = [0, 5, 0], sizes = [1, 16, 16], strides = [1, 1, 1]} : vector<1x22x16xf32> to vector<1x16x16xf32>
    %347 = vector.broadcast %345 : f32 to vector<1x16x16xf32>
    %348 = arith.mulf %347, %346 : vector<1x16x16xf32>
    %349 = arith.addf %344, %348 : vector<1x16x16xf32>
    %c92 = arith.constant 92 : index
    %350 = memref.load %arg2[%c92] : memref<98xf32, #tpu.memory_space<smem>>
    %351 = vector.extract_strided_slice %319 {offsets = [0, 6, 0], sizes = [1, 16, 16], strides = [1, 1, 1]} : vector<1x22x16xf32> to vector<1x16x16xf32>
    %352 = vector.broadcast %350 : f32 to vector<1x16x16xf32>
    %353 = arith.mulf %352, %351 : vector<1x16x16xf32>
    %354 = arith.addf %349, %353 : vector<1x16x16xf32>
    %c0_70 = arith.constant 0 : index
    %c1_71 = arith.constant 1 : index
    %c0_72 = arith.constant 0 : index
    %c2_73 = arith.constant 2 : index
    %355 = vector.load %arg5[%c0_70, %c1_71, %c0_72, %c2_73] : memref<1x2x22x22xf32, #tpu.memory_space<vmem>>, vector<1x1x22x16xf32>
    %356 = vector.shape_cast %355 : vector<1x1x22x16xf32> to vector<1x22x16xf32>
    %c51 = arith.constant 51 : index
    %357 = memref.load %arg2[%c51] : memref<98xf32, #tpu.memory_space<smem>>
    %358 = vector.extract_strided_slice %356 {offsets = [0, 0, 0], sizes = [1, 16, 16], strides = [1, 1, 1]} : vector<1x22x16xf32> to vector<1x16x16xf32>
    %359 = vector.broadcast %357 : f32 to vector<1x16x16xf32>
    %360 = arith.mulf %359, %358 : vector<1x16x16xf32>
    %361 = arith.addf %354, %360 : vector<1x16x16xf32>
    %c58 = arith.constant 58 : index
    %362 = memref.load %arg2[%c58] : memref<98xf32, #tpu.memory_space<smem>>
    %363 = vector.extract_strided_slice %356 {offsets = [0, 1, 0], sizes = [1, 16, 16], strides = [1, 1, 1]} : vector<1x22x16xf32> to vector<1x16x16xf32>
    %364 = vector.broadcast %362 : f32 to vector<1x16x16xf32>
    %365 = arith.mulf %364, %363 : vector<1x16x16xf32>
    %366 = arith.addf %361, %365 : vector<1x16x16xf32>
    %c65 = arith.constant 65 : index
    %367 = memref.load %arg2[%c65] : memref<98xf32, #tpu.memory_space<smem>>
    %368 = vector.extract_strided_slice %356 {offsets = [0, 2, 0], sizes = [1, 16, 16], strides = [1, 1, 1]} : vector<1x22x16xf32> to vector<1x16x16xf32>
    %369 = vector.broadcast %367 : f32 to vector<1x16x16xf32>
    %370 = arith.mulf %369, %368 : vector<1x16x16xf32>
    %371 = arith.addf %366, %370 : vector<1x16x16xf32>
    %c72 = arith.constant 72 : index
    %372 = memref.load %arg2[%c72] : memref<98xf32, #tpu.memory_space<smem>>
    %373 = vector.extract_strided_slice %356 {offsets = [0, 3, 0], sizes = [1, 16, 16], strides = [1, 1, 1]} : vector<1x22x16xf32> to vector<1x16x16xf32>
    %374 = vector.broadcast %372 : f32 to vector<1x16x16xf32>
    %375 = arith.mulf %374, %373 : vector<1x16x16xf32>
    %376 = arith.addf %371, %375 : vector<1x16x16xf32>
    %c79 = arith.constant 79 : index
    %377 = memref.load %arg2[%c79] : memref<98xf32, #tpu.memory_space<smem>>
    %378 = vector.extract_strided_slice %356 {offsets = [0, 4, 0], sizes = [1, 16, 16], strides = [1, 1, 1]} : vector<1x22x16xf32> to vector<1x16x16xf32>
    %379 = vector.broadcast %377 : f32 to vector<1x16x16xf32>
    %380 = arith.mulf %379, %378 : vector<1x16x16xf32>
    %381 = arith.addf %376, %380 : vector<1x16x16xf32>
    %c86 = arith.constant 86 : index
    %382 = memref.load %arg2[%c86] : memref<98xf32, #tpu.memory_space<smem>>
    %383 = vector.extract_strided_slice %356 {offsets = [0, 5, 0], sizes = [1, 16, 16], strides = [1, 1, 1]} : vector<1x22x16xf32> to vector<1x16x16xf32>
    %384 = vector.broadcast %382 : f32 to vector<1x16x16xf32>
    %385 = arith.mulf %384, %383 : vector<1x16x16xf32>
    %386 = arith.addf %381, %385 : vector<1x16x16xf32>
    %c93 = arith.constant 93 : index
    %387 = memref.load %arg2[%c93] : memref<98xf32, #tpu.memory_space<smem>>
    %388 = vector.extract_strided_slice %356 {offsets = [0, 6, 0], sizes = [1, 16, 16], strides = [1, 1, 1]} : vector<1x22x16xf32> to vector<1x16x16xf32>
    %389 = vector.broadcast %387 : f32 to vector<1x16x16xf32>
    %390 = arith.mulf %389, %388 : vector<1x16x16xf32>
    %391 = arith.addf %386, %390 : vector<1x16x16xf32>
    %c0_74 = arith.constant 0 : index
    %c1_75 = arith.constant 1 : index
    %c0_76 = arith.constant 0 : index
    %c3_77 = arith.constant 3 : index
    %392 = vector.load %arg5[%c0_74, %c1_75, %c0_76, %c3_77] : memref<1x2x22x22xf32, #tpu.memory_space<vmem>>, vector<1x1x22x16xf32>
    %393 = vector.shape_cast %392 : vector<1x1x22x16xf32> to vector<1x22x16xf32>
    %c52 = arith.constant 52 : index
    %394 = memref.load %arg2[%c52] : memref<98xf32, #tpu.memory_space<smem>>
    %395 = vector.extract_strided_slice %393 {offsets = [0, 0, 0], sizes = [1, 16, 16], strides = [1, 1, 1]} : vector<1x22x16xf32> to vector<1x16x16xf32>
    %396 = vector.broadcast %394 : f32 to vector<1x16x16xf32>
    %397 = arith.mulf %396, %395 : vector<1x16x16xf32>
    %398 = arith.addf %391, %397 : vector<1x16x16xf32>
    %c59 = arith.constant 59 : index
    %399 = memref.load %arg2[%c59] : memref<98xf32, #tpu.memory_space<smem>>
    %400 = vector.extract_strided_slice %393 {offsets = [0, 1, 0], sizes = [1, 16, 16], strides = [1, 1, 1]} : vector<1x22x16xf32> to vector<1x16x16xf32>
    %401 = vector.broadcast %399 : f32 to vector<1x16x16xf32>
    %402 = arith.mulf %401, %400 : vector<1x16x16xf32>
    %403 = arith.addf %398, %402 : vector<1x16x16xf32>
    %c66 = arith.constant 66 : index
    %404 = memref.load %arg2[%c66] : memref<98xf32, #tpu.memory_space<smem>>
    %405 = vector.extract_strided_slice %393 {offsets = [0, 2, 0], sizes = [1, 16, 16], strides = [1, 1, 1]} : vector<1x22x16xf32> to vector<1x16x16xf32>
    %406 = vector.broadcast %404 : f32 to vector<1x16x16xf32>
    %407 = arith.mulf %406, %405 : vector<1x16x16xf32>
    %408 = arith.addf %403, %407 : vector<1x16x16xf32>
    %c73 = arith.constant 73 : index
    %409 = memref.load %arg2[%c73] : memref<98xf32, #tpu.memory_space<smem>>
    %410 = vector.extract_strided_slice %393 {offsets = [0, 3, 0], sizes = [1, 16, 16], strides = [1, 1, 1]} : vector<1x22x16xf32> to vector<1x16x16xf32>
    %411 = vector.broadcast %409 : f32 to vector<1x16x16xf32>
    %412 = arith.mulf %411, %410 : vector<1x16x16xf32>
    %413 = arith.addf %408, %412 : vector<1x16x16xf32>
    %c80 = arith.constant 80 : index
    %414 = memref.load %arg2[%c80] : memref<98xf32, #tpu.memory_space<smem>>
    %415 = vector.extract_strided_slice %393 {offsets = [0, 4, 0], sizes = [1, 16, 16], strides = [1, 1, 1]} : vector<1x22x16xf32> to vector<1x16x16xf32>
    %416 = vector.broadcast %414 : f32 to vector<1x16x16xf32>
    %417 = arith.mulf %416, %415 : vector<1x16x16xf32>
    %418 = arith.addf %413, %417 : vector<1x16x16xf32>
    %c87 = arith.constant 87 : index
    %419 = memref.load %arg2[%c87] : memref<98xf32, #tpu.memory_space<smem>>
    %420 = vector.extract_strided_slice %393 {offsets = [0, 5, 0], sizes = [1, 16, 16], strides = [1, 1, 1]} : vector<1x22x16xf32> to vector<1x16x16xf32>
    %421 = vector.broadcast %419 : f32 to vector<1x16x16xf32>
    %422 = arith.mulf %421, %420 : vector<1x16x16xf32>
    %423 = arith.addf %418, %422 : vector<1x16x16xf32>
    %c94 = arith.constant 94 : index
    %424 = memref.load %arg2[%c94] : memref<98xf32, #tpu.memory_space<smem>>
    %425 = vector.extract_strided_slice %393 {offsets = [0, 6, 0], sizes = [1, 16, 16], strides = [1, 1, 1]} : vector<1x22x16xf32> to vector<1x16x16xf32>
    %426 = vector.broadcast %424 : f32 to vector<1x16x16xf32>
    %427 = arith.mulf %426, %425 : vector<1x16x16xf32>
    %428 = arith.addf %423, %427 : vector<1x16x16xf32>
    %c0_78 = arith.constant 0 : index
    %c1_79 = arith.constant 1 : index
    %c0_80 = arith.constant 0 : index
    %c4_81 = arith.constant 4 : index
    %429 = vector.load %arg5[%c0_78, %c1_79, %c0_80, %c4_81] : memref<1x2x22x22xf32, #tpu.memory_space<vmem>>, vector<1x1x22x16xf32>
    %430 = vector.shape_cast %429 : vector<1x1x22x16xf32> to vector<1x22x16xf32>
    %c53 = arith.constant 53 : index
    %431 = memref.load %arg2[%c53] : memref<98xf32, #tpu.memory_space<smem>>
    %432 = vector.extract_strided_slice %430 {offsets = [0, 0, 0], sizes = [1, 16, 16], strides = [1, 1, 1]} : vector<1x22x16xf32> to vector<1x16x16xf32>
    %433 = vector.broadcast %431 : f32 to vector<1x16x16xf32>
    %434 = arith.mulf %433, %432 : vector<1x16x16xf32>
    %435 = arith.addf %428, %434 : vector<1x16x16xf32>
    %c60 = arith.constant 60 : index
    %436 = memref.load %arg2[%c60] : memref<98xf32, #tpu.memory_space<smem>>
    %437 = vector.extract_strided_slice %430 {offsets = [0, 1, 0], sizes = [1, 16, 16], strides = [1, 1, 1]} : vector<1x22x16xf32> to vector<1x16x16xf32>
    %438 = vector.broadcast %436 : f32 to vector<1x16x16xf32>
    %439 = arith.mulf %438, %437 : vector<1x16x16xf32>
    %440 = arith.addf %435, %439 : vector<1x16x16xf32>
    %c67 = arith.constant 67 : index
    %441 = memref.load %arg2[%c67] : memref<98xf32, #tpu.memory_space<smem>>
    %442 = vector.extract_strided_slice %430 {offsets = [0, 2, 0], sizes = [1, 16, 16], strides = [1, 1, 1]} : vector<1x22x16xf32> to vector<1x16x16xf32>
    %443 = vector.broadcast %441 : f32 to vector<1x16x16xf32>
    %444 = arith.mulf %443, %442 : vector<1x16x16xf32>
    %445 = arith.addf %440, %444 : vector<1x16x16xf32>
    %c74 = arith.constant 74 : index
    %446 = memref.load %arg2[%c74] : memref<98xf32, #tpu.memory_space<smem>>
    %447 = vector.extract_strided_slice %430 {offsets = [0, 3, 0], sizes = [1, 16, 16], strides = [1, 1, 1]} : vector<1x22x16xf32> to vector<1x16x16xf32>
    %448 = vector.broadcast %446 : f32 to vector<1x16x16xf32>
    %449 = arith.mulf %448, %447 : vector<1x16x16xf32>
    %450 = arith.addf %445, %449 : vector<1x16x16xf32>
    %c81 = arith.constant 81 : index
    %451 = memref.load %arg2[%c81] : memref<98xf32, #tpu.memory_space<smem>>
    %452 = vector.extract_strided_slice %430 {offsets = [0, 4, 0], sizes = [1, 16, 16], strides = [1, 1, 1]} : vector<1x22x16xf32> to vector<1x16x16xf32>
    %453 = vector.broadcast %451 : f32 to vector<1x16x16xf32>
    %454 = arith.mulf %453, %452 : vector<1x16x16xf32>
    %455 = arith.addf %450, %454 : vector<1x16x16xf32>
    %c88 = arith.constant 88 : index
    %456 = memref.load %arg2[%c88] : memref<98xf32, #tpu.memory_space<smem>>
    %457 = vector.extract_strided_slice %430 {offsets = [0, 5, 0], sizes = [1, 16, 16], strides = [1, 1, 1]} : vector<1x22x16xf32> to vector<1x16x16xf32>
    %458 = vector.broadcast %456 : f32 to vector<1x16x16xf32>
    %459 = arith.mulf %458, %457 : vector<1x16x16xf32>
    %460 = arith.addf %455, %459 : vector<1x16x16xf32>
    %c95 = arith.constant 95 : index
    %461 = memref.load %arg2[%c95] : memref<98xf32, #tpu.memory_space<smem>>
    %462 = vector.extract_strided_slice %430 {offsets = [0, 6, 0], sizes = [1, 16, 16], strides = [1, 1, 1]} : vector<1x22x16xf32> to vector<1x16x16xf32>
    %463 = vector.broadcast %461 : f32 to vector<1x16x16xf32>
    %464 = arith.mulf %463, %462 : vector<1x16x16xf32>
    %465 = arith.addf %460, %464 : vector<1x16x16xf32>
    %c0_82 = arith.constant 0 : index
    %c1_83 = arith.constant 1 : index
    %c0_84 = arith.constant 0 : index
    %c5_85 = arith.constant 5 : index
    %466 = vector.load %arg5[%c0_82, %c1_83, %c0_84, %c5_85] : memref<1x2x22x22xf32, #tpu.memory_space<vmem>>, vector<1x1x22x16xf32>
    %467 = vector.shape_cast %466 : vector<1x1x22x16xf32> to vector<1x22x16xf32>
    %c54 = arith.constant 54 : index
    %468 = memref.load %arg2[%c54] : memref<98xf32, #tpu.memory_space<smem>>
    %469 = vector.extract_strided_slice %467 {offsets = [0, 0, 0], sizes = [1, 16, 16], strides = [1, 1, 1]} : vector<1x22x16xf32> to vector<1x16x16xf32>
    %470 = vector.broadcast %468 : f32 to vector<1x16x16xf32>
    %471 = arith.mulf %470, %469 : vector<1x16x16xf32>
    %472 = arith.addf %465, %471 : vector<1x16x16xf32>
    %c61 = arith.constant 61 : index
    %473 = memref.load %arg2[%c61] : memref<98xf32, #tpu.memory_space<smem>>
    %474 = vector.extract_strided_slice %467 {offsets = [0, 1, 0], sizes = [1, 16, 16], strides = [1, 1, 1]} : vector<1x22x16xf32> to vector<1x16x16xf32>
    %475 = vector.broadcast %473 : f32 to vector<1x16x16xf32>
    %476 = arith.mulf %475, %474 : vector<1x16x16xf32>
    %477 = arith.addf %472, %476 : vector<1x16x16xf32>
    %c68 = arith.constant 68 : index
    %478 = memref.load %arg2[%c68] : memref<98xf32, #tpu.memory_space<smem>>
    %479 = vector.extract_strided_slice %467 {offsets = [0, 2, 0], sizes = [1, 16, 16], strides = [1, 1, 1]} : vector<1x22x16xf32> to vector<1x16x16xf32>
    %480 = vector.broadcast %478 : f32 to vector<1x16x16xf32>
    %481 = arith.mulf %480, %479 : vector<1x16x16xf32>
    %482 = arith.addf %477, %481 : vector<1x16x16xf32>
    %c75 = arith.constant 75 : index
    %483 = memref.load %arg2[%c75] : memref<98xf32, #tpu.memory_space<smem>>
    %484 = vector.extract_strided_slice %467 {offsets = [0, 3, 0], sizes = [1, 16, 16], strides = [1, 1, 1]} : vector<1x22x16xf32> to vector<1x16x16xf32>
    %485 = vector.broadcast %483 : f32 to vector<1x16x16xf32>
    %486 = arith.mulf %485, %484 : vector<1x16x16xf32>
    %487 = arith.addf %482, %486 : vector<1x16x16xf32>
    %c82 = arith.constant 82 : index
    %488 = memref.load %arg2[%c82] : memref<98xf32, #tpu.memory_space<smem>>
    %489 = vector.extract_strided_slice %467 {offsets = [0, 4, 0], sizes = [1, 16, 16], strides = [1, 1, 1]} : vector<1x22x16xf32> to vector<1x16x16xf32>
    %490 = vector.broadcast %488 : f32 to vector<1x16x16xf32>
    %491 = arith.mulf %490, %489 : vector<1x16x16xf32>
    %492 = arith.addf %487, %491 : vector<1x16x16xf32>
    %c89 = arith.constant 89 : index
    %493 = memref.load %arg2[%c89] : memref<98xf32, #tpu.memory_space<smem>>
    %494 = vector.extract_strided_slice %467 {offsets = [0, 5, 0], sizes = [1, 16, 16], strides = [1, 1, 1]} : vector<1x22x16xf32> to vector<1x16x16xf32>
    %495 = vector.broadcast %493 : f32 to vector<1x16x16xf32>
    %496 = arith.mulf %495, %494 : vector<1x16x16xf32>
    %497 = arith.addf %492, %496 : vector<1x16x16xf32>
    %c96 = arith.constant 96 : index
    %498 = memref.load %arg2[%c96] : memref<98xf32, #tpu.memory_space<smem>>
    %499 = vector.extract_strided_slice %467 {offsets = [0, 6, 0], sizes = [1, 16, 16], strides = [1, 1, 1]} : vector<1x22x16xf32> to vector<1x16x16xf32>
    %500 = vector.broadcast %498 : f32 to vector<1x16x16xf32>
    %501 = arith.mulf %500, %499 : vector<1x16x16xf32>
    %502 = arith.addf %497, %501 : vector<1x16x16xf32>
    %c0_86 = arith.constant 0 : index
    %c1_87 = arith.constant 1 : index
    %c0_88 = arith.constant 0 : index
    %c6_89 = arith.constant 6 : index
    %503 = vector.load %arg5[%c0_86, %c1_87, %c0_88, %c6_89] : memref<1x2x22x22xf32, #tpu.memory_space<vmem>>, vector<1x1x22x16xf32>
    %504 = vector.shape_cast %503 : vector<1x1x22x16xf32> to vector<1x22x16xf32>
    %c55 = arith.constant 55 : index
    %505 = memref.load %arg2[%c55] : memref<98xf32, #tpu.memory_space<smem>>
    %506 = vector.extract_strided_slice %504 {offsets = [0, 0, 0], sizes = [1, 16, 16], strides = [1, 1, 1]} : vector<1x22x16xf32> to vector<1x16x16xf32>
    %507 = vector.broadcast %505 : f32 to vector<1x16x16xf32>
    %508 = arith.mulf %507, %506 : vector<1x16x16xf32>
    %509 = arith.addf %502, %508 : vector<1x16x16xf32>
    %c62 = arith.constant 62 : index
    %510 = memref.load %arg2[%c62] : memref<98xf32, #tpu.memory_space<smem>>
    %511 = vector.extract_strided_slice %504 {offsets = [0, 1, 0], sizes = [1, 16, 16], strides = [1, 1, 1]} : vector<1x22x16xf32> to vector<1x16x16xf32>
    %512 = vector.broadcast %510 : f32 to vector<1x16x16xf32>
    %513 = arith.mulf %512, %511 : vector<1x16x16xf32>
    %514 = arith.addf %509, %513 : vector<1x16x16xf32>
    %c69 = arith.constant 69 : index
    %515 = memref.load %arg2[%c69] : memref<98xf32, #tpu.memory_space<smem>>
    %516 = vector.extract_strided_slice %504 {offsets = [0, 2, 0], sizes = [1, 16, 16], strides = [1, 1, 1]} : vector<1x22x16xf32> to vector<1x16x16xf32>
    %517 = vector.broadcast %515 : f32 to vector<1x16x16xf32>
    %518 = arith.mulf %517, %516 : vector<1x16x16xf32>
    %519 = arith.addf %514, %518 : vector<1x16x16xf32>
    %c76 = arith.constant 76 : index
    %520 = memref.load %arg2[%c76] : memref<98xf32, #tpu.memory_space<smem>>
    %521 = vector.extract_strided_slice %504 {offsets = [0, 3, 0], sizes = [1, 16, 16], strides = [1, 1, 1]} : vector<1x22x16xf32> to vector<1x16x16xf32>
    %522 = vector.broadcast %520 : f32 to vector<1x16x16xf32>
    %523 = arith.mulf %522, %521 : vector<1x16x16xf32>
    %524 = arith.addf %519, %523 : vector<1x16x16xf32>
    %c83 = arith.constant 83 : index
    %525 = memref.load %arg2[%c83] : memref<98xf32, #tpu.memory_space<smem>>
    %526 = vector.extract_strided_slice %504 {offsets = [0, 4, 0], sizes = [1, 16, 16], strides = [1, 1, 1]} : vector<1x22x16xf32> to vector<1x16x16xf32>
    %527 = vector.broadcast %525 : f32 to vector<1x16x16xf32>
    %528 = arith.mulf %527, %526 : vector<1x16x16xf32>
    %529 = arith.addf %524, %528 : vector<1x16x16xf32>
    %c90 = arith.constant 90 : index
    %530 = memref.load %arg2[%c90] : memref<98xf32, #tpu.memory_space<smem>>
    %531 = vector.extract_strided_slice %504 {offsets = [0, 5, 0], sizes = [1, 16, 16], strides = [1, 1, 1]} : vector<1x22x16xf32> to vector<1x16x16xf32>
    %532 = vector.broadcast %530 : f32 to vector<1x16x16xf32>
    %533 = arith.mulf %532, %531 : vector<1x16x16xf32>
    %534 = arith.addf %529, %533 : vector<1x16x16xf32>
    %c97 = arith.constant 97 : index
    %535 = memref.load %arg2[%c97] : memref<98xf32, #tpu.memory_space<smem>>
    %536 = vector.extract_strided_slice %504 {offsets = [0, 6, 0], sizes = [1, 16, 16], strides = [1, 1, 1]} : vector<1x22x16xf32> to vector<1x16x16xf32>
    %537 = vector.broadcast %535 : f32 to vector<1x16x16xf32>
    %538 = arith.mulf %537, %536 : vector<1x16x16xf32>
    %539 = arith.addf %534, %538 : vector<1x16x16xf32>
    %c0_90 = arith.constant 0 : index
    %540 = memref.load %arg3[%c0_90] : memref<2xf32, #tpu.memory_space<smem>>
    %541 = vector.broadcast %540 : f32 to vector<1x16x16xf32>
    %542 = arith.mulf %539, %541 : vector<1x16x16xf32>
    %c1_91 = arith.constant 1 : index
    %543 = memref.load %arg3[%c1_91] : memref<2xf32, #tpu.memory_space<smem>>
    %544 = vector.broadcast %543 : f32 to vector<1x16x16xf32>
    %545 = arith.addf %542, %544 : vector<1x16x16xf32>
    %546 = arith.negf %545 : vector<1x16x16xf32>
    %547 = math.exp %546 : vector<1x16x16xf32>
    %cst_92 = arith.constant 1.000000e+00 : f32
    %548 = vector.broadcast %cst_92 : f32 to vector<1x16x16xf32>
    %549 = arith.addf %548, %547 : vector<1x16x16xf32>
    %550 = arith.divf %548, %549 : vector<1x16x16xf32>
    %551 = vector.shape_cast %550 : vector<1x16x16xf32> to vector<1x1x256xf32>
    %552 = vector.broadcast %551 : vector<1x1x256xf32> to vector<1x4x256xf32>
    %553 = arith.mulf %0, %552 : vector<1x4x256xf32>
    %c0_93 = arith.constant 0 : index
    %c0_94 = arith.constant 0 : index
    %c0_95 = arith.constant 0 : index
    %554 = vector.load %arg4[%c0_93, %c0_94, %c0_95] : memref<1x4x256xf32, #tpu.memory_space<vmem>>, vector<1x4x256xf32>
    tpu.vector_store %arg4[%c0_93, %c0_94, %c0_95], %553 {strides = array<i32>} : memref<1x4x256xf32, #tpu.memory_space<vmem>>, vector<1x4x256xf32>,
    return
  }
  func.func @transform_0(%arg0: i32) -> (i32, i32, i32) {
    %c0_i32 = arith.constant 0 : i32
    %c0_i32_0 = arith.constant 0 : i32
    %c0_i32_1 = arith.constant 0 : i32
    return %arg0, %c0_i32, %c0_i32_0 : i32, i32, i32
  }
  func.func @transform_1(%arg0: i32) -> i32 {
    %c0_i32 = arith.constant 0 : i32
    %c0_i32_0 = arith.constant 0 : i32
    return %c0_i32 : i32
  }
  func.func @transform_2(%arg0: i32) -> i32 {
    %c0_i32 = arith.constant 0 : i32
    %c0_i32_0 = arith.constant 0 : i32
    return %c0_i32 : i32
  }
  func.func @transform_3(%arg0: i32) -> (i32, i32, i32) {
    %c0_i32 = arith.constant 0 : i32
    %c0_i32_0 = arith.constant 0 : i32
    %c0_i32_1 = arith.constant 0 : i32
    return %arg0, %c0_i32, %c0_i32_0 : i32, i32, i32
  }
}

</mosaic_0001>

<bundles_post_ra>
// kernel: tpu_custom_call.1
= control target key start
LH: loop header
LB: loop body
LE: loop exit
PB: predicated region body
PF: predicated region fallthrough
CT: control target
= control target key end

     0   :  { %8 = vsyncpa [#allocation4], 0  ;;  %s5289_s0 = inlined_call_operand.hbm [shape: f32[2,4,256], index: 0, kind: input, shape index: {}]   ;;  %s5290_s1 = inlined_call_operand.hbm [shape: f32[98], index: 1, kind: input, shape index: {}]   ;;  %s5291_s2 = inlined_call_operand.hbm [shape: f32[2], index: 2, kind: input, shape index: {}]   ;;  %s5292_s3 = inlined_call_operand.hbm [shape: f32[2,4,256], index: 3, kind: output, shape index: {}]  }
   0x1   :  { %10 = vsyncpa [#allocation4 + $0x1], 0 }
   0x2   :  { %11 = vsyncpa [#allocation6], 0 }
   0x3   :  { %12 = vsyncpa [#allocation9], 0 }
   0x4   :  { %13 = vsyncpa [#allocation5], 0 }
   0x5   :  { %15 = vsyncpa [#allocation5 + $0x1], 0  ;;  %s3190_s12 = smov 0   ;;  %s3192_s13 = smov 0  }
   0x6   :  { %s3194_s14 = smov 0   ;;  %s3196_s15 = smov 0  }
   0x7 LB: > { %s3211_s16 = sadd.s32 4294967295, %s3147_s15   ;;  %s2795_s17 = sadd.s32 4294967294, %s3147_s15   ;;  %s3147_s15 = sphi %s3196_s15, %s5406_s15   ;;  %s3143_s14 = sphi %s3194_s14, %s5405_s14   ;;  %s3139_s13 = sphi %s3192_s13, %s5404_s13   ;;  %s3135_s12 = sphi %s3190_s12, %s5403_s12  }
   0x8   : > { %p41_p0 = scmp.ne.s32.totalorder %s3139_s13, %s3135_s12  ;;  %p5293_p1 = scmp.eq.s32.totalorder %s3211_s16, 0 }
   0x9   : > { %p113_p3 = scmp.eq.s32.totalorder %s2795_s17, 1  ;;  %p2796_p5 = scmp.ge.s32.totalorder %s3147_s15, 1 }
   0xa   : > { %p3220_p4 = por %p5293_p1, %p41_p0  ;;  %p120_p7 = scmp.lt.s32.totalorder %s3147_s15, 3 }
   0xb   : > { %p3225_p6 = por %p113_p3, %p41_p0  ;;  %s3238_s21 = sadd.s32 1, %s3147_s15  }
   0xc   : > { %s5331_s18 = scalar_select %p3220_p4, 1, 0 }
   0xd   : > { %s5332_s19 = scalar_select %p3225_p6, 1, 0 }
   0xe   : > { %p3230_p8 = pnand %p2796_p5, %p120_p7  ;;  %s28_s22 = sadd.s32 1, %s3143_s14 }
   0xf   : > { %s25_s24 = ssub.s32 %s3147_s15, %s3238_s21  ;;  %p35_p13 = scmp.ne.s32.totalorder %s3143_s14, %s3139_s13 }
  0x10   : > { %p2927_p10 = pneg %p3230_p8  ;;  %p3249_p12 = scmp.eq.s32.totalorder %s25_s24, 0 }
  0x11   : > { %p36_p0 = scmp.eq.s32.totalorder %s3147_s15, 0  ;;  %s3017_s28 = scalar_lea.hbm %s5290_s1, 16 }
  0x12   : > { %p3243_p11 = pnand %p2927_p10, %p5293_p1  ;;  %p3018_p3 = scmp.ne.s32.totalorder %s5290_s1, %s3017_s28 }
  0x13   : > { %p3024_p9 = scmp.lt.u32.totalorder %s3017_s28, %s5290_s1 }
  0x14   : > { %p3019_p5 = pneg %p3243_p11 }
  0x16   : > { %p3020_p7 = pnand %p3019_p5, %p3018_p3 }
  0x18   : > { %p3021_p10 = pneg %p3020_p7 }
  0x1a   : > { %p3026_p1 = pnand %p3024_p9, %p3021_p10 }
  0x1c   : > { %3029 = shalt.err (!%p3026_p1)
}
  0x1d   : > { %s3149_s6 = smov [#allocation7]   ;;  %s3030_s11 = scalar_lea.hbm %s5291_s2, 16 }
  0x1e   : > { %2930 = dma.hbm_to_smem (!%p3243_p11), %s5290_s1, 16, %s3149_s6, [#allocation6]  }
  0x1f   : > { %p3031_p3 = scmp.ne.s32.totalorder %s5291_s2, %s3030_s11  ;;  %p3037_p1 = scmp.lt.u32.totalorder %s3030_s11, %s5291_s2 }
  0x21   : > { %p3033_p7 = pnand %p3031_p3, %p3019_p5 }
  0x23   : > { %p3034_p2 = pneg %p3033_p7 }
  0x25   : > { %p3039_p9 = pnand %p3037_p1, %p3034_p2 }
  0x27   : > { %3042 = shalt.err (!%p3039_p9)
}
  0x28   : > { %s3150_s28 = smov [#allocation8]   ;;  %p37_p2 = por %p36_p0, %p35_p13 }
  0x29   : > { %2933 = dma.hbm_to_smem (!%p3243_p11), %s5291_s2, 16, %s3150_s28, [#allocation9]  }
  0x2a   : > { %s3289_s4 = scalar_select %p3249_p12, %s3143_s14, %s28_s22  }
  0x2b   : > { %p5336_p5 = scmp.eq.s32.totalorder %s3211_s16, 1  ;;  %p2944_p3 = scmp.lt.s32.totalorder %s3147_s15, 2 }
  0x2c   : > { %s151_s5 = sand.u32 1, %s3143_s14   ;;  %s2913_s7 = sshll.u32 %s3147_s15, 7 }
  0x2d   : > { %p3301_p10 = por %p5336_p5, %p35_p13  ;;  %s2800_s6 = sshll.u32 %s151_s5, 3 }
  0x2e   : > { %s3311_s10 = scalar_lea.hbm %s5289_s0, %s2913_s7  ;;  %s155_s22 = scalar_lea.vmem [#allocation3], %s2800_s6 }
  0x2f   : > { %s5337_s23 = scalar_select %p3301_p10, 1, 0 }
  0x30   : > { %s163_s25 = sshll.u32 %s155_s22, 4  ;;  %p3315_p11 = pnand %p2944_p3, %p37_p2  ;;  %s3313_s25 = int_to_ptr.vmem [resolvable:$true] %s163_s25 }
  0x31   : > { %s152_s17 = scalar_lea.sflag [#allocation4], %s151_s5  ;;  %s3043_s24 = scalar_lea.hbm %s3311_s10, 128 }
  0x32   : > { %p3044_p12 = scmp.ne.s32.totalorder %s3311_s10, %s3043_s24  ;;  %p3045_p13 = pneg %p3315_p11 }
  0x33   : > { %s3048_s28 = scalar_lea.hbm %s5289_s0, 256  ;;  %p3049_p1 = scmp.lt.u32.totalorder %s3311_s10, %s5289_s0 }
  0x34   : > { %p3046_p0 = pnand %p3045_p13, %p3044_p12  ;;  %p3050_p9 = scmp.lt.u32.totalorder %s3048_s28, %s3043_s24 }
  0x35   : > { %p3052_p5 = scmp.lt.u32.totalorder %s3043_s24, %s3311_s10 }
  0x36   : > { %p3047_p7 = pneg %p3046_p0  ;;  %p3051_p2 = por %p3050_p9, %p3049_p1 }
  0x38   : > { %p3053_p3 = por %p3052_p5, %p3051_p2 }
  0x3a   : > { %p3054_p6 = pnand %p3053_p3, %p3047_p7 }
  0x3c   : > { %3057 = shalt.err (!%p3054_p6)
}
  0x3d   : > { %s3058_s5 = scalar_lea.vmem %s3313_s25, 128  ;;  %s3151_s6 = smov [#allocation3]  }
  0x3e   : > { %p3059_p12 = scmp.ne.s32.totalorder %s3313_s25, %s3058_s5  ;;  %s3063_s7 = sshll.u32 %s3151_s6, 4  ;;  %s3064_s7 = int_to_ptr.vmem [resolvable:$false] %s3063_s7 }
  0x3f   : > { %s3065_s8 = scalar_lea.vmem %s3064_s7, 256  ;;  %p3066_p4 = scmp.lt.s32.totalorder %s3313_s25, %s3064_s7 }
  0x40   : > { %p3061_p0 = pnand %p3059_p12, %p3045_p13  ;;  %p3067_p1 = scmp.lt.s32.totalorder %s3065_s8, %s3058_s5 }
  0x42   : > { %p3062_p10 = pneg %p3061_p0  ;;  %p3068_p9 = por %p3067_p1, %p3066_p4 }
  0x44   : > { %p3069_p2 = pnand %p3068_p9, %p3062_p10 }
  0x46   : > { %3072 = shalt.err (!%p3069_p2)
}
  0x47   : > { %2937 = dma.hbm_to_vmem [thread:$0]  (!%p3315_p11), %s3311_s10, 128, %s3313_s25, %s152_s17  }
  0x48   : > { %172 = sbr.rel (%p3230_p8) target bundleno = 1029 (0x405), region = 32 }
  0x4f   : > { %s3347_s9 = sand.u32 1, %s3139_s13   ;;  %p5339_p4 = scmp.ne.s32.totalorder %s5331_s18, 0 }
  0x50   : > { %s5296_s22 = sshll.u32 %s3347_s9, 3  ;;  %s175_s24 = scalar_lea.sflag [#allocation4], %s3347_s9 }
  0x51   : > { %s3353_s26 = scalar_lea.vmem [#allocation3], %s5296_s22 }
  0x52   : > { %3118 = dma.done.wait (%p5339_p4), %s175_s24, 128  }
  0x53   : > { %3120 = vsyncadd (%p5339_p4), %s175_s24, 4294967168  ;;  %p5340_p6 = scmp.eq.s32.totalorder %s3211_s16, 0 }
  0x55   : > { %3122 = dma.done.wait (%p5340_p6), [#allocation6], 16   ;;  %p5341_p8 = pmov %p5340_p6 }
  0x56   : > { %p5342_p10 = pmov %p5340_p6 }
  0x57   : > { %3124 = vsyncadd (%p5341_p8), [#allocation6], 4294967280 }
  0x58   : > { %3126 = dma.done.wait (%p5342_p10), [#allocation9], 16   ;;  %p5343_p11 = pmov %p5340_p6 }
  0x5a   : > { %3128 = vsyncadd (%p5343_p11), [#allocation9], 4294967280 }
  0x5b   : > { %191 = sfence }
  0x5c   : > { %v210_v0 = vld [vmem:[%s3353_s26] sm:$0xff]  ;;  %vm214_vm0 = vcmask 1043456   ;;  %s5301_s18 = smov 80   ;;  %s5297_s20 = smov 112   ;;  %vm245_vm1 = vcmask 174080   ;;  %vm250_vm2 = vcmask 23552   ;;  %v314_v36 = vlaneseq }
  0x5d   : > { %v215_v1 = vsel %vm214_vm0, %v210_v0, -inf  ;;  %v212_v2 = vcombine.high %v210_v0, %v210_v0  ;;  %v229_v12 = vsel %vm214_vm0, %v210_v0, 0.0  ;;  %s5305_s10 = smov 64   ;;  %s5299_s25 = smov 96   ;;  %vm258_vm3 = vcmask 179352  }
  0x5e   : > { %v216_v3 = vrot.slane %v215_v1, 4  ;;  %v230_v15 = vrot.slane %v229_v12, 4  ;;  %s5307_s11 = smov 32   ;;  %s5303_s17 = smov 48   ;;  %v5319_v32 = vmov 0.0   ;;  %v3448_v39 = vshrl.u32 %v314_v36, 7 }
  0x5f   : > { %v222_v4 = vsel %vm214_vm0, %v212_v2, -inf  ;;  %v236_v20 = vsel %vm214_vm0, %v212_v2, 0.0  ;;  %s5309_s27 = smov 16   ;;  %246 = vst.msk [vmem:[#allocation2] sm:$0x7] %vm245_vm1, %v5319_v32  ;;  %vm253_vm4 = vcmask 21504  }
  0x60   : > { %v217_v5 = vmax.f32 %v215_v1, %v216_v3  ;;  %v223_v6 = vrot.slane %v222_v4, 4  ;;  %v231_v17 = vadd.f32 %v230_v15, %v229_v12  ;;  %v237_v22 = vrot.slane %v236_v20, 4  ;;  %252 = vst.msk [vmem:[#allocation2 + $0x8] sm:$0xff] %vm250_vm2, %v5319_v32  ;;  %256 = vst.msk [vmem:[#allocation2 + $0x20] sm:$0xff] %vm250_vm2, %v5319_v32  ;;  %s3162_s28 = smov 3   ;;  %s2814_s29 = sld [smem:[#allocation7 + $0x1]] }
  0x61   : > { %247 = vst.msk [vmem:[#allocation2 + $0x18] sm:$0x7] %vm245_vm1, %v5319_v32  ;;  %248 = vst.msk [vmem:[#allocation2 + $0x13] sm:$0x7] %vm245_vm1, %v5319_v32  ;;  %v3160_v34 = vmov 1983009808  }
  0x62   : > { %v218_v7 = vrot.slane %v217_v5, 2  ;;  %v224_v8 = vmax.f32 %v222_v4, %v223_v6  ;;  %v232_v19 = vrot.slane %v231_v17, 2  ;;  %v238_v24 = vadd.f32 %v237_v22, %v236_v20  ;;  %249 = vst.msk [vmem:[#allocation2 + $0x2b] sm:$0x7] %vm245_vm1, %v5319_v32  ;;  %5344 = vst [vmem:[#allocation15_spill] sm:$0xff] %v3448_v39  ;;  %s2821_s30 = sld [smem:[#allocation7 + $0x2]] }
  0x63   : > { %251 = vst.msk [vmem:[#allocation2] sm:$0xff] %vm250_vm2, %v5319_v32  ;;  %255 = vst.msk [vmem:[#allocation2 + $0x18] sm:$0xff] %vm250_vm2, %v5319_v32  ;;  %v312_v35 = vunpack.c.l.s4 %v3160_v34  ;;  %v3161_v43 = vmov 1934713408   ;;  %vm261_vm5 = vcmask 177304   ;;  %vm416_vm6 = vcmask 154648  }
  0x64   : > { %v219_v9 = vmax.f32 %v217_v5, %v218_v7  ;;  %v225_v11 = vrot.slane %v224_v8, 2  ;;  %v233_v21 = vadd.f32 %v232_v19, %v231_v17  ;;  %v239_v26 = vrot.slane %v238_v24, 2  ;;  %260 = vst.msk [vmem:[#allocation2 + $0x8] sm:$0xff] %vm258_vm3, %v5319_v32  ;;  %264 = vst.msk [vmem:[#allocation2 + $0x20] sm:$0xff] %vm258_vm3, %v5319_v32  ;;  %s3493_s5 = sld [smem:[#allocation7 + $0x3]]  ;;  %s3498_s6 = sld [smem:[#allocation7 + $0x4]] }
  0x65   : > { %259 = vst.msk [vmem:[#allocation2] sm:$0xff] %vm258_vm3, %v5319_v32  ;;  %263 = vst.msk [vmem:[#allocation2 + $0x18] sm:$0xff] %vm258_vm3, %v5319_v32  ;;  %v313_v38 = vunpack.c.0.s8 %v312_v35  ;;  %v344_v44 = vunpack.c.l.s4 %v3161_v43  ;;  %s5317_s7 = smov 127   ;;  %s3504_s8 = sld [smem:[#allocation7 + $0x5]]  ;;  %vm589_vm7 = vcmask 1046528   ;;  %vm607_vm8 = vcmask 1045504  }
  0x66   : > { %v220_v10 = vrot.slane %v219_v9, 1  ;;  %v226_v14 = vmax.f32 %v224_v8, %v225_v11  ;;  %v234_v23 = vrot.slane %v233_v21, 1  ;;  %v240_v28 = vadd.f32 %v239_v26, %v238_v24  ;;  %254 = vst.msk [vmem:[#allocation2 + $0x10] sm:$0x3f] %vm253_vm4, %v5319_v32  ;;  %257 = vst.msk [vmem:[#allocation2 + $0x28] sm:$0x3f] %vm253_vm4, %v5319_v32 }
  0x67   : > { %v3452_v45 = vsub.s32 %v313_v38, %v3448_v39  ;;  %v345_v50 = vunpack.c.0.s8 %v344_v44  ;;  %262 = vst.msk [vmem:[#allocation2 + $0x10] sm:$0x3f] %vm261_vm5, %v5319_v32  ;;  %265 = vst.msk [vmem:[#allocation2 + $0x28] sm:$0x3f] %vm261_vm5, %v5319_v32  ;;  %s5315_s24 = smov 126   ;;  %s3529_s22 = sld [smem:[#allocation7 + $0x33]] }
  0x68   : > { %v3371_v13 = vmax.f32 %v219_v9, %v220_v10  ;;  %v227_v16 = vrot.slane %v226_v14, 1  ;;  %v235_v25 = vadd.f32 %v234_v23, %v233_v21  ;;  %v241_v29 = vrot.slane %v240_v28, 1  ;;  %p5400_p7 = scmp.ne.s32.totalorder %s5337_s23, 0 }
  0x69   : > { %5345 = vst [vmem:[#allocation16_spill] sm:$0xff] %v3452_v45  ;;  %v3457_v57 = vsub.s32 %v345_v50, %v3448_v39  ;;  %vm625_vm9 = vcmask 1044480   ;;  %vm660_vm10 = vcmask 1042432   ;;  %vm678_vm11 = vcmask 1041408  }
  0x6a   : > { %273 = vrot.lane.b32.xlu1 %v3371_v13, %s5301_s18  ;;  %267 = vrot.lane.b32.xlu0 %v3371_v13, %s5297_s20  ;;  %v3385_v18 = vmax.f32 %v226_v14, %v227_v16  ;;  %v3404_v27 = vmul.f32 0.25, %v235_v25  ;;  %v242_v30 = vadd.f32 %v241_v29, %v240_v28  ;;  %vm2653_vm12 = vcmask 130048  }
  0x6b   : > { %5346 = vst [vmem:[#allocation17_spill] sm:$0xff] %v3457_v57  ;;  %vm2655_vm13 = vcmask 261120   ;;  %vm2657_vm14 = vcmask 392192   ;;  %vm2659_vm15 = vcmask 523264   ;;  %vm2663_vm1 = vcmask 785408  }
  0x6c   : > { %v3418_v31 = vmul.f32 0.25, %v242_v30  ;;  %vm2665_vm2 = vcmask 916480  }
  0x6e   : > { %276 = vrot.lane.b32.xlu1 %v3371_v13, %s5305_s10  ;;  %270 = vrot.lane.b32.xlu0 %v3371_v13, %s5299_s25 }
  0x72   : > { %282 = vrot.lane.b32.xlu1 %v3371_v13, %s5307_s11  ;;  %279 = vrot.lane.b32.xlu0 %v3371_v13, %s5303_s17 }
  0x76   : > { %285 = vrot.lane.b32.xlu0 %v3371_v13, %s5309_s27  ;;  %289 = vrot.lane.b32.xlu1 %v3385_v18, %s5297_s20 }
  0x7a   : > { %292 = vrot.lane.b32.xlu0 %v3385_v18, %s5299_s25  ;;  %295 = vrot.lane.b32.xlu1 %v3385_v18, %s5301_s18 }
  0x7e   : > { %298 = vrot.lane.b32.xlu0 %v3385_v18, %s5305_s10  ;;  %301 = vrot.lane.b32.xlu1 %v3385_v18, %s5303_s17 }
  0x82   : > { %304 = vrot.lane.b32.xlu0 %v3385_v18, %s5307_s11  ;;  %307 = vrot.lane.b32.xlu1 %v3385_v18, %s5309_s27 }
  0x86   : > { %420 = vrot.lane.b32.xlu0 %v3404_v27, %s5297_s20  ;;  %423 = vrot.lane.b32.xlu1 %v3404_v27, %s5299_s25 }
  0x8a   : > { %426 = vrot.lane.b32.xlu0 %v3404_v27, %s5301_s18  ;;  %429 = vrot.lane.b32.xlu1 %v3404_v27, %s5305_s10 }
  0x8e   : > { %432 = vrot.lane.b32.xlu0 %v3404_v27, %s5303_s17  ;;  %435 = vrot.lane.b32.xlu1 %v3404_v27, %s5307_s11 }
  0x92   : > { %438 = vrot.lane.b32.xlu0 %v3404_v27, %s5309_s27  ;;  %442 = vrot.lane.b32.xlu1 %v3418_v31, %s5297_s20  ;;  %s2816_s20 = sld [smem:[#allocation7 + $0xf]] }
  0x96   : > { %445 = vrot.lane.b32.xlu0 %v3418_v31, %s5299_s25  ;;  %448 = vrot.lane.b32.xlu1 %v3418_v31, %s5301_s18  ;;  %s2817_s25 = sld [smem:[#allocation7 + $0x16]]  ;;  %s3865_s18 = sld [smem:[#allocation7 + $0x1b]] }
  0x9a   : > { %451 = vrot.lane.b32.xlu0 %v3418_v31, %s5305_s10  ;;  %454 = vrot.lane.b32.xlu1 %v3418_v31, %s5303_s17  ;;  %s3867_s17 = sld [smem:[#allocation7 + $0x15]]  ;;  %s3876_s10 = sld [smem:[#allocation7 + $0x1c]] }
  0x9e   : > { %457 = vrot.lane.b32.xlu0 %v3418_v31, %s5307_s11  ;;  %460 = vrot.lane.b32.xlu1 %v3418_v31, %s5309_s27  ;;  %s3885_s11 = sld [smem:[#allocation7 + $0x2a]] }
  0x9f   : > { %s3891_s27 = sld [smem:[#allocation7 + $0x22]] }
  0xdc   : > { %v274_v33 = vpop.permute.xlu1 %273  ;;  %v268_v37 = vpop.permute.xlu0 %267 }
  0xdd   : > { %v318_v46 = vcombine.low %v268_v37, %v274_v33 }
  0xdf   : > { %v325_v52 = vrot.slane %v318_v46, %v3452_v45 }
  0xe0   : > { %v277_v40 = vpop.permute.xlu1 %276  ;;  %v271_v41 = vpop.permute.xlu0 %270 }
  0xe1   : > { %v310_v42 = vcombine.low %v3371_v13, %v271_v41 }
  0xe3   : > { %v317_v49 = vrot.slane %v310_v42, %v3452_v45 }
  0xe4   : > { %v283_v47 = vpop.permute.xlu1 %282  ;;  %v280_v48 = vpop.permute.xlu0 %279 }
  0xe5   : > { %v326_v51 = vcombine.low %v277_v40, %v283_v47  ;;  %v342_v56 = vcombine.low %v317_v49, %v325_v52 }
  0xe7   : > { %v333_v58 = vrot.slane %v326_v51, %v3452_v45  ;;  %v349_v63 = vrot.slane %v342_v56, %v3457_v57 }
  0xe8   : > { %v286_v53 = vpop.permute.xlu0 %285  ;;  %v290_v54 = vpop.permute.xlu1 %289 }
  0xe9   : > { %v334_v55 = vcombine.low %v280_v48, %v286_v53 }
  0xeb   : > { %v341_v59 = vrot.slane %v334_v55, %v3452_v45 }
  0xec   : > { %v293_v60 = vpop.permute.xlu0 %292  ;;  %v296_v61 = vpop.permute.xlu1 %295 }
  0xed   : > { %v350_v62 = vcombine.low %v333_v58, %v341_v59  ;;  %v359_v0 = vcombine.low %v3385_v18, %v293_v60  ;;  %v367_v1 = vcombine.low %v290_v54, %v296_v61 }
  0xef   : > { %v357_v2 = vrot.slane %v350_v62, %v3457_v57  ;;  %v366_v6 = vrot.slane %v359_v0, %v3452_v45  ;;  %v374_v7 = vrot.slane %v367_v1, %v3452_v45  ;;  %v689_v0 = vstv %s2814_s29  ;;  %s5313_s29 = smov 125  }
  0xf0   : > { %v299_v3 = vpop.permute.xlu0 %298  ;;  %v302_v4 = vpop.permute.xlu1 %301 }
  0xf1   : > { %v358_v5 = vcombine.low %v349_v63, %v357_v2  ;;  %v391_v12 = vcombine.low %v366_v6, %v374_v7  ;;  %v969_v6 = vstv %s3493_s5  ;;  %s3522_s5 = sld [smem:[#allocation7 + $0x32]] }
  0xf3   : > { %410 = vrot.lane.b32.xlu0 %v358_v5, %s3162_s28  ;;  %v398_v18 = vrot.slane %v391_v12, %v3457_v57  ;;  %v1249_v12 = vstv %s3504_s8  ;;  %s2815_s8 = sld [smem:[#allocation7 + $0x8]] }
  0xf4   : > { %v305_v8 = vpop.permute.xlu0 %304  ;;  %v308_v9 = vpop.permute.xlu1 %307 }
  0xf5   : > { %v375_v10 = vcombine.low %v299_v3, %v305_v8  ;;  %v383_v11 = vcombine.low %v302_v4, %v308_v9  ;;  %v829_v3 = vstv %s2821_s30  ;;  %v1109_v8 = vstv %s3498_s6  ;;  %s5311_s30 = smov 124   ;;  %s3167_s6 = smov 123  }
  0xf7   : > { %v382_v13 = vrot.slane %v375_v10, %v3452_v45  ;;  %v390_v14 = vrot.slane %v383_v11, %v3452_v45 }
  0xf8   : > { %v421_v15 = vpop.permute.xlu0 %420  ;;  %v424_v16 = vpop.permute.xlu1 %423 }
  0xf9   : > { %v399_v17 = vcombine.low %v382_v13, %v390_v14  ;;  %v463_v26 = vcombine.low %v3404_v27, %v424_v16 }
  0xfb   : > { %v406_v19 = vrot.slane %v399_v17, %v3457_v57  ;;  %v470_v34 = vrot.slane %v463_v26, %v3452_v45 }
  0xfc   : > { %v427_v20 = vpop.permute.xlu0 %426  ;;  %v430_v21 = vpop.permute.xlu1 %429 }
  0xfd   : > { %v407_v22 = vcombine.low %v398_v18, %v406_v19  ;;  %v471_v23 = vcombine.low %v421_v15, %v427_v20  ;;  %v1640_v20 = vstv %s3522_s5  ;;  %s2818_s5 = sld [smem:[#allocation7 + $0x1d]] }
  0xff   : > { %412 = vrot.lane.b32.xlu1 %v407_v22, %s3162_s28  ;;  %v478_v28 = vrot.slane %v471_v23, %v3452_v45 }
 0x100   : > { %v433_v24 = vpop.permute.xlu0 %432  ;;  %v436_v25 = vpop.permute.xlu1 %435 }
 0x101   : > { %v479_v29 = vcombine.low %v430_v21, %v436_v25  ;;  %v495_v36 = vcombine.low %v470_v34, %v478_v28  ;;  %v1780_v25 = vstv %s3529_s22  ;;  %v724_v34 = vstv %s2816_s20  ;;  %s2819_s22 = sld [smem:[#allocation7 + $0x24]]  ;;  %s2820_s20 = sld [smem:[#allocation7 + $0x2b]] }
 0x103   : > { %v486_v37 = vrot.slane %v479_v29, %v3452_v45  ;;  %v502_v27 = vrot.slane %v495_v36, %v3457_v57 }
 0x104   : > { %v439_v30 = vpop.permute.xlu0 %438  ;;  %v443_v33 = vpop.permute.xlu1 %442 }
 0x105   : > { %v487_v35 = vcombine.low %v433_v24, %v439_v30  ;;  %v703_v24 = vstv %s2815_s8  ;;  %s2823_s8 = sld [smem:[#allocation7 + $0x10]] }
 0x107   : > { %v494_v38 = vrot.slane %v487_v35, %v3452_v45 }
 0x108   : > { %v446_v40 = vpop.permute.xlu0 %445  ;;  %v449_v41 = vpop.permute.xlu1 %448 }
 0x109   : > { %v503_v42 = vcombine.low %v486_v37, %v494_v38  ;;  %v512_v43 = vcombine.low %v3418_v31, %v446_v40  ;;  %v520_v44 = vcombine.low %v443_v33, %v449_v41  ;;  %v745_v40 = vstv %s2817_s25  ;;  %s2822_s25 = sld [smem:[#allocation7 + $0x9]] }
 0x10b   : > { %v510_v46 = vrot.slane %v503_v42, %v3457_v57  ;;  %v519_v50 = vrot.slane %v512_v43, %v3452_v45  ;;  %v527_v51 = vrot.slane %v520_v44, %v3452_v45 }
 0x10c   : > { %v452_v47 = vpop.permute.xlu0 %451  ;;  %v455_v48 = vpop.permute.xlu1 %454 }
 0x10d   : > { %v511_v49 = vcombine.low %v502_v27, %v510_v46  ;;  %v544_v56 = vcombine.low %v519_v50, %v527_v51 }
 0x10f   : > { %563 = vrot.lane.b32.xlu0 %v511_v49, %s3162_s28  ;;  %v551_v60 = vrot.slane %v544_v56, %v3457_v57  ;;  %v766_v49 = vstv %s2818_s5  ;;  %v787_v56 = vstv %s2819_s22  ;;  %s2824_s5 = sld [smem:[#allocation7 + $0x17]]  ;;  %s2825_s22 = sld [smem:[#allocation7 + $0x1e]] }
 0x110   : > { %v458_v52 = vpop.permute.xlu0 %457  ;;  %v461_v53 = vpop.permute.xlu1 %460 }
 0x111   : > { %v528_v54 = vcombine.low %v452_v47, %v458_v52  ;;  %v536_v55 = vcombine.low %v455_v48, %v461_v53 }
 0x113   : > { %v535_v31 = vrot.slane %v528_v54, %v3452_v45  ;;  %v543_v58 = vrot.slane %v536_v55, %v3452_v45 }
 0x115   : > { %v552_v59 = vcombine.low %v535_v31, %v543_v58 }
 0x117   : > { %v559_v61 = vrot.slane %v552_v59, %v3457_v57 }
 0x119   : > { %v560_v62 = vcombine.low %v551_v60, %v559_v61 }
 0x11b   : > { %565 = vrot.lane.b32.xlu1 %v560_v62, %s3162_s28  ;;  %s3509_s28 = sld [smem:[#allocation7 + $0x6]] }
 0x121   : > { %v1389_v15 = vstv %s3509_s28  ;;  %s3168_s28 = smov 122  }
 0x165   : > { %v411_v63 = vpop.permute.xlu0 %410 }
 0x166   : > { %417 = vst.msk [vmem:[#allocation2 + $0x3] sm:$0xff] %vm416_vm6, %v411_v63 }
 0x16d   : > { %v3495_v1 = vld [vmem:[#allocation2] sm:$0xff] }
 0x16e   : > { %v690_v2 = vmul.f32 %v689_v0, %v3495_v1  ;;  %v830_v5 = vmul.f32 %v829_v3, %v3495_v1  ;;  %v970_v7 = vmul.f32 %v969_v6, %v3495_v1  ;;  %v1110_v10 = vmul.f32 %v1109_v8, %v3495_v1 }
 0x16f   : > { %v1250_v13 = vmul.f32 %v1249_v12, %v3495_v1  ;;  %v1390_v17 = vmul.f32 %v1389_v15, %v3495_v1  ;;  %v704_v29 = vmul.f32 %v703_v24, %v3495_v1  ;;  %v725_v38 = vmul.f32 %v724_v34, %v3495_v1 }
 0x170   : > { %694 = vrot.lane.b32.xlu0 %v690_v2, %s5317_s7  ;;  %v746_v47 = vmul.f32 %v745_v40, %v3495_v1  ;;  %v767_v55 = vmul.f32 %v766_v49, %v3495_v1  ;;  %v788_v63 = vmul.f32 %v787_v56, %v3495_v1  ;;  %v808_v2 = vstv %s2820_s20  ;;  %s2826_s20 = sld [smem:[#allocation7 + $0x25]] }
 0x171   : > { %v413_v4 = vpop.permute.xlu1 %412  ;;  %v710_v37 = vrot.slane %v704_v29, 1  ;;  %v731_v46 = vrot.slane %v725_v38, 2 }
 0x172   : > { %418 = vst.msk [vmem:[#allocation2 + $0xb] sm:$0xff] %vm416_vm6, %v413_v4  ;;  %v752_v54 = vrot.slane %v746_v47, 3 }
 0x174   : > { %834 = vrot.lane.b32.xlu0 %v830_v5, %s5315_s24 }
 0x178   : > { %974 = vrot.lane.b32.xlu0 %v970_v7, %s5313_s29 }
 0x179   : > { %v3512_v9 = vld [vmem:[#allocation2 + $0x8] sm:$0xff]  ;;  %v3556_v44 = vld [vmem:[#allocation2 + $0x10] sm:$0x3f] }
 0x17a   : > { %v691_v11 = vmul.f32 %v689_v0, %v3512_v9  ;;  %v831_v14 = vmul.f32 %v829_v3, %v3512_v9  ;;  %v971_v18 = vmul.f32 %v969_v6, %v3512_v9  ;;  %v1111_v19 = vmul.f32 %v1109_v8, %v3512_v9 }
 0x17b   : > { %v1251_v23 = vmul.f32 %v1249_v12, %v3512_v9  ;;  %v705_v26 = vmul.f32 %v703_v24, %v3512_v9  ;;  %v1391_v33 = vmul.f32 %v1389_v15, %v3512_v9  ;;  %v726_v36 = vmul.f32 %v724_v34, %v3512_v9 }
 0x17c   : > { %1114 = vrot.lane.b32.xlu0 %v1110_v10, %s5311_s30  ;;  %696 = vrot.lane.b32.xlu1 %v691_v11, %s5317_s7  ;;  %v3554_v43 = vmul.f32 %v745_v40, %v3512_v9  ;;  %v3566_v52 = vmul.f32 %v766_v49, %v3512_v9  ;;  %v706_v53 = vmul.f32 %v703_v24, %v3556_v44  ;;  %v773_v0 = vrot.slane %v767_v55, 4 }
 0x17d   : > { %v711_v35 = vrot.slane %v705_v26, 1  ;;  %v732_v42 = vrot.slane %v726_v36, 2  ;;  %v3574_v58 = vmul.f32 %v787_v56, %v3512_v9  ;;  %v727_v62 = vmul.f32 %v724_v34, %v3556_v44 }
 0x17e   : > { %v753_v51 = vrot.slane %v3554_v43, 3  ;;  %v774_v60 = vrot.slane %v3566_v52, 4  ;;  %v713_v61 = vrot.slane %v706_v53, 1  ;;  %v3584_v4 = vmul.f32 %v808_v2, %v3512_v9 }
 0x17f   : > { %v712_v41 = vsel %vm589_vm7, %v710_v37, %v711_v35  ;;  %v733_v50 = vsel %vm607_vm8, %v731_v46, %v732_v42  ;;  %v795_v3 = vrot.slane %v3574_v58, 5  ;;  %v734_v7 = vrot.slane %v727_v62, 2 }
 0x180   : > { %1254 = vrot.lane.b32.xlu0 %v1250_v13, %s3167_s6  ;;  %836 = vrot.lane.b32.xlu1 %v831_v14, %s5315_s24  ;;  %v754_v59 = vsel %vm625_vm9, %v752_v54, %v753_v51  ;;  %v775_v5 = vsel %vm214_vm0, %v773_v0, %v774_v60  ;;  %v714_v6 = vsel %vm589_vm7, %v711_v35, %v713_v61  ;;  %v794_v10 = vrot.slane %v788_v63, 5 }
 0x181   : > { %v564_v16 = vpop.permute.xlu0 %563  ;;  %v748_v8 = vmul.f32 %v745_v40, %v3556_v44  ;;  %v809_v11 = vmul.f32 %v808_v2, %v3495_v1  ;;  %v816_v13 = vrot.slane %v3584_v4, 6  ;;  %v843_v14 = vstv %s2822_s25  ;;  %s2827_s25 = sld [smem:[#allocation7 + $0x2c]] }
 0x182   : > { %570 = vst.msk [vmem:[#allocation2 + $0x1b] sm:$0xff] %vm416_vm6, %v564_v16  ;;  %v796_v12 = vsel %vm660_vm10, %v794_v10, %v795_v3  ;;  %v735_v15 = vsel %vm607_vm8, %v732_v42, %v734_v7  ;;  %v790_v29 = vmul.f32 %v787_v56, %v3556_v44  ;;  %v885_v34 = vstv %s2824_s5  ;;  %s2830_s5 = sld [smem:[#allocation7 + $0x11]] }
 0x183   : > { %v755_v16 = vrot.slane %v748_v8, 3  ;;  %v3610_v35 = vmul.f32 %v885_v34, %v3512_v9  ;;  %v811_v36 = vmul.f32 %v808_v2, %v3556_v44  ;;  %v886_v42 = vmul.f32 %v885_v34, %v3495_v1 }
 0x184   : > { %1394 = vrot.lane.b32.xlu0 %v1390_v17, %s3168_s28  ;;  %976 = vrot.lane.b32.xlu1 %v971_v18, %s5313_s29  ;;  %v845_v17 = vmul.f32 %v843_v14, %v3512_v9  ;;  %v769_v18 = vmul.f32 %v766_v49, %v3556_v44  ;;  %v906_v46 = vstv %s2825_s22  ;;  %v846_v52 = vmul.f32 %v843_v14, %v3556_v44  ;;  %s2831_s22 = sld [smem:[#allocation7 + $0x18]] }
 0x185   : > { %v893_v47 = vrot.slane %v3610_v35, 3  ;;  %v892_v53 = vrot.slane %v886_v42, 3  ;;  %v907_v54 = vmul.f32 %v906_v46, %v3495_v1  ;;  %v888_v7 = vmul.f32 %v885_v34, %v3556_v44 }
 0x186   : > { %v851_v26 = vrot.slane %v845_v17, 1  ;;  %v909_v17 = vmul.f32 %v906_v46, %v3556_v44 }
 0x187   : > { %v894_v55 = vsel %vm625_vm9, %v892_v53, %v893_v47  ;;  %v913_v62 = vrot.slane %v907_v54, 4  ;;  %v948_v0 = vstv %s2827_s25  ;;  %s2833_s25 = sld [smem:[#allocation7 + $0x26]] }
 0x188   : > { %1116 = vrot.lane.b32.xlu1 %v1111_v19, %s5311_s30  ;;  %v815_v19 = vrot.slane %v809_v11, 6  ;;  %v949_v8 = vmul.f32 %v948_v0, %v3495_v1 }
 0x189   : > { %v3536_v21 = vld [vmem:[#allocation2 + $0x18] sm:$0xff] }
 0x18a   : > { %v1641_v22 = vmul.f32 %v1640_v20, %v3536_v21  ;;  %v1781_v30 = vmul.f32 %v1780_v25, %v3536_v21 }
 0x18c   : > { %1645 = vrot.lane.b32.xlu0 %v1641_v22, %s5317_s7  ;;  %1256 = vrot.lane.b32.xlu1 %v1251_v23, %s3167_s6  ;;  %v864_v22 = vstv %s2823_s8  ;;  %v817_v23 = vsel %vm678_vm11, %v815_v19, %v816_v13  ;;  %s2829_s8 = sld [smem:[#allocation7 + $0xa]] }
 0x18d   : > { %v566_v28 = vpop.permute.xlu1 %565  ;;  %v3602_v24 = vmul.f32 %v864_v22, %v3512_v9  ;;  %v867_v61 = vmul.f32 %v864_v22, %v3556_v44  ;;  %v1067_v54 = vstv %s2833_s25  ;;  %s2839_s25 = sld [smem:[#allocation7 + $0x20]] }
 0x18e   : > { %571 = vst.msk [vmem:[#allocation2 + $0x23] sm:$0xff] %vm416_vm6, %v566_v28  ;;  %v776_v28 = vrot.slane %v769_v18, 4  ;;  %v955_v18 = vrot.slane %v949_v8, 6 }
 0x18f   : > { %v872_v40 = vrot.slane %v3602_v24, 2 }
 0x190   : > { %1785 = vrot.lane.b32.xlu0 %v1781_v30, %s5315_s24  ;;  %1396 = vrot.lane.b32.xlu1 %v1391_v33, %s3168_s28  ;;  %v865_v33 = vmul.f32 %v864_v22, %v3495_v1  ;;  %v777_v38 = vsel %vm214_vm0, %v774_v60, %v776_v28 }
 0x192   : > { %v871_v43 = vrot.slane %v865_v33, 2  ;;  %v983_v11 = vstv %s2829_s8  ;;  %v1025_v33 = vstv %s2831_s22  ;;  %s2834_s8 = sld [smem:[#allocation7 + $0x2d]]  ;;  %s2837_s22 = sld [smem:[#allocation7 + $0x12]] }
 0x193   : > { %v984_v19 = vmul.f32 %v983_v11, %v3495_v1  ;;  %v3666_v35 = vmul.f32 %v1025_v33, %v3512_v9  ;;  %v1026_v42 = vmul.f32 %v1025_v33, %v3495_v1 }
 0x194   : > { %715 = vrot.lane.b32.xlu0 %v712_v41, %s5317_s7  ;;  %v797_v41 = vrot.slane %v790_v29, 5  ;;  %v873_v49 = vsel %vm607_vm8, %v871_v43, %v872_v40 }
 0x195   : > { %v3559_v27 = vld [vmem:[#allocation2 + $0x20] sm:$0xff]  ;;  %v990_v29 = vrot.slane %v984_v19, 1  ;;  %v1032_v53 = vrot.slane %v1026_v42, 3  ;;  %v1186_v42 = vstv %s2839_s25  ;;  %s2845_s25 = sld [smem:[#allocation7 + $0x1a]] }
 0x196   : > { %v1642_v48 = vmul.f32 %v1640_v20, %v3559_v27  ;;  %v1782_v31 = vmul.f32 %v1780_v25, %v3559_v27  ;;  %v844_v20 = vmul.f32 %v843_v14, %v3495_v1  ;;  %v756_v25 = vsel %vm625_vm9, %v753_v51, %v755_v16 }
 0x197   : > { %v818_v51 = vrot.slane %v811_v36, 6  ;;  %v895_v16 = vrot.slane %v888_v7, 3 }
 0x198   : > { %736 = vrot.lane.b32.xlu0 %v733_v50, %s5317_s7  ;;  %1647 = vrot.lane.b32.xlu1 %v1642_v48, %s5317_s7  ;;  %v850_v30 = vrot.slane %v844_v20, 1  ;;  %v3621_v48 = vmul.f32 %v906_v46, %v3512_v9  ;;  %v798_v50 = vsel %vm660_vm10, %v795_v3, %v797_v41  ;;  %v3639_v3 = vmul.f32 %v948_v0, %v3512_v9 }
 0x199   : > { %v819_v58 = vsel %vm678_vm11, %v816_v13, %v818_v51  ;;  %v3648_v13 = vmul.f32 %v983_v11, %v3512_v9  ;;  %v896_v24 = vsel %vm625_vm9, %v893_v47, %v895_v16  ;;  %v1033_v46 = vrot.slane %v3666_v35, 3 }
 0x19a   : > { %v852_v37 = vsel %vm589_vm7, %v850_v30, %v851_v26  ;;  %v914_v56 = vrot.slane %v3621_v48, 4  ;;  %v986_v51 = vmul.f32 %v983_v11, %v3556_v44  ;;  %v1144_v19 = vstv %s2837_s22  ;;  %s2843_s22 = sld [smem:[#allocation7 + $0xc]] }
 0x19b   : > { %v991_v22 = vrot.slane %v3648_v13, 1 }
 0x19c   : > { %757 = vrot.lane.b32.xlu0 %v754_v59, %s5317_s7  ;;  %1787 = vrot.lane.b32.xlu1 %v1782_v31, %s5315_s24  ;;  %v927_v31 = vstv %s2826_s20  ;;  %v853_v59 = vrot.slane %v846_v52, 1  ;;  %v915_v2 = vsel %vm214_vm0, %v913_v62, %v914_v56  ;;  %s2832_s20 = sld [smem:[#allocation7 + $0x1f]]  ;;  %v1068_v62 = vmul.f32 %v1067_v54, %v3495_v1 }
 0x19d   : > { %v929_v60 = vmul.f32 %v927_v31, %v3512_v9  ;;  %v928_v63 = vmul.f32 %v927_v31, %v3495_v1  ;;  %v930_v28 = vmul.f32 %v927_v31, %v3556_v44  ;;  %v992_v34 = vsel %vm589_vm7, %v990_v29, %v991_v22 }
 0x19e   : > { %v854_v4 = vsel %vm589_vm7, %v851_v26, %v853_v59  ;;  %v1034_v31 = vsel %vm625_vm9, %v1032_v53, %v1033_v46  ;;  %v993_v59 = vrot.slane %v986_v51, 1  ;;  %v1074_v7 = vrot.slane %v1068_v62, 5 }
 0x19f   : > { %v934_v10 = vrot.slane %v928_v63, 5  ;;  %v1145_v29 = vmul.f32 %v1144_v19, %v3495_v1  ;;  %v1187_v51 = vmul.f32 %v1186_v42, %v3495_v1 }
 0x1a0   : > { %778 = vrot.lane.b32.xlu0 %v775_v5, %s5317_s7  ;;  %717 = vrot.lane.b32.xlu1 %v714_v6, %s5317_s7  ;;  %v935_v5 = vrot.slane %v929_v60, 5  ;;  %v874_v6 = vrot.slane %v867_v61, 2 }
 0x1a2   : > { %v936_v14 = vsel %vm660_vm10, %v934_v10, %v935_v5  ;;  %v1046_v43 = vstv %s2832_s20  ;;  %s2838_s20 = sld [smem:[#allocation7 + $0x19]] }
 0x1a3   : > { %v3675_v47 = vmul.f32 %v1046_v43, %v3512_v9  ;;  %v1047_v52 = vmul.f32 %v1046_v43, %v3495_v1  ;;  %v1049_v16 = vmul.f32 %v1046_v43, %v3556_v44  ;;  %v3731_v43 = vmul.f32 %v1186_v42, %v3512_v9 }
 0x1a4   : > { %799 = vrot.lane.b32.xlu0 %v796_v12, %s5317_s7  ;;  %738 = vrot.lane.b32.xlu1 %v735_v15, %s5317_s7  ;;  %v956_v12 = vrot.slane %v3639_v3, 6  ;;  %v875_v15 = vsel %vm607_vm8, %v872_v40, %v874_v6  ;;  %v951_v40 = vmul.f32 %v948_v0, %v3556_v44  ;;  %v994_v3 = vsel %vm589_vm7, %v991_v22, %v993_v59 }
 0x1a5   : > { %v1053_v61 = vrot.slane %v1047_v52, 4  ;;  %v1028_v6 = vmul.f32 %v1025_v33, %v3556_v44  ;;  %v3712_v22 = vmul.f32 %v1144_v19, %v3512_v9 }
 0x1a6   : > { %v957_v20 = vsel %vm678_vm11, %v955_v18, %v956_v12 }
 0x1a7   : > { %v1152_v33 = vrot.slane %v3712_v22, 2 }
 0x1a8   : > { %820 = vrot.lane.b32.xlu0 %v817_v23, %s5317_s7  ;;  %759 = vrot.lane.b32.xlu1 %v756_v25, %s5317_s7  ;;  %v1004_v23 = vstv %s2830_s5  ;;  %v916_v25 = vrot.slane %v909_v17, 4  ;;  %s2836_s5 = sld [smem:[#allocation7 + $0xb]] }
 0x1a9   : > { %v1006_v26 = vmul.f32 %v1004_v23, %v3512_v9  ;;  %v1005_v30 = vmul.f32 %v1004_v23, %v3495_v1  ;;  %v1007_v60 = vmul.f32 %v1004_v23, %v3556_v44 }
 0x1aa   : > { %v917_v36 = vsel %vm214_vm0, %v914_v56, %v916_v25  ;;  %v3685_v56 = vmul.f32 %v1067_v54, %v3512_v9  ;;  %v1056_v25 = vrot.slane %v1049_v16, 4 }
 0x1ab   : > { %v1011_v41 = vrot.slane %v1005_v30, 2 }
 0x1ac   : > { %855 = vrot.lane.b32.xlu0 %v852_v37, %s5315_s24  ;;  %780 = vrot.lane.b32.xlu1 %v777_v38, %s5317_s7  ;;  %v1012_v37 = vrot.slane %v1006_v26, 2  ;;  %v937_v38 = vrot.slane %v930_v28, 5  ;;  %v1075_v0 = vrot.slane %v3685_v56, 5  ;;  %v1070_v26 = vmul.f32 %v1067_v54, %v3556_v44 }
 0x1ad   : > { %v1194_v54 = vrot.slane %v3731_v43, 4 }
 0x1ae   : > { %v1013_v48 = vsel %vm607_vm8, %v1011_v41, %v1012_v37  ;;  %v1123_v10 = vstv %s2836_s5  ;;  %v1076_v11 = vsel %vm660_vm10, %v1074_v7, %v1075_v0  ;;  %s2841_s5 = sld [smem:[#allocation7 + $0x2e]] }
 0x1af   : > { %v1124_v17 = vmul.f32 %v1123_v10, %v3495_v1 }
 0x1b0   : > { %876 = vrot.lane.b32.xlu0 %v873_v49, %s5315_s24  ;;  %801 = vrot.lane.b32.xlu1 %v798_v50, %s5317_s7  ;;  %v938_v49 = vsel %vm660_vm10, %v935_v5, %v937_v38  ;;  %v958_v50 = vrot.slane %v951_v40, 6  ;;  %v1151_v40 = vrot.slane %v1145_v29, 2 }
 0x1b1   : > { %v1130_v28 = vrot.slane %v1124_v17, 1 }
 0x1b4   : > { %897 = vrot.lane.b32.xlu0 %v894_v55, %s5315_s24  ;;  %822 = vrot.lane.b32.xlu1 %v819_v58, %s5317_s7  ;;  %v1054_v55 = vrot.slane %v3675_v47, 4  ;;  %v959_v58 = vsel %vm678_vm11, %v956_v12, %v958_v50  ;;  %v3703_v12 = vmul.f32 %v1123_v10, %v3512_v9  ;;  %v1153_v47 = vsel %vm607_vm8, %v1151_v40, %v1152_v33  ;;  %s3934_s7 = sld [smem:[#allocation7 + $0x47]] }
 0x1b6   : > { %v1055_v63 = vsel %vm214_vm0, %v1053_v61, %v1054_v55  ;;  %v1057_v35 = vsel %vm214_vm0, %v1054_v55, %v1056_v25  ;;  %v1193_v61 = vrot.slane %v1187_v51, 4 }
 0x1b8   : > { %918 = vrot.lane.b32.xlu0 %v915_v2, %s5315_s24  ;;  %857 = vrot.lane.b32.xlu1 %v854_v4, %s5315_s24  ;;  %v1088_v2 = vstv %s2834_s8  ;;  %v1014_v4 = vrot.slane %v1007_v60, 2  ;;  %s2840_s8 = sld [smem:[#allocation7 + $0x27]]  ;;  %v1147_v60 = vmul.f32 %v1144_v19, %v3556_v44 }
 0x1b9   : > { %v1090_v5 = vmul.f32 %v1088_v2, %v3512_v9  ;;  %v1089_v8 = vmul.f32 %v1088_v2, %v3495_v1  ;;  %v1091_v38 = vmul.f32 %v1088_v2, %v3556_v44 }
 0x1ba   : > { %v1015_v13 = vsel %vm607_vm8, %v1012_v37, %v1014_v4 }
 0x1bb   : > { %v1095_v18 = vrot.slane %v1089_v8, 6  ;;  %v1098_v50 = vrot.slane %v1091_v38, 6 }
 0x1bc   : > { %939 = vrot.lane.b32.xlu0 %v936_v14, %s5315_s24  ;;  %878 = vrot.lane.b32.xlu1 %v875_v15, %s5315_s24  ;;  %v1096_v14 = vrot.slane %v1090_v5, 6  ;;  %v1035_v15 = vrot.slane %v1028_v6, 3  ;;  %v1154_v5 = vrot.slane %v1147_v60, 2 }
 0x1be   : > { %v1097_v23 = vsel %vm678_vm11, %v1095_v18, %v1096_v14  ;;  %v1207_v56 = vstv %s2840_s8  ;;  %v1155_v16 = vsel %vm607_vm8, %v1152_v33, %v1154_v5  ;;  %s2846_s8 = sld [smem:[#allocation7 + $0x21]] }
 0x1bf   : > { %v3746_v59 = vmul.f32 %v1207_v56, %v3512_v9  ;;  %v1208_v62 = vmul.f32 %v1207_v56, %v3495_v1  ;;  %v1210_v33 = vmul.f32 %v1207_v56, %v3556_v44 }
 0x1c0   : > { %960 = vrot.lane.b32.xlu0 %v957_v20, %s5315_s24  ;;  %899 = vrot.lane.b32.xlu1 %v896_v24, %s5315_s24  ;;  %v1131_v20 = vrot.slane %v3703_v12, 1  ;;  %v1036_v24 = vsel %vm625_vm9, %v1033_v46, %v1035_v15  ;;  %v1126_v46 = vmul.f32 %v1123_v10, %v3556_v44 }
 0x1c1   : > { %v1215_v4 = vrot.slane %v3746_v59, 5  ;;  %v1214_v8 = vrot.slane %v1208_v62, 5  ;;  %v1217_v43 = vrot.slane %v1210_v33, 5 }
 0x1c2   : > { %v1132_v30 = vsel %vm589_vm7, %v1130_v28, %v1131_v20  ;;  %v1133_v55 = vrot.slane %v1126_v46, 1 }
 0x1c3   : > { %v1216_v15 = vsel %vm660_vm10, %v1214_v8, %v1215_v4  ;;  %v1218_v56 = vsel %vm660_vm10, %v1215_v4, %v1217_v43 }
 0x1c4   : > { %995 = vrot.lane.b32.xlu0 %v992_v34, %s5313_s29  ;;  %920 = vrot.lane.b32.xlu1 %v917_v36, %s5315_s24  ;;  %v1165_v34 = vstv %s2838_s20  ;;  %v1077_v36 = vrot.slane %v1070_v26, 5  ;;  %v1134_v2 = vsel %vm589_vm7, %v1131_v20, %v1133_v55  ;;  %s2844_s20 = sld [smem:[#allocation7 + $0x13]] }
 0x1c5   : > { %v3724_v37 = vmul.f32 %v1165_v34, %v3512_v9  ;;  %v1166_v41 = vmul.f32 %v1165_v34, %v3495_v1  ;;  %v1168_v7 = vmul.f32 %v1165_v34, %v3556_v44 }
 0x1c7   : > { %v1172_v52 = vrot.slane %v1166_v41, 3  ;;  %v1175_v18 = vrot.slane %v1168_v7, 3 }
 0x1c8   : > { %1016 = vrot.lane.b32.xlu0 %v1013_v48, %s5313_s29  ;;  %941 = vrot.lane.b32.xlu1 %v938_v49, %s5315_s24  ;;  %v1078_v48 = vsel %vm660_vm10, %v1075_v0, %v1077_v36  ;;  %v1173_v49 = vrot.slane %v3724_v37, 3  ;;  %v1195_v0 = vsel %vm214_vm0, %v1193_v61, %v1194_v54  ;;  %v1305_v36 = vstv %s2845_s25  ;;  %s3845_s25 = sld [smem:[#allocation7 + $0x14]] }
 0x1c9   : > { %v3794_v40 = vmul.f32 %v1305_v36, %v3512_v9 }
 0x1ca   : > { %v1284_v26 = vstv %s2844_s20  ;;  %v1176_v29 = vsel %vm625_vm9, %v1173_v49, %v1175_v18  ;;  %s3816_s20 = sld [smem:[#allocation7 + $0xd]] }
 0x1cb   : > { %v1287_v7 = vmul.f32 %v1284_v26, %v3556_v44 }
 0x1cc   : > { %1037 = vrot.lane.b32.xlu0 %v1034_v31, %s5313_s29  ;;  %962 = vrot.lane.b32.xlu1 %v959_v58, %s5315_s24  ;;  %v1174_v31 = vsel %vm625_vm9, %v1172_v52, %v1173_v49  ;;  %v1099_v58 = vsel %vm678_vm11, %v1096_v14, %v1098_v50  ;;  %v1189_v14 = vmul.f32 %v1186_v42, %v3556_v44  ;;  %v1326_v50 = vstv %s2846_s8  ;;  %s3850_s8 = sld [smem:[#allocation7]] }
 0x1cd   : > { %v1313_v52 = vrot.slane %v3794_v40, 3  ;;  %v1327_v60 = vmul.f32 %v1326_v50, %v3495_v1  ;;  %v1294_v18 = vrot.slane %v1287_v7, 2  ;;  %s3932_s24 = sld [smem:[#allocation7 + $0x40]] }
 0x1ce   : > { %v1196_v25 = vrot.slane %v1189_v14, 4 }
 0x1cf   : > { %v1333_v8 = vrot.slane %v1327_v60, 4 }
 0x1d0   : > { %1058 = vrot.lane.b32.xlu0 %v1055_v63, %s5313_s29  ;;  %997 = vrot.lane.b32.xlu1 %v994_v3, %s5313_s29  ;;  %v1228_v3 = vstv %s2841_s5  ;;  %s2847_s5 = sld [smem:[#allocation7 + $0x28]]  ;;  %v1197_v41 = vsel %vm214_vm0, %v1194_v54, %v1196_v25  ;;  %v3808_v54 = vmul.f32 %v1326_v50, %v3512_v9 }
 0x1d1   : > { %v3758_v6 = vmul.f32 %v1228_v3, %v3512_v9  ;;  %v1229_v10 = vmul.f32 %v1228_v3, %v3495_v1  ;;  %v1231_v46 = vmul.f32 %v1228_v3, %v3556_v44 }
 0x1d2   : > { %v5353_v57 = vstv %s3850_s8 }
 0x1d3   : > { %v1236_v17 = vrot.slane %v3758_v6, 6  ;;  %v1235_v20 = vrot.slane %v1229_v10, 6  ;;  %v577_v45 = vmul.f32 %v5353_v57, %v3495_v1 }
 0x1d4   : > { %1079 = vrot.lane.b32.xlu0 %v1076_v11, %s5313_s29  ;;  %1018 = vrot.lane.b32.xlu1 %v1015_v13, %s5313_s29  ;;  %v1263_v11 = vstv %s2843_s22  ;;  %s2848_s22 = sld [smem:[#allocation7 + $0x2f]] }
 0x1d5   : > { %v3767_v13 = vmul.f32 %v1263_v11, %v3512_v9  ;;  %v1264_v19 = vmul.f32 %v1263_v11, %v3495_v1  ;;  %v1237_v28 = vsel %vm678_vm11, %v1235_v20, %v1236_v17 }
 0x1d6   : > { %v1347_v3 = vstv %s2847_s5  ;;  %s3852_s5 = sld [smem:[#allocation7 + $0x7]] }
 0x1d7   : > { %v1270_v34 = vrot.slane %v1264_v19, 1  ;;  %v3828_v6 = vmul.f32 %v1347_v3, %v3512_v9  ;;  %v1348_v10 = vmul.f32 %v1347_v3, %v3495_v1  ;;  %v1308_v19 = vmul.f32 %v1305_v36, %v3556_v44 }
 0x1d8   : > { %1100 = vrot.lane.b32.xlu0 %v1097_v23, %s5313_s29  ;;  %1039 = vrot.lane.b32.xlu1 %v1036_v24, %s5313_s29  ;;  %v1271_v24 = vrot.slane %v3767_v13, 1 }
 0x1da   : > { %v1272_v38 = vsel %vm589_vm7, %v1270_v34, %v1271_v24 }
 0x1dc   : > { %1135 = vrot.lane.b32.xlu0 %v1132_v30, %s5311_s30  ;;  %1060 = vrot.lane.b32.xlu1 %v1057_v35, %s5313_s29  ;;  %v3784_v30 = vmul.f32 %v1284_v26, %v3512_v9  ;;  %v1285_v35 = vmul.f32 %v1284_v26, %v3495_v1  ;;  %v3863_v26 = vstv %s3816_s20  ;;  %s3883_s20 = sld [smem:[#allocation7 + $0x23]]  ;;  %v3922_v60 = vstv %s3852_s5  ;;  %s4374_s5 = sld [smem:[#allocation7 + $0x5d]] }
 0x1de   : > { %v1292_v42 = vrot.slane %v3784_v30, 2  ;;  %v1291_v49 = vrot.slane %v1285_v35, 2  ;;  %v3874_v30 = vmul.f32 %v3863_v26, %v3512_v9  ;;  %v1315_v35 = vrot.slane %v1308_v19, 3 }
 0x1e0   : > { %1156 = vrot.lane.b32.xlu0 %v1153_v47, %s5311_s30  ;;  %1081 = vrot.lane.b32.xlu1 %v1078_v48, %s5313_s29  ;;  %v1306_v48 = vmul.f32 %v1305_v36, %v3495_v1  ;;  %v1293_v55 = vsel %vm607_vm8, %v1291_v49, %v1292_v42  ;;  %v1295_v34 = vsel %vm607_vm8, %v1292_v42, %v1294_v18  ;;  %v3904_v49 = vstv %s3845_s25  ;;  %s3919_s25 = sld [smem:[#allocation7 + $0x39]] }
 0x1e1   : > { %v1329_v36 = vmul.f32 %v1326_v50, %v3556_v44  ;;  %v1316_v50 = vsel %vm625_vm9, %v1313_v52, %v1315_v35  ;;  %v3978_v35 = vstv %s3891_s27  ;;  %s4224_s27 = sld [smem:[#allocation7 + $0x3a]] }
 0x1e2   : > { %v3740_v53 = vpop.permute.xlu0 %694  ;;  %v1312_v59 = vrot.slane %v1306_v48, 3  ;;  %v5321_v48 = vrot.slane %v3874_v30, 1 }
 0x1e4   : > { %1177 = vrot.lane.b32.xlu0 %v1174_v31, %s5311_s30  ;;  %1102 = vrot.lane.b32.xlu1 %v1099_v58, %s5313_s29  ;;  %v1238_v31 = vrot.slane %v1231_v46, 6  ;;  %v1266_v58 = vmul.f32 %v1263_v11, %v3556_v44  ;;  %v3834_v11 = vstv %s2848_s22  ;;  %s3860_s22 = sld [smem:[#allocation7 + $0xe]]  ;;  %s3906_s29 = sld [smem:[#allocation7 + $0x30]] }
 0x1e5   : > { %v1369_v25 = vmul.f32 %v3834_v11, %v3495_v1  ;;  %v1371_v19 = vmul.f32 %v3834_v11, %v3556_v44 }
 0x1e6   : > { %v3752_v63 = vpop.permute.xlu0 %834  ;;  %v1239_v4 = vsel %vm678_vm11, %v1236_v17, %v1238_v31  ;;  %v1273_v5 = vrot.slane %v1266_v58, 1  ;;  %v1355_v17 = vrot.slane %v3828_v6, 5  ;;  %v1350_v31 = vmul.f32 %v1347_v3, %v3556_v44 }
 0x1e7   : > { %v3937_v3 = vstv %s3867_s17  ;;  %v1467_v6 = vmul.f32 %v3978_v35, %v3495_v1  ;;  %s4194_s17 = sld [smem:[#allocation7 + $0x5c]] }
 0x1e8   : > { %1198 = vrot.lane.b32.xlu0 %v1195_v0, %s5311_s30  ;;  %1137 = vrot.lane.b32.xlu1 %v1134_v2, %s5311_s30  ;;  %v1314_v0 = vsel %vm625_vm9, %v1312_v59, %v1313_v52  ;;  %v1334_v2 = vrot.slane %v3808_v54, 4  ;;  %v1425_v52 = vmul.f32 %v3904_v49, %v3495_v1  ;;  %v1357_v18 = vrot.slane %v1350_v31, 5 }
 0x1ea   : > { %v3764_v12 = vpop.permute.xlu0 %974  ;;  %v1335_v14 = vsel %vm214_vm0, %v1333_v8, %v1334_v2  ;;  %v3925_v40 = vstv %s3860_s22  ;;  %s2878_s22 = sld [smem:[#allocation7 + $0x3b]] }
 0x1eb   : > { %v601_v32 = vmul.f32 %v3925_v40, %v3495_v1 }
 0x1ec   : > { %1219 = vrot.lane.b32.xlu0 %v1216_v15, %s5311_s30  ;;  %1158 = vrot.lane.b32.xlu1 %v1155_v16, %s5311_s30  ;;  %v3843_v15 = vmul.f32 %v3834_v11, %v3512_v9  ;;  %v1274_v16 = vsel %vm589_vm7, %v1271_v24, %v1273_v5  ;;  %v1354_v24 = vrot.slane %v1348_v10, 5 }
 0x1ee   : > { %v3776_v22 = vpop.permute.xlu0 %1114  ;;  %v3778_v23 = vpop.permute.xlu1 %696  ;;  %v1356_v33 = vsel %vm660_vm10, %v1354_v24, %v1355_v17  ;;  %v3965_v24 = vstv %s3876_s10  ;;  %s4165_s10 = sld [smem:[#allocation7 + $0x55]] }
 0x1f0   : > { %1240 = vrot.lane.b32.xlu0 %v1237_v28, %s5311_s30  ;;  %1179 = vrot.lane.b32.xlu1 %v1176_v29, %s5311_s30  ;;  %v1376_v29 = vrot.slane %v3843_v15, 6  ;;  %v1473_v15 = vrot.slane %v1467_v6, 4 }
 0x1f2   : > { %v3790_v37 = vpop.permute.xlu1 %836  ;;  %v3799_v47 = vpop.permute.xlu0 %1254 }
 0x1f4   : > { %1275 = vrot.lane.b32.xlu0 %v1272_v38, %s3167_s6  ;;  %1200 = vrot.lane.b32.xlu1 %v1197_v41, %s5311_s30  ;;  %v1375_v38 = vrot.slane %v1369_v25, 6  ;;  %v1404_v41 = vmul.f32 %v3863_v26, %v3495_v1  ;;  %v583_v25 = vmul.f32 %v3922_v60, %v3495_v1 }
 0x1f6   : > { %v3804_v51 = vpop.permute.xlu1 %976  ;;  %v3818_v61 = vpop.permute.xlu0 %1394  ;;  %v1377_v46 = vsel %vm678_vm11, %v1375_v38, %v1376_v29  ;;  %v1410_v59 = vrot.slane %v1404_v41, 1 }
 0x1f7   : > { %5347 = vst [vmem:[#allocation18_spill] sm:$0xff] %v3818_v61 }
 0x1f8   : > { %1296 = vrot.lane.b32.xlu0 %v1293_v55, %s3167_s6  ;;  %1221 = vrot.lane.b32.xlu1 %v1218_v56, %s5311_s30  ;;  %v1336_v55 = vrot.slane %v1329_v36, 4  ;;  %v3913_v56 = vmul.f32 %v3904_v49, %v3512_v9  ;;  %v1412_v8 = vsel %vm589_vm7, %v1410_v59, %v5321_v48  ;;  %v1358_v59 = vsel %vm660_vm10, %v1355_v17, %v1357_v18 }
 0x1f9   : > { %v4012_v17 = vmul.f32 %v3925_v40, %v3512_v9  ;;  %v4015_v18 = vstv %s3919_s25  ;;  %s2879_s25 = sld [smem:[#allocation7 + $0x42]] }
 0x1fa   : > { %v3820_v62 = vpop.permute.xlu1 %1116 }
 0x1fc   : > { %1317 = vrot.lane.b32.xlu0 %v1314_v0, %s3167_s6  ;;  %1242 = vrot.lane.b32.xlu1 %v1239_v4, %s5311_s30  ;;  %s3893_s30 = sld [smem:[#allocation7 + $0x29]]  ;;  %v3930_v0 = vstv %s3865_s18  ;;  %v3941_v4 = vmul.f32 %v3922_v60, %v3512_v9  ;;  %s3954_s18 = sld [smem:[#allocation7 + $0x4e]] }
 0x1fd   : > { %v3952_v10 = vmul.f32 %v3930_v0, %v3512_v9  ;;  %v1446_v54 = vmul.f32 %v3930_v0, %v3495_v1  ;;  %v585_v1 = vmul.f32 %v3922_v60, %v3556_v44  ;;  %v1448_v60 = vmul.f32 %v3930_v0, %v3556_v44  ;;  %v3009_v0 = vld [vmem:[#allocation2 + $0x8] sm:$0xff] }
 0x1fe   : > { %v3836_v13 = vpop.permute.xlu0 %1645  ;;  %v3854_v20 = vpop.permute.xlu1 %1256  ;;  %v5324_v36 = vrot.slane %v3941_v4, 1 }
 0x1ff   : > { %5348 = vst [vmem:[#allocation19_spill] sm:$0xff] %v3836_v13  ;;  %v1452_v48 = vrot.slane %v1446_v54, 3 }
 0x200   : > { %1338 = vrot.lane.b32.xlu0 %v1335_v14, %s3167_s6  ;;  %1277 = vrot.lane.b32.xlu1 %v1274_v16, %s3167_s6  ;;  %v1337_v14 = vsel %vm214_vm0, %v1334_v2, %v1336_v55  ;;  %v5322_v16 = vrot.slane %v3913_v56, 2  ;;  %v3975_v2 = vstv %s3885_s11  ;;  %v3994_v55 = vstv %s3906_s29  ;;  %s5367_s11 = smov 127   ;;  %s4324_s29 = sld [smem:[#allocation7 + $0x4f]] }
 0x202   : > { %v3869_v28 = vpop.permute.xlu0 %1785  ;;  %v3895_v42 = vpop.permute.xlu1 %1396  ;;  %v3981_v11 = vstv %s3893_s30  ;;  %s4349_s30 = sld [smem:[#allocation7 + $0x56]] }
 0x203   : > { %5349 = vst [vmem:[#allocation20_spill] sm:$0xff] %v3869_v28  ;;  %5350 = vst [vmem:[#allocation21_spill] sm:$0xff] %v3895_v42 }
 0x204   : > { %1359 = vrot.lane.b32.xlu0 %v1356_v33, %s3167_s6  ;;  %1298 = vrot.lane.b32.xlu1 %v1295_v34, %s3167_s6  ;;  %v3968_v33 = vstv %s3883_s20  ;;  %v1431_v34 = vrot.slane %v1425_v52, 2  ;;  %v1378_v52 = vrot.slane %v1371_v19, 6  ;;  %v4021_v19 = vstv %s3934_s7  ;;  %s4264_s7 = sld [smem:[#allocation7 + $0x41]]  ;;  %s4433_s20 = sld [smem:[#allocation7 + $0x34]] }
 0x206   : > { %v3897_v43 = vpop.permute.xlu0 %715  ;;  %v1433_v31 = vsel %vm607_vm8, %v1431_v34, %v5322_v16  ;;  %v4035_v16 = vstv %s3954_s18  ;;  %v1379_v58 = vsel %vm678_vm11, %v1376_v29, %v1378_v52  ;;  %v4072_v52 = vmul.f32 %v3994_v55, %v3512_v9  ;;  %s4473_s18 = sld [smem:[#allocation7 + $0x49]] }
 0x208   : > { %1380 = vrot.lane.b32.xlu0 %v1377_v46, %s3167_s6  ;;  %1319 = vrot.lane.b32.xlu1 %v1316_v50, %s3167_s6  ;;  %v5329_v46 = vrot.slane %v3952_v10, 3  ;;  %v3991_v50 = vmul.f32 %v3978_v35, %v3512_v9 }
 0x20a   : > { %v3943_v5 = vpop.permute.xlu0 %736  ;;  %v3945_v7 = vpop.permute.xlu1 %1647 }
 0x20b   : > { %5351 = vst [vmem:[#allocation22_spill] sm:$0xff] %v3945_v7 }
 0x20c   : > { %1415 = vrot.lane.b32.xlu0 %v1412_v8, %s3168_s28  ;;  %1340 = vrot.lane.b32.xlu1 %v1337_v14, %s3167_s6  ;;  %v1406_v8 = vmul.f32 %v3863_v26, %v3556_v44  ;;  %v590_v14 = vrot.slane %v583_v25, 1  ;;  %v4018_v26 = vstv %s3932_s24  ;;  %s4295_s24 = sld [smem:[#allocation7 + $0x48]] }
 0x20e   : > { %v3984_v38 = vpop.permute.xlu0 %757  ;;  %v3986_v41 = vpop.permute.xlu1 %1787  ;;  %v592_v25 = vsel %vm589_vm7, %v590_v14, %v5324_v36  ;;  %v1413_v39 = vrot.slane %v1406_v8, 1  ;;  %v4042_v14 = vmul.f32 %v3981_v11, %v3512_v9  ;;  %v1427_v36 = vmul.f32 %v3904_v49, %v3556_v44 }
 0x20f   : > { %5352 = vst [vmem:[#allocation23_spill] sm:$0xff] %v3986_v41  ;;  %v4058_v49 = vmul.f32 %v3937_v3, %v3512_v9  ;;  %v5355_v41 = vrot.slane %v3874_v30, 1 }
 0x210   : > { %1436 = vrot.lane.b32.xlu0 %v1433_v31, %s3168_s28  ;;  %1361 = vrot.lane.b32.xlu1 %v1358_v59, %s3167_s6  ;;  %v1454_v31 = vsel %vm625_vm9, %v1452_v48, %v5329_v46  ;;  %v608_v48 = vrot.slane %v601_v32, 2  ;;  %v3008_v46 = vld [vmem:[#allocation2] sm:$0xff]  ;;  %v597_v32 = vadd.f32 %v592_v25, %v577_v45  ;;  %v1434_v25 = vrot.slane %v1427_v36, 2 }
 0x211   : > { %v619_v59 = vmul.f32 %v3008_v46, %v3937_v3  ;;  %v4053_v29 = vmul.f32 %v3008_v46, %v3965_v24  ;;  %v1488_v57 = vmul.f32 %v3008_v46, %v3981_v11  ;;  %v1414_v28 = vsel %vm589_vm7, %v5355_v41, %v1413_v39 }
 0x212   : > { %v4026_v34 = vpop.permute.xlu0 %778  ;;  %v4028_v54 = vpop.permute.xlu1 %717  ;;  %v4081_v13 = vmul.f32 %v3008_v46, %v3968_v33  ;;  %v1509_v9 = vmul.f32 %v3008_v46, %v3994_v55  ;;  %v5356_v39 = vrot.slane %v4012_v17, 2  ;;  %v4094_v41 = vmul.f32 %v3009_v0, %v3965_v24 }
 0x213   : > { %v626_v7 = vrot.slane %v619_v59, 3  ;;  %v1494_v59 = vrot.slane %v1488_v57, 5  ;;  %v593_v45 = vrot.slane %v585_v1, 1  ;;  %v5358_v36 = vrot.slane %v3913_v56, 2 }
 0x214   : > { %1457 = vrot.lane.b32.xlu0 %v1454_v31, %s3168_s28  ;;  %1382 = vrot.lane.b32.xlu1 %v1379_v58, %s3167_s6  ;;  %v5354_v58 = vrot.slane %v3991_v50, 4  ;;  %v610_v30 = vsel %vm607_vm8, %v608_v48, %v5356_v39  ;;  %v5357_v48 = vrot.slane %v4042_v14, 5  ;;  %v1469_v1 = vmul.f32 %v3978_v35, %v3556_v44 }
 0x215   : > { %v1435_v57 = vsel %vm607_vm8, %v5358_v36, %v1434_v25  ;;  %v1515_v61 = vrot.slane %v1509_v9, 6  ;;  %v661_v56 = vrot.slane %v4081_v13, 5  ;;  %v5359_v25 = vrot.slane %v4058_v49, 3 }
 0x216   : > { %v4063_v8 = vpop.permute.xlu0 %799  ;;  %v4065_v31 = vpop.permute.xlu1 %738  ;;  %v1475_v6 = vsel %vm214_vm0, %v1473_v15, %v5354_v58  ;;  %v4084_v15 = vmul.f32 %v3008_v46, %v3975_v2  ;;  %v615_v58 = vadd.f32 %v610_v30, %v597_v32  ;;  %v4103_v46 = vmul.f32 %v4015_v18, %v3559_v27 }
 0x217   : > { %v1496_v39 = vsel %vm660_vm10, %v1494_v59, %v5357_v48  ;;  %v1455_v32 = vrot.slane %v1448_v60, 3  ;;  %v643_v30 = vrot.slane %v4053_v29, 4  ;;  %v1655_v59 = vmul.f32 %v4015_v18, %v3536_v21 }
 0x218   : > { %1478 = vrot.lane.b32.xlu0 %v1475_v6, %s3168_s28  ;;  %1417 = vrot.lane.b32.xlu1 %v1414_v28, %s3168_s28  ;;  %v4115_v28 = vmul.f32 %v3009_v0, %v3968_v33  ;;  %v628_v35 = vsel %vm625_vm9, %v626_v7, %v5359_v25  ;;  %v603_v60 = vmul.f32 %v3925_v40, %v3556_v44  ;;  %v5360_v48 = vrot.slane %v3941_v4, 1 }
 0x219   : > { %v633_v36 = vadd.f32 %v628_v35, %v615_v58  ;;  %v5361_v13 = vrot.slane %v4072_v52, 6  ;;  %v5330_v7 = vrot.slane %v4103_v46, 1  ;;  %v5362_v25 = vrot.slane %v3952_v10, 3 }
 0x21a   : > { %v4096_v42 = vpop.permute.xlu0 %820  ;;  %v4098_v6 = vpop.permute.xlu1 %759  ;;  %v594_v9 = vsel %vm589_vm7, %v5360_v48, %v593_v45  ;;  %v1476_v40 = vrot.slane %v1469_v1, 4  ;;  %v4144_v4 = vmul.f32 %v4018_v26, %v3559_v27  ;;  %v1490_v45 = vmul.f32 %v3981_v11, %v3556_v44 }
 0x21b   : > { %v1456_v29 = vsel %vm625_vm9, %v5362_v25, %v1455_v32  ;;  %v4150_v35 = vmul.f32 %v3009_v0, %v3975_v2  ;;  %v1661_v10 = vrot.slane %v1655_v59, 1  ;;  %v5364_v32 = vrot.slane %v4094_v41, 4  ;;  %v4161_v25 = vld [vmem:[#allocation2 + $0x18] sm:$0xff] }
 0x21c   : > { %1499 = vrot.lane.b32.xlu0 %v1496_v39, %s3168_s28  ;;  %1438 = vrot.lane.b32.xlu1 %v1435_v57, %s3168_s28  ;;  %v1517_v57 = vsel %vm678_vm11, %v1515_v61, %v5361_v13  ;;  %v5363_v61 = vstv %s3850_s8  ;;  %v611_v13 = vrot.slane %v603_v60, 2  ;;  %v621_v11 = vmul.f32 %v3937_v3, %v3556_v44  ;;  %v4205_v60 = vld [vmem:[#allocation2 + $0x20] sm:$0xff]  ;;  %s5379_s8 = smov 126  }
 0x21d   : > { %v578_v48 = vmul.f32 %v3009_v0, %v5363_v61  ;;  %v645_v1 = vsel %vm214_vm0, %v643_v30, %v5364_v32  ;;  %v1676_v58 = vmul.f32 %v4161_v25, %v4018_v26  ;;  %v1663_v30 = vsel %vm589_vm7, %v1661_v10, %v5330_v7  ;;  %v4183_v32 = vld [vmem:[#allocation2 + $0x28] sm:$0x3f] }
 0x21e   : > { %v4131_v39 = vpop.permute.xlu0 %855  ;;  %v4133_v21 = vpop.permute.xlu1 %780  ;;  %v650_v0 = vadd.f32 %v645_v1, %v633_v36  ;;  %v4176_v44 = vmul.f32 %v4021_v19, %v3559_v27  ;;  %v5365_v3 = vrot.slane %v3991_v50, 4  ;;  %v1497_v36 = vrot.slane %v1490_v45, 5 }
 0x21f   : > { %v679_v1 = vrot.slane %v4084_v15, 6  ;;  %v5366_v10 = vrot.slane %v4115_v28, 5  ;;  %v1697_v50 = vmul.f32 %v4161_v25, %v4021_v19  ;;  %v629_v15 = vrot.slane %v621_v11, 3 }
 0x220   : > { %1520 = vrot.lane.b32.xlu0 %v1517_v57, %s3168_s28  ;;  %1459 = vrot.lane.b32.xlu1 %v1456_v29, %s3168_s28  ;;  %v598_v57 = vadd.f32 %v594_v9, %v578_v48  ;;  %v1477_v29 = vsel %vm214_vm0, %v5365_v3, %v1476_v40  ;;  %v3011_v9 = vld [vmem:[#allocation2 + $0x10] sm:$0x3f]  ;;  %v1682_v3 = vrot.slane %v1676_v58, 2 }
 0x221   : > { %v1511_v48 = vmul.f32 %v3011_v9, %v3994_v55  ;;  %v663_v7 = vsel %vm660_vm10, %v661_v56, %v5366_v10  ;;  %v5368_v55 = vrot.slane %v4012_v17, 2  ;;  %v639_v45 = vmul.f32 %v3011_v9, %v3965_v24 }
 0x222   : > { %v4167_v61 = vpop.permute.xlu0 %876  ;;  %v4169_v59 = vpop.permute.xlu1 %801  ;;  %v668_v56 = vadd.f32 %v663_v7, %v650_v0  ;;  %v4209_v17 = vmul.f32 %v4205_v60, %v4035_v16  ;;  %v5370_v7 = vrot.slane %v4042_v14, 5  ;;  %v1657_v0 = vmul.f32 %v4015_v18, %v4183_v32 }
 0x223   : > { %v612_v40 = vsel %vm607_vm8, %v5368_v55, %v611_v13  ;;  %v5369_v13 = vrot.slane %v4144_v4, 2  ;;  %v1518_v11 = vrot.slane %v1511_v48, 6  ;;  %v1703_v55 = vrot.slane %v1697_v50, 3 }
 0x224   : > { %1666 = vrot.lane.b32.xlu0 %v1663_v30, %s5367_s11  ;;  %1480 = vrot.lane.b32.xlu1 %v1477_v29, %s3168_s28  ;;  %v616_v10 = vadd.f32 %v612_v40, %v598_v57  ;;  %v1704_v29 = vrot.slane %v4176_v44, 3  ;;  %v1498_v58 = vsel %vm660_vm10, %v5370_v7, %v1497_v36  ;;  %v656_v57 = vmul.f32 %v3011_v9, %v3968_v33 }
 0x225   : > { %v1684_v24 = vsel %vm607_vm8, %v1682_v3, %v5369_v13  ;;  %v1718_v40 = vmul.f32 %v4161_v25, %v4035_v16  ;;  %v5371_v14 = vrot.slane %v4150_v35, 6  ;;  %v5372_v48 = vrot.slane %v4058_v49, 3 }
 0x226   : > { %v4200_v27 = vpop.permute.xlu0 %897  ;;  %v4202_v30 = vpop.permute.xlu1 %822  ;;  %v646_v3 = vrot.slane %v639_v45, 4  ;;  %v4233_v33 = vstv %s4165_s10  ;;  %v5373_v49 = vrot.slane %v4072_v52, 6  ;;  %v1664_v45 = vrot.slane %v1657_v0, 1  ;;  %s4484_s10 = sld [smem:[#allocation7 + $0x50]] }
 0x227   : > { %v681_v36 = vsel %vm678_vm11, %v679_v1, %v5371_v14  ;;  %v630_v18 = vsel %vm625_vm9, %v5372_v48, %v629_v15  ;;  %v1725_v1 = vrot.slane %v4209_v17, 4  ;;  %v4248_v14 = vmul.f32 %v4205_v60, %v4233_v33 }
 0x228   : > { %1687 = vrot.lane.b32.xlu0 %v1684_v24, %s5367_s11  ;;  %1501 = vrot.lane.b32.xlu1 %v1498_v58, %s3168_s28  ;;  %v686_v13 = vadd.f32 %v681_v36, %v668_v56  ;;  %v634_v24 = vadd.f32 %v630_v18, %v616_v10  ;;  %v1705_v58 = vsel %vm625_vm9, %v1703_v55, %v1704_v29  ;;  %v664_v10 = vrot.slane %v656_v57, 5 }
 0x229   : > { %v1519_v15 = vsel %vm678_vm11, %v5373_v49, %v1518_v11  ;;  %v1678_v56 = vmul.f32 %v4018_v26, %v4183_v32  ;;  %v1724_v55 = vrot.slane %v1718_v40, 4  ;;  %v4255_v36 = vstv %s4194_s17  ;;  %s4508_s17 = sld [smem:[#allocation7 + $0x57]] }
 0x22a   : > { %v4235_v50 = vpop.permute.xlu0 %918  ;;  %v4237_v7 = vpop.permute.xlu1 %857  ;;  %v700_v52 = vadd.f32 %v3740_v53, %v686_v13  ;;  %v5374_v11 = vrot.slane %v4094_v41, 4  ;;  %v674_v48 = vmul.f32 %v3011_v9, %v3975_v2  ;;  %v1739_v26 = vmul.f32 %v4161_v25, %v4233_v33 }
 0x22b   : > { %v1726_v53 = vsel %vm214_vm0, %v1724_v55, %v1725_v1  ;;  %v4275_v41 = vmul.f32 %v4205_v60, %v4255_v36  ;;  %v1699_v2 = vmul.f32 %v4021_v19, %v4183_v32  ;;  %v1760_v49 = vmul.f32 %v4161_v25, %v4255_v36 }
 0x22c   : > { %1708 = vrot.lane.b32.xlu0 %v1705_v58, %s5367_s11  ;;  %1522 = vrot.lane.b32.xlu1 %v1519_v15, %s3168_s28  ;;  %v647_v0 = vsel %vm214_vm0, %v5374_v11, %v646_v3  ;;  %v721_v9 = vadd.f32 %v3897_v43, %v700_v52  ;;  %v5375_v3 = vrot.slane %v4103_v46, 1  ;;  %v1685_v58 = vrot.slane %v1678_v56, 2 }
 0x22d   : > { %v651_v57 = vadd.f32 %v647_v0, %v634_v24  ;;  %v1746_v24 = vrot.slane %v4248_v14, 5  ;;  %v4289_v15 = vstv %s4224_s27  ;;  %v5376_v19 = vrot.slane %v4115_v28, 5  ;;  %s4532_s27 = sld [smem:[#allocation7 + $0x5e]] }
 0x22e   : > { %v4266_v18 = vpop.permute.xlu0 %939  ;;  %v4268_v40 = vpop.permute.xlu1 %878  ;;  %v1665_v13 = vsel %vm589_vm7, %v5375_v3, %v1664_v45  ;;  %v682_v55 = vrot.slane %v674_v48, 6  ;;  %v742_v46 = vadd.f32 %v3943_v5, %v721_v9  ;;  %v1745_v45 = vrot.slane %v1739_v26, 5 }
 0x22f   : > { %v665_v43 = vsel %vm660_vm10, %v5376_v19, %v664_v10  ;;  %v1767_v0 = vrot.slane %v4275_v41, 6  ;;  %v4304_v28 = vmul.f32 %v4205_v60, %v4289_v15  ;;  %v5377_v48 = vrot.slane %v4144_v4, 2 }
 0x230   : > { %1729 = vrot.lane.b32.xlu0 %v1726_v53, %s5367_s11  ;;  %1668 = vrot.lane.b32.xlu1 %v1665_v13, %s5367_s11  ;;  %v669_v56 = vadd.f32 %v665_v43, %v651_v57  ;;  %v1706_v53 = vrot.slane %v1699_v2, 3  ;;  %v763_v10 = vadd.f32 %v3984_v38, %v742_v46  ;;  %v1747_v5 = vsel %vm660_vm10, %v1745_v45, %v1746_v24 }
 0x231   : > { %v1686_v26 = vsel %vm607_vm8, %v5377_v48, %v1685_v58  ;;  %v1720_v57 = vmul.f32 %v4035_v16, %v4183_v32  ;;  %v1766_v2 = vrot.slane %v1760_v49, 6  ;;  %v1795_v9 = vmul.f32 %v4161_v25, %v4289_v15 }
 0x232   : > { %v4297_v52 = vpop.permute.xlu0 %960  ;;  %v4299_v11 = vpop.permute.xlu1 %899  ;;  %v5378_v38 = vrot.slane %v4150_v35, 6  ;;  %v784_v13 = vadd.f32 %v4026_v34, %v763_v10  ;;  %v1815_v4 = vstv %s4264_s7  ;;  %v1707_v35 = vsel %vm625_vm9, %v1704_v29, %v1706_v53  ;;  %s4578_s7 = sld [smem:[#allocation7 + $0x3c]] }
 0x233   : > { %v1768_v49 = vsel %vm678_vm11, %v1766_v2, %v1767_v0  ;;  %v1802_v43 = vrot.slane %v4304_v28, 1  ;;  %v4339_v46 = vmul.f32 %v4205_v60, %v1815_v4  ;;  %v1741_v45 = vmul.f32 %v4233_v33, %v4183_v32 }
 0x234   : > { %1750 = vrot.lane.b32.xlu0 %v1747_v5, %s5367_s11  ;;  %1689 = vrot.lane.b32.xlu1 %v1686_v26, %s5367_s11  ;;  %v683_v3 = vsel %vm678_vm11, %v5378_v38, %v682_v55  ;;  %v805_v34 = vadd.f32 %v4063_v8, %v784_v13  ;;  %v1727_v55 = vrot.slane %v1720_v57, 4  ;;  %v1816_v53 = vmul.f32 %v4161_v25, %v1815_v4 }
 0x235   : > { %v687_v58 = vadd.f32 %v683_v3, %v669_v56  ;;  %v1801_v56 = vrot.slane %v1795_v9, 1  ;;  %v1836_v10 = vstv %s4295_s24  ;;  %v1823_v57 = vrot.slane %v4339_v46, 2  ;;  %s4586_s24 = sld [smem:[#allocation7 + $0x35]] }
 0x236   : > { %v4326_v16 = vpop.permute.xlu0 %995  ;;  %v4328_v19 = vpop.permute.xlu1 %920  ;;  %v826_v29 = vadd.f32 %v4096_v42, %v805_v34  ;;  %v4359_v48 = vmul.f32 %v4205_v60, %v1836_v10  ;;  %v1728_v26 = vsel %vm214_vm0, %v1725_v1, %v1727_v55  ;;  %v1748_v2 = vrot.slane %v1741_v45, 5 }
 0x237   : > { %v701_v44 = vadd.f32 %v3778_v23, %v687_v58  ;;  %v1803_v33 = vsel %vm589_vm7, %v1801_v56, %v1802_v43  ;;  %v1762_v23 = vmul.f32 %v4255_v36, %v4183_v32  ;;  %v1837_v9 = vmul.f32 %v4161_v25, %v1836_v10 }
 0x238   : > { %1771 = vrot.lane.b32.xlu0 %v1768_v49, %s5367_s11  ;;  %1710 = vrot.lane.b32.xlu1 %v1707_v35, %s5367_s11  ;;  %v840_v3 = vadd.f32 %v3752_v63, %v826_v29  ;;  %v1822_v36 = vrot.slane %v1816_v53, 2  ;;  %v1857_v13 = vstv %s4324_s29  ;;  %v1844_v1 = vrot.slane %v4359_v48, 3  ;;  %s4601_s29 = sld [smem:[#allocation7 + $0x43]] }
 0x239   : > { %v722_v42 = vadd.f32 %v4028_v54, %v701_v44  ;;  %v1769_v58 = vrot.slane %v1762_v23, 6  ;;  %v4382_v49 = vmul.f32 %v4205_v60, %v1857_v13  ;;  %v1797_v34 = vmul.f32 %v4289_v15, %v4183_v32 }
 0x23a   : > { %v4351_v8 = vpop.permute.xlu0 %1016  ;;  %v4353_v5 = vpop.permute.xlu1 %941  ;;  %v1824_v63 = vsel %vm607_vm8, %v1822_v36, %v1823_v57  ;;  %v1843_v55 = vrot.slane %v1837_v9, 3  ;;  %v1858_v45 = vmul.f32 %v4161_v25, %v1857_v13  ;;  %v1878_v44 = vstv %s4349_s30  ;;  %s4622_s30 = sld [smem:[#allocation7 + $0x4a]] }
 0x23b   : > { %v743_v38 = vadd.f32 %v4065_v31, %v722_v42  ;;  %v1749_v31 = vsel %vm660_vm10, %v1746_v24, %v1748_v2  ;;  %v1770_v15 = vsel %vm678_vm11, %v1767_v0, %v1769_v58  ;;  %v1865_v53 = vrot.slane %v4382_v49, 4 }
 0x23c   : > { %1806 = vrot.lane.b32.xlu0 %v1803_v33, %s5379_s8  ;;  %1731 = vrot.lane.b32.xlu1 %v1728_v26, %s5367_s11  ;;  %v1845_v24 = vsel %vm625_vm9, %v1843_v55, %v1844_v1  ;;  %v1804_v23 = vrot.slane %v1797_v34, 1  ;;  %v1818_v42 = vmul.f32 %v1815_v4, %v4183_v32  ;;  %v1864_v26 = vrot.slane %v1858_v45, 4 }
 0x23d   : > { %v764_v35 = vadd.f32 %v4098_v6, %v743_v38  ;;  %v861_v6 = vadd.f32 %v4131_v39, %v840_v3  ;;  %v4411_v39 = vmul.f32 %v4205_v60, %v1878_v44  ;;  %v1879_v41 = vmul.f32 %v4161_v25, %v1878_v44 }
 0x23e   : > { %v4376_v54 = vpop.permute.xlu0 %1037  ;;  %v4378_v17 = vpop.permute.xlu1 %962  ;;  %v1899_v9 = vstv %s4374_s5  ;;  %v1825_v36 = vrot.slane %v1818_v42, 2  ;;  %v1839_v58 = vmul.f32 %v1836_v10, %v4183_v32  ;;  %v1920_v46 = vstv %s4433_s20  ;;  %s4651_s5 = sld [smem:[#allocation7 + $0x58]]  ;;  %s4675_s20 = sld [smem:[#allocation7 + $0x5f]] }
 0x23f   : > { %v785_v56 = vadd.f32 %v4133_v21, %v764_v35  ;;  %v882_v21 = vadd.f32 %v4167_v61, %v861_v6  ;;  %v1886_v4 = vrot.slane %v4411_v39, 5  ;;  %v4431_v3 = vmul.f32 %v4205_v60, %v1899_v9 }
 0x240   : > { %1827 = vrot.lane.b32.xlu0 %v1824_v63, %s5379_s8  ;;  %1752 = vrot.lane.b32.xlu1 %v1749_v31, %s5367_s11  ;;  %v1885_v35 = vrot.slane %v1879_v41, 5  ;;  %v1900_v63 = vmul.f32 %v4161_v25, %v1899_v9  ;;  %v1846_v45 = vrot.slane %v1839_v58, 3 }
 0x241   : > { %v806_v33 = vadd.f32 %v4169_v59, %v785_v56  ;;  %v903_v0 = vadd.f32 %v4200_v27, %v882_v21  ;;  %v1866_v59 = vsel %vm214_vm0, %v1864_v26, %v1865_v53  ;;  %v1907_v10 = vrot.slane %v4431_v3, 6 }
 0x242   : > { %v4399_v29 = vpop.permute.xlu0 %1058  ;;  %v4401_v14 = vpop.permute.xlu1 %997  ;;  %v1906_v6 = vrot.slane %v1900_v63, 6  ;;  %v1922_v3 = vmul.f32 %v4205_v60, %v1920_v46 }
 0x243   : > { %v827_v2 = vadd.f32 %v4202_v30, %v806_v33  ;;  %v924_v27 = vadd.f32 %v4235_v50, %v903_v0  ;;  %v1805_v30 = vsel %vm589_vm7, %v1802_v43, %v1804_v23  ;;  %v1887_v43 = vsel %vm660_vm10, %v1885_v35, %v1886_v4 }
 0x244   : > { %1848 = vrot.lane.b32.xlu0 %v1845_v24, %s5379_s8  ;;  %1773 = vrot.lane.b32.xlu1 %v1770_v15, %s5367_s11  ;;  %v1934_v24 = vstv %s2878_s22  ;;  %v1847_v23 = vsel %vm625_vm9, %v1844_v1, %v1846_v45  ;;  %s5380_s11 = smov 125   ;;  %s5381_s22 = smov 124  }
 0x245   : > { %v841_v31 = vadd.f32 %v3790_v37, %v827_v2  ;;  %v945_v34 = vadd.f32 %v4266_v18, %v924_v27  ;;  %v1826_v37 = vsel %vm607_vm8, %v1823_v57, %v1825_v36  ;;  %v1860_v18 = vmul.f32 %v1857_v13, %v4183_v32 }
 0x246   : > { %v4422_v38 = vpop.permute.xlu0 %1079  ;;  %v4424_v61 = vpop.permute.xlu1 %1018  ;;  %v4470_v57 = vmul.f32 %v4205_v60, %v1934_v24  ;;  %v1881_v13 = vmul.f32 %v1878_v44, %v4183_v32  ;;  %v1935_v26 = vmul.f32 %v4161_v25, %v1934_v24  ;;  %v1955_v44 = vstv %s2879_s25  ;;  %s4705_s25 = sld [smem:[#allocation7 + $0x3d]] }
 0x247   : > { %v966_v55 = vadd.f32 %v4297_v52, %v945_v34  ;;  %v862_v56 = vadd.f32 %v4237_v7, %v841_v31  ;;  %v1908_v52 = vsel %vm678_vm11, %v1906_v6, %v1907_v10  ;;  %v1867_v42 = vrot.slane %v1860_v18, 4 }
 0x248   : > { %1869 = vrot.lane.b32.xlu0 %v1866_v59, %s5379_s8  ;;  %1808 = vrot.lane.b32.xlu1 %v1805_v30, %s5379_s8  ;;  %v1942_v48 = vrot.slane %v4470_v57, 1  ;;  %v1888_v1 = vrot.slane %v1881_v13, 5  ;;  %v4495_v2 = vmul.f32 %v4205_v60, %v1955_v44  ;;  %v1902_v30 = vmul.f32 %v1899_v9, %v4183_v32 }
 0x249   : > { %v883_v7 = vadd.f32 %v4268_v40, %v862_v56  ;;  %v980_v33 = vadd.f32 %v3764_v12, %v966_v55  ;;  %v1921_v12 = vmul.f32 %v4161_v25, %v1920_v46  ;;  %v1868_v27 = vsel %vm214_vm0, %v1865_v53, %v1867_v42 }
 0x24a   : > { %v4445_v50 = vpop.permute.xlu0 %1100  ;;  %v4447_v28 = vpop.permute.xlu1 %1039  ;;  %v1941_v36 = vrot.slane %v1935_v26, 1  ;;  %v1956_v58 = vmul.f32 %v4161_v25, %v1955_v44  ;;  %v1889_v9 = vsel %vm660_vm10, %v1886_v4, %v1888_v1  ;;  %v1963_v63 = vrot.slane %v4495_v2, 2 }
 0x24b   : > { %v904_v41 = vadd.f32 %v4299_v11, %v883_v7  ;;  %v1001_v59 = vadd.f32 %v4326_v16, %v980_v33  ;;  %v1909_v34 = vrot.slane %v1902_v30, 6  ;;  %v1958_v42 = vmul.f32 %v1955_v44, %v4183_v32 }
 0x24c   : > { %1890 = vrot.lane.b32.xlu0 %v1887_v43, %s5379_s8  ;;  %1829 = vrot.lane.b32.xlu1 %v1826_v37, %s5379_s8  ;;  %v1943_v53 = vsel %vm589_vm7, %v1941_v36, %v1942_v48  ;;  %v1962_v55 = vrot.slane %v1956_v58, 2  ;;  %v1997_v37 = vstv %s4484_s10  ;;  %s4723_s10 = sld [smem:[#allocation7 + $0x38]] }
 0x24d   : > { %v925_v11 = vadd.f32 %v4328_v19, %v904_v41  ;;  %v1022_v35 = vadd.f32 %v4351_v8, %v1001_v59  ;;  %v1976_v8 = vstv %s4473_s18  ;;  %v4542_v18 = vmul.f32 %v4205_v60, %v1997_v37  ;;  %s4714_s18 = sld [smem:[#allocation7 + $0x36]] }
 0x24e   : > { %v4461_v15 = vpop.permute.xlu0 %1135  ;;  %v4463_v21 = vpop.permute.xlu1 %1060  ;;  %v4525_v43 = vmul.f32 %v4205_v60, %v1976_v8  ;;  %v1977_v4 = vmul.f32 %v4161_v25, %v1976_v8  ;;  %v1964_v45 = vsel %vm607_vm8, %v1962_v55, %v1963_v63  ;;  %v1965_v36 = vrot.slane %v1958_v42, 2 }
 0x24f   : > { %v946_v16 = vadd.f32 %v4353_v5, %v925_v11  ;;  %v1043_v5 = vadd.f32 %v4376_v54, %v1022_v35  ;;  %v2005_v41 = vrot.slane %v4542_v18, 4  ;;  %v2039_v11 = vstv %s4532_s27  ;;  %s4735_s27 = sld [smem:[#allocation7 + $0x46]] }
 0x250   : > { %1911 = vrot.lane.b32.xlu0 %v1908_v52, %s5379_s8  ;;  %1850 = vrot.lane.b32.xlu1 %v1847_v23, %s5379_s8  ;;  %v1910_v52 = vsel %vm678_vm11, %v1907_v10, %v1909_v34  ;;  %v1984_v13 = vrot.slane %v4525_v43, 3  ;;  %v1983_v33 = vrot.slane %v1977_v4, 3  ;;  %v1998_v23 = vmul.f32 %v4161_v25, %v1997_v37 }
 0x251   : > { %v967_v31 = vadd.f32 %v4378_v17, %v946_v16  ;;  %v1064_v39 = vadd.f32 %v4399_v29, %v1043_v5  ;;  %v1937_v29 = vmul.f32 %v1934_v24, %v4183_v32  ;;  %v2018_v24 = vstv %s4508_s17  ;;  %s4733_s17 = sld [smem:[#allocation7 + $0x3f]] }
 0x252   : > { %v4486_v0 = vpop.permute.xlu0 %1156  ;;  %v4488_v40 = vpop.permute.xlu1 %1081  ;;  %v4564_v10 = vmul.f32 %v4205_v60, %v2018_v24  ;;  %v2019_v46 = vmul.f32 %v4161_v25, %v2018_v24  ;;  %v2004_v44 = vrot.slane %v1998_v23, 4  ;;  %v4584_v58 = vmul.f32 %v4205_v60, %v2039_v11 }
 0x253   : > { %v981_v6 = vadd.f32 %v3804_v51, %v967_v31  ;;  %v1085_v56 = vadd.f32 %v4422_v38, %v1064_v39  ;;  %v1979_v16 = vmul.f32 %v1976_v8, %v4183_v32  ;;  %v1966_v8 = vsel %vm607_vm8, %v1963_v63, %v1965_v36 }
 0x254   : > { %1925 = vrot.lane.b32.xlu0 %v1921_v12, %s5380_s11  ;;  %1871 = vrot.lane.b32.xlu1 %v1868_v27, %s5379_s8  ;;  %v1944_v12 = vrot.slane %v1937_v29, 1  ;;  %v2026_v30 = vrot.slane %v4564_v10, 5  ;;  %v2000_v39 = vmul.f32 %v1997_v37, %v4183_v32  ;;  %v2074_v63 = vstv %s4578_s7  ;;  %s4767_s7 = sld [smem:[#allocation7 + $0x4d]] }
 0x255   : > { %v1106_v7 = vadd.f32 %v4445_v50, %v1085_v56  ;;  %v1002_v26 = vadd.f32 %v4401_v14, %v981_v6  ;;  %v1985_v50 = vsel %vm625_vm9, %v1983_v33, %v1984_v13  ;;  %v1986_v55 = vrot.slane %v1979_v16, 3 }
 0x256   : > { %v4510_v19 = vpop.permute.xlu0 %1177  ;;  %v4512_v49 = vpop.permute.xlu1 %1102  ;;  %v2060_v37 = vstv %s4586_s24  ;;  %v4632_v29 = vmul.f32 %v4205_v60, %v2074_v63  ;;  %s4769_s24 = sld [smem:[#allocation7 + $0x54]] }
 0x257   : > { %v1023_v1 = vadd.f32 %v4424_v61, %v1002_v26  ;;  %v1120_v59 = vadd.f32 %v3776_v22, %v1106_v7  ;;  %v2006_v22 = vsel %vm214_vm0, %v2004_v44, %v2005_v41  ;;  %v1945_v61 = vsel %vm589_vm7, %v1942_v48, %v1944_v12 }
 0x258   : > { %1946 = vrot.lane.b32.xlu0 %v1943_v53, %s5380_s11  ;;  %1892 = vrot.lane.b32.xlu1 %v1889_v9, %s5379_s8  ;;  %v2025_v53 = vrot.slane %v2019_v46, 5  ;;  %v1987_v56 = vsel %vm625_vm9, %v1984_v13, %v1986_v55  ;;  %v2075_v7 = vmul.f32 %v4161_v25, %v2074_v63 }
 0x259   : > { %v1044_v35 = vadd.f32 %v4447_v28, %v1023_v1  ;;  %v1141_v9 = vadd.f32 %v4461_v15, %v1120_v59  ;;  %v2040_v28 = vmul.f32 %v4161_v25, %v2039_v11  ;;  %v2047_v15 = vrot.slane %v4584_v58, 6 }
 0x25a   : > { %v4534_v54 = vpop.permute.xlu0 %1198  ;;  %v4536_v17 = vpop.permute.xlu1 %1137  ;;  %v2027_v48 = vsel %vm660_vm10, %v2025_v53, %v2026_v30  ;;  %v2081_v12 = vrot.slane %v2075_v7, 1  ;;  %v4670_v59 = vstv %s4622_s30  ;;  %s4800_s30 = sld [smem:[#allocation7 + $0x44]] }
 0x25b   : > { %v1065_v5 = vadd.f32 %v4463_v21, %v1044_v35  ;;  %v1162_v21 = vadd.f32 %v4486_v0, %v1141_v9  ;;  %v2158_v9 = vstv %s4651_s5  ;;  %s4870_s5 = sld [smem:[#allocation7 + $0x52]] }
 0x25c   : > { %1967 = vrot.lane.b32.xlu0 %v1964_v45, %s5380_s11  ;;  %1913 = vrot.lane.b32.xlu1 %v1910_v52, %s5379_s8  ;;  %v2046_v45 = vrot.slane %v2040_v28, 6  ;;  %s4624_s8 = sld [smem:[#allocation7 + $0x51]]  ;;  %v2007_v52 = vrot.slane %v2000_v39, 4 }
 0x25d   : > { %v1086_v34 = vadd.f32 %v4488_v40, %v1065_v5  ;;  %v1183_v4 = vadd.f32 %v4510_v19, %v1162_v21  ;;  %v2021_v19 = vmul.f32 %v2018_v24, %v4183_v32  ;;  %v2095_v24 = vstv %s4601_s29  ;;  %s4777_s29 = sld [smem:[#allocation7 + $0x5b]] }
 0x25e   : > { %v4556_v51 = vpop.permute.xlu0 %1219  ;;  %v4558_v38 = vpop.permute.xlu1 %1158  ;;  %v2048_v6 = vsel %vm678_vm11, %v2046_v45, %v2047_v15  ;;  %v4659_v26 = vmul.f32 %v4205_v60, %v2095_v24  ;;  %v2096_v46 = vmul.f32 %v4161_v25, %v2095_v24  ;;  %v2098_v21 = vmul.f32 %v2095_v24, %v4183_v32 }
 0x25f   : > { %v1107_v2 = vadd.f32 %v4512_v49, %v1086_v34  ;;  %v1204_v49 = vadd.f32 %v4534_v54, %v1183_v4  ;;  %v2061_v54 = vmul.f32 %v4161_v25, %v2060_v37  ;;  %v2028_v42 = vrot.slane %v2021_v19, 5 }
 0x260   : > { %1988 = vrot.lane.b32.xlu0 %v1985_v50, %s5380_s11  ;;  %1927 = vrot.lane.b32.xlu1 %v1922_v3, %s5380_s11  ;;  %v2082_v3 = vrot.slane %v4632_v29, 1  ;;  %v2008_v50 = vsel %vm214_vm0, %v2005_v41, %v2007_v52  ;;  %v2102_v10 = vrot.slane %v2096_v46, 2  ;;  %v4728_v45 = vmul.f32 %v4205_v60, %v2158_v9 }
 0x261   : > { %v1121_v33 = vadd.f32 %v3820_v62, %v1107_v2  ;;  %v1225_v23 = vadd.f32 %v4556_v51, %v1204_v49  ;;  %v2042_v62 = vmul.f32 %v2039_v11, %v4183_v32  ;;  %v2029_v41 = vsel %vm660_vm10, %v2026_v30, %v2028_v42 }
 0x262   : > { %v1241_v14 = vpop.permute.xlu0 %1240  ;;  %v4580_v27 = vpop.permute.xlu1 %1179  ;;  %v4673_v44 = vstv %s4624_s8  ;;  %v2083_v18 = vsel %vm589_vm7, %v2081_v12, %v2082_v3  ;;  %v2117_v30 = vmul.f32 %v4161_v25, %v4670_v59  ;;  %v2159_v2 = vmul.f32 %v4161_v25, %v2158_v9  ;;  %s4833_s8 = sld [smem:[#allocation7 + $0x4b]] }
 0x263   : > { %v1246_v51 = vadd.f32 %v1241_v14, %v1225_v23  ;;  %v1142_v1 = vadd.f32 %v4536_v17, %v1121_v33  ;;  %v2103_v17 = vrot.slane %v4659_v26, 2  ;;  %v2049_v36 = vrot.slane %v2042_v62, 6 }
 0x264   : > { %2009 = vrot.lane.b32.xlu0 %v2006_v22, %s5380_s11  ;;  %1948 = vrot.lane.b32.xlu1 %v1945_v61, %s5380_s11  ;;  %v4690_v61 = vmul.f32 %v4205_v60, %v4670_v59  ;;  %v4694_v16 = vmul.f32 %v4205_v60, %v4673_v44  ;;  %v2123_v58 = vrot.slane %v2117_v30, 3  ;;  %v2165_v24 = vrot.slane %v2159_v2, 5 }
 0x265   : > { %v1163_v35 = vadd.f32 %v4558_v38, %v1142_v1  ;;  %v1260_v22 = vadd.f32 %v3799_v47, %v1246_v51  ;;  %v2138_v38 = vmul.f32 %v4161_v25, %v4673_v44  ;;  %v2077_v47 = vmul.f32 %v2074_v63, %v4183_v32 }
 0x266   : > { %v4603_v31 = vpop.permute.xlu0 %1275  ;;  %v4605_v57 = vpop.permute.xlu1 %1200  ;;  %v2124_v55 = vrot.slane %v4690_v61, 3  ;;  %v2145_v39 = vrot.slane %v4694_v16, 4  ;;  %v4731_v63 = vstv %s4675_s20  ;;  %v2119_v26 = vmul.f32 %v4670_v59, %v4183_v32  ;;  %s4910_s20 = sld [smem:[#allocation7 + $0x59]] }
 0x267   : > { %v1184_v53 = vadd.f32 %v4580_v27, %v1163_v35  ;;  %v1281_v34 = vadd.f32 %v4603_v31, %v1260_v22  ;;  %v2084_v4 = vrot.slane %v2077_v47, 1  ;;  %v2180_v33 = vmul.f32 %v4161_v25, %v4731_v63 }
 0x268   : > { %2030 = vrot.lane.b32.xlu0 %v2027_v48, %s5380_s11  ;;  %1969 = vrot.lane.b32.xlu1 %v1966_v8, %s5380_s11  ;;  %v2104_v48 = vsel %vm607_vm8, %v2102_v10, %v2103_v17  ;;  %v2050_v8 = vsel %vm678_vm11, %v2047_v15, %v2049_v36  ;;  %v2144_v15 = vrot.slane %v2138_v38, 4  ;;  %v2125_v52 = vsel %vm625_vm9, %v2123_v58, %v2124_v55  ;;  %v5382_v58 = vld [vmem:[#allocation18_spill] sm:$0xff] }
 0x269   : > { %v1205_v27 = vadd.f32 %v4605_v57, %v1184_v53  ;;  %v4761_v23 = vmul.f32 %v4205_v60, %v4731_v63  ;;  %v2200_v62 = vstv %s4714_s18  ;;  %v2140_v51 = vmul.f32 %v4673_v44, %v4183_v32  ;;  %s5017_s18 = sld [smem:[#allocation7 + $0x37]] }
 0x26a   : > { %v4626_v0 = vpop.permute.xlu0 %1296  ;;  %v4628_v40 = vpop.permute.xlu1 %1221  ;;  %v2146_v7 = vsel %vm214_vm0, %v2144_v15, %v2145_v39  ;;  %v2161_v1 = vmul.f32 %v2158_v9, %v4183_v32  ;;  %v2186_v59 = vrot.slane %v2180_v33, 6  ;;  %v4798_v36 = vstv %s4735_s27  ;;  %s5087_s27 = sld [smem:[#allocation7 + $0x53]] }
 0x26b   : > { %v1302_v31 = vadd.f32 %v4626_v0, %v1281_v34  ;;  %v1226_v57 = vadd.f32 %v4628_v40, %v1205_v27  ;;  %v2187_v44 = vrot.slane %v4761_v23, 6  ;;  %v2126_v10 = vrot.slane %v2119_v26, 3 }
 0x26c   : > { %2051 = vrot.lane.b32.xlu0 %v2048_v6, %s5380_s11  ;;  %1990 = vrot.lane.b32.xlu1 %v1987_v56, %s5380_s11  ;;  %v2062_v6 = vmul.f32 %v4205_v60, %v2060_v37  ;;  %v2105_v56 = vrot.slane %v2098_v21, 2  ;;  %v2085_v37 = vsel %vm589_vm7, %v2082_v3, %v2084_v4  ;;  %v2201_v30 = vmul.f32 %v4161_v25, %v2200_v62 }
 0x26d   : > { %v2147_v38 = vrot.slane %v2140_v51, 4  ;;  %v4823_v34 = vmul.f32 %v4161_v25, %v4798_v36  ;;  %v4828_v4 = vstv %s4767_s7  ;;  %v4831_v2 = vstv %s4769_s24  ;;  %s5139_s7 = sld [smem:[#allocation7 + $0x61]]  ;;  %s5391_s24 = smov 16  }
 0x26e   : > { %v4653_v43 = vpop.permute.xlu0 %1317  ;;  %v4655_v13 = vpop.permute.xlu1 %1242  ;;  %v2106_v42 = vsel %vm607_vm8, %v2103_v17, %v2105_v56  ;;  %v4795_v17 = vstv %s4733_s17  ;;  %v4868_v33 = vstv %s4800_s30  ;;  %s5069_s17 = sld [smem:[#allocation7 + $0x4c]]  ;;  %s5393_s30 = smov 64  }
 0x26f   : > { %v1323_v0 = vadd.f32 %v4653_v43, %v1302_v31  ;;  %v1247_v40 = vadd.f32 %v4655_v13, %v1226_v57  ;;  %v2166_v43 = vrot.slane %v4728_v45, 5  ;;  %v4765_v13 = vstv %s4705_s25  ;;  %s4947_s25 = sld [smem:[#allocation7 + $0x60]] }
 0x270   : > { %2065 = vrot.lane.b32.xlu0 %v2061_v54, %s5381_s22  ;;  %2011 = vrot.lane.b32.xlu1 %v2008_v50, %s5380_s11  ;;  %v4782_v46 = vmul.f32 %v4205_v60, %v4765_v13  ;;  %v2127_v45 = vsel %vm625_vm9, %v2124_v55, %v2126_v10  ;;  %v4904_v10 = vstv %s4833_s8  ;;  %s5394_s8 = smov 48  }
 0x271   : > { %v1261_v50 = vadd.f32 %v3854_v20, %v1247_v40  ;;  %v4791_v20 = vstv %s4723_s10  ;;  %v1590_v40 = vmul.f32 %v4161_v25, %v4828_v4  ;;  %s5034_s10 = sld [smem:[#allocation7 + $0x45]] }
 0x272   : > { %v1339_v11 = vpop.permute.xlu0 %1338  ;;  %v4677_v14 = vpop.permute.xlu1 %1277  ;;  %v2222_v9 = vrot.slane %v4782_v46, 1 }
 0x273   : > { %v1344_v54 = vadd.f32 %v1339_v11, %v1323_v0  ;;  %v2215_v11 = vmul.f32 %v4161_v25, %v4765_v13  ;;  %v1282_v53 = vadd.f32 %v4677_v14, %v1261_v50  ;;  %v4819_v14 = vmul.f32 %v4161_v25, %v4795_v17 }
 0x274   : > { %2086 = vrot.lane.b32.xlu0 %v2083_v18, %s5381_s22  ;;  %2032 = vrot.lane.b32.xlu1 %v2029_v41, %s5380_s11  ;;  %v2167_v41 = vsel %vm660_vm10, %v2165_v24, %v2166_v43  ;;  %v4890_v50 = vmul.f32 %v4205_v60, %v4868_v33 }
 0x275   : > { %v2221_v21 = vrot.slane %v2215_v11, 1  ;;  %v1562_v16 = vrot.slane %v4819_v14, 2  ;;  %v4898_v11 = vmul.f32 %v4205_v60, %v4831_v2  ;;  %v4915_v14 = vmul.f32 %v4205_v60, %v4904_v10 }
 0x276   : > { %v1360_v5 = vpop.permute.xlu0 %1359  ;;  %v4707_v28 = vpop.permute.xlu1 %1298 }
 0x277   : > { %v1365_v12 = vadd.f32 %v1360_v5, %v1344_v54  ;;  %v2168_v5 = vrot.slane %v2161_v1, 5  ;;  %v1303_v27 = vadd.f32 %v4707_v28, %v1282_v53  ;;  %v2223_v0 = vsel %vm589_vm7, %v2221_v21, %v2222_v9 }
 0x278   : > { %2107 = vrot.lane.b32.xlu0 %v2104_v48, %s5381_s22  ;;  %2053 = vrot.lane.b32.xlu1 %v2050_v8, %s5380_s11  ;;  %s4742_s11 = sld [smem:[#allocation7 + $0x31]]  ;;  %v4810_v48 = vmul.f32 %v4161_v25, %v4791_v20  ;;  %v2188_v8 = vsel %vm678_vm11, %v2186_v59, %v2187_v44  ;;  %v1596_v1 = vrot.slane %v1590_v40, 4 }
 0x279   : > { %v2169_v61 = vsel %vm660_vm10, %v2166_v43, %v2168_v5  ;;  %v4874_v43 = vmul.f32 %v4205_v60, %v4791_v20 }
 0x27a   : > { %v1381_v19 = vpop.permute.xlu0 %1380  ;;  %v4737_v49 = vpop.permute.xlu1 %1319  ;;  %v1545_v55 = vrot.slane %v4810_v48, 1 }
 0x27b   : > { %v1386_v18 = vadd.f32 %v1381_v19, %v1365_v12  ;;  %v2148_v19 = vsel %vm214_vm0, %v2145_v39, %v2147_v38  ;;  %v1324_v56 = vadd.f32 %v4737_v49, %v1303_v27  ;;  %v1579_v39 = vrot.slane %v4823_v34, 3 }
 0x27c   : > { %2128 = vrot.lane.b32.xlu0 %v2125_v52, %s5381_s22  ;;  %2067 = vrot.lane.b32.xlu1 %v2062_v6, %s5381_s22  ;;  %v4847_v6 = vstv %s4777_s29  ;;  %v1607_v49 = vmul.f32 %v4161_v25, %v4831_v2  ;;  %v2182_v12 = vmul.f32 %v4731_v63, %v4183_v32  ;;  %v1614_v34 = vrot.slane %v4898_v11, 5  ;;  %s5392_s29 = smov 32  }
 0x27d   : > { %v1400_v15 = vadd.f32 %v5382_v58, %v1386_v18  ;;  %v2236_v18 = vmul.f32 %v4161_v25, %v4868_v33  ;;  %v4922_v27 = vmul.f32 %v4205_v60, %v4847_v6 }
 0x27e   : > { %v1416_v29 = vpop.permute.xlu0 %1415  ;;  %v1341_v3 = vpop.permute.xlu1 %1340  ;;  %v1532_v47 = vstv %s4742_s11  ;;  %v1613_v59 = vrot.slane %v1607_v49, 5  ;;  %v2189_v21 = vrot.slane %v2182_v12, 6  ;;  %s5118_s11 = sld [smem:[#allocation7 + $0x5a]] }
 0x27f   : > { %v4844_v28 = vmul.f32 %v4161_v25, %v1532_v47  ;;  %v1421_v52 = vadd.f32 %v1416_v29, %v1400_v15  ;;  %v4882_v29 = vmul.f32 %v4205_v60, %v4798_v36  ;;  %v2242_v58 = vrot.slane %v2236_v18, 2  ;;  %v4924_v15 = vld [vmem:[#allocation2 + $0x18] sm:$0xff] }
 0x280   : > { %2149 = vrot.lane.b32.xlu0 %v2146_v7, %s5381_s22  ;;  %2088 = vrot.lane.b32.xlu1 %v2085_v37, %s5381_s22  ;;  %v1345_v7 = vadd.f32 %v1341_v3, %v1324_v56  ;;  %v4865_v37 = vmul.f32 %v4161_v25, %v4847_v6  ;;  %v4886_v3 = vmul.f32 %v4205_v60, %v4828_v4  ;;  %v4930_v56 = vstv %s4870_s5  ;;  %s5395_s5 = smov 80  }
 0x281   : > { %v1580_v5 = vrot.slane %v4882_v29, 3  ;;  %v2278_v23 = vmul.f32 %v4924_v15, %v4930_v56 }
 0x282   : > { %v1437_v35 = vpop.permute.xlu0 %1436  ;;  %v1362_v22 = vpop.permute.xlu1 %1361  ;;  %v1597_v48 = vrot.slane %v4886_v3, 4 }
 0x283   : > { %v1442_v26 = vadd.f32 %v1437_v35, %v1421_v52  ;;  %v1366_v51 = vadd.f32 %v1362_v22, %v1345_v7  ;;  %v1630_v22 = vrot.slane %v4865_v37, 6  ;;  %v1581_v52 = vsel %vm625_vm9, %v1579_v39, %v1580_v5 }
 0x284   : > { %2170 = vrot.lane.b32.xlu0 %v2167_v41, %s5381_s22  ;;  %2109 = vrot.lane.b32.xlu1 %v2106_v42, %s5381_s22  ;;  %v4878_v42 = vmul.f32 %v4205_v60, %v4795_v17  ;;  %v4945_v37 = vmul.f32 %v4205_v60, %v4930_v56  ;;  %v1598_v39 = vsel %vm214_vm0, %v1596_v1, %v1597_v48 }
 0x286   : > { %v1458_v31 = vpop.permute.xlu0 %1457  ;;  %v1383_v57 = vpop.permute.xlu1 %1382  ;;  %v1563_v53 = vrot.slane %v4878_v42, 2 }
 0x287   : > { %v1463_v41 = vadd.f32 %v1458_v31, %v1442_v26  ;;  %v1387_v35 = vadd.f32 %v1383_v57, %v1366_v51  ;;  %v2257_v31 = vmul.f32 %v4924_v15, %v4904_v10  ;;  %v5383_v57 = vld [vmem:[#allocation21_spill] sm:$0xff]  ;;  %v1631_v26 = vrot.slane %v4922_v27, 6 }
 0x288   : > { %2191 = vrot.lane.b32.xlu0 %v2188_v8, %s5381_s22  ;;  %2130 = vrot.lane.b32.xlu1 %v2127_v45, %s5381_s22  ;;  %v2243_v8 = vrot.slane %v4890_v50, 2  ;;  %v1564_v49 = vsel %vm607_vm8, %v1562_v16, %v1563_v53  ;;  %v2264_v16 = vrot.slane %v4915_v14, 3 }
 0x289   : > { %v1401_v45 = vadd.f32 %v5383_v57, %v1387_v35  ;;  %v2263_v12 = vrot.slane %v2257_v31, 3  ;;  %v2285_v35 = vrot.slane %v4945_v37, 4  ;;  %v4984_v31 = vld [vmem:[#allocation2 + $0x20] sm:$0xff] }
 0x28a   : > { %v1479_v54 = vpop.permute.xlu0 %1478  ;;  %v1418_v24 = vpop.permute.xlu1 %1417 }
 0x28b   : > { %v1484_v25 = vadd.f32 %v1479_v54, %v1463_v41  ;;  %v1615_v54 = vsel %vm660_vm10, %v1613_v59, %v1614_v34  ;;  %v2202_v59 = vmul.f32 %v4205_v60, %v2200_v62  ;;  %v1632_v62 = vsel %vm678_vm11, %v1630_v22, %v1631_v26 }
 0x28c   : > { %2205 = vrot.lane.b32.xlu0 %v2201_v30, %s3167_s6  ;;  %2151 = vrot.lane.b32.xlu1 %v2148_v19, %s5381_s22  ;;  %v1546_v30 = vrot.slane %v4874_v43, 1 }
 0x28e   : > { %v1500_v63 = vpop.permute.xlu0 %1499  ;;  %v1439_v38 = vpop.permute.xlu1 %1438  ;;  %v1547_v40 = vsel %vm589_vm7, %v1545_v55, %v1546_v30  ;;  %v2190_v55 = vsel %vm678_vm11, %v2187_v44, %v2189_v21  ;;  %v1422_v44 = vadd.f32 %v1418_v24, %v1401_v45 }
 0x28f   : > { %v1505_v19 = vadd.f32 %v1500_v63, %v1484_v25  ;;  %v4975_v63 = vstv %s4910_s20  ;;  %v4977_v25 = vld [vmem:[#allocation2 + $0x28] sm:$0x3f]  ;;  %s5396_s20 = smov 96  }
 0x290   : > { %2226 = vrot.lane.b32.xlu0 %v2223_v0, %s3167_s6  ;;  %2172 = vrot.lane.b32.xlu1 %v2169_v61, %s5381_s22  ;;  %v2217_v0 = vmul.f32 %v4765_v13, %v4183_v32  ;;  %v2244_v13 = vsel %vm607_vm8, %v2242_v58, %v2243_v8  ;;  %v2238_v24 = vmul.f32 %v4977_v25, %v4868_v33  ;;  %v2284_v33 = vrot.slane %v2278_v23, 4 }
 0x291   : > { %v1443_v21 = vadd.f32 %v1439_v38, %v1422_v44  ;;  %v2265_v58 = vsel %vm625_vm9, %v2263_v12, %v2264_v16  ;;  %v4988_v60 = vmul.f32 %v4984_v31, %v4975_v63  ;;  %v1534_v38 = vmul.f32 %v4984_v31, %v1532_v47 }
 0x292   : > { %v1521_v61 = vpop.permute.xlu0 %1520  ;;  %v1460_v7 = vpop.permute.xlu1 %1459  ;;  %v2224_v18 = vrot.slane %v2217_v0, 1  ;;  %v1541_v57 = vmul.f32 %v4977_v25, %v4791_v20  ;;  %v2299_v22 = vmul.f32 %v4924_v15, %v4975_v63  ;;  %v2286_v47 = vsel %vm214_vm0, %v2284_v33, %v2285_v35 }
 0x293   : > { %v1526_v32 = vadd.f32 %v1521_v61, %v1505_v19  ;;  %v1464_v19 = vadd.f32 %v1460_v7, %v1443_v21  ;;  %v5013_v20 = vstv %s4947_s25  ;;  %v2259_v46 = vmul.f32 %v4977_v25, %v4904_v10  ;;  %s5397_s25 = smov 112  }
 0x294   : > { %2247 = vrot.lane.b32.xlu0 %v2244_v13, %s3167_s6  ;;  %2193 = vrot.lane.b32.xlu1 %v2190_v55, %s5381_s22  ;;  %v2225_v0 = vsel %vm589_vm7, %v2222_v9, %v2224_v18  ;;  %s5005_s22 = sld [smem:[#allocation7 + $0x3e]]  ;;  %v2306_v7 = vrot.slane %v4988_v60, 5  ;;  %v5022_v13 = vmul.f32 %v4984_v31, %v5013_v20  ;;  %v1548_v55 = vrot.slane %v1541_v57, 1 }
 0x295   : > { %v1535_v51 = vadd.f32 %v4844_v28, %v1526_v32  ;;  %v2245_v32 = vrot.slane %v2238_v24, 2  ;;  %v1558_v23 = vmul.f32 %v4977_v25, %v4795_v17  ;;  %v1575_v10 = vmul.f32 %v4977_v25, %v4798_v36 }
 0x296   : > { %v4968_v41 = vpop.permute.xlu0 %1666  ;;  %v1481_v1 = vpop.permute.xlu1 %1480  ;;  %v2305_v12 = vrot.slane %v2299_v22, 5  ;;  %v2320_v18 = vmul.f32 %v4924_v15, %v5013_v20  ;;  %v2266_v36 = vrot.slane %v2259_v46, 3  ;;  %v1626_v33 = vmul.f32 %v4977_v25, %v4847_v6 }
 0x297   : > { %v1552_v28 = vadd.f32 %v1547_v40, %v1535_v51  ;;  %v2246_v17 = vsel %vm607_vm8, %v2243_v8, %v2245_v32  ;;  %v1565_v50 = vrot.slane %v1558_v23, 2  ;;  %v1582_v8 = vrot.slane %v1575_v10, 3 }
 0x298   : > { %2268 = vrot.lane.b32.xlu0 %v2265_v58, %s3167_s6  ;;  %2207 = vrot.lane.b32.xlu1 %v2202_v59, %s3167_s6  ;;  %v1609_v59 = vmul.f32 %v4977_v25, %v4831_v2  ;;  %v2327_v58 = vrot.slane %v5022_v13, 6  ;;  %v1549_v2 = vsel %vm589_vm7, %v1546_v30, %v1548_v55  ;;  %v2326_v57 = vrot.slane %v2320_v18, 6 }
 0x299   : > { %v1569_v45 = vadd.f32 %v1564_v49, %v1552_v28  ;;  %v1485_v49 = vadd.f32 %v1481_v1, %v1464_v19  ;;  %v2307_v28 = vsel %vm660_vm10, %v2305_v12, %v2306_v7  ;;  %v2267_v43 = vsel %vm625_vm9, %v2264_v16, %v2266_v36 }
 0x29a   : > { %v5007_v61 = vpop.permute.xlu0 %1687  ;;  %v1502_v40 = vpop.permute.xlu1 %1501  ;;  %v2340_v30 = vstv %s5017_s18  ;;  %v2328_v14 = vsel %vm678_vm11, %v2326_v57, %v2327_v58  ;;  %v1616_v46 = vrot.slane %v1609_v59, 5  ;;  %v2375_v23 = vstv %s5034_s10  ;;  %v5385_v57 = vld [vmem:[#allocation22_spill] sm:$0xff]  ;;  %s5399_s18 = sshll.u32 %s3347_s9, 3 }
 0x29b   : > { %v1586_v9 = vadd.f32 %v1581_v52, %v1569_v45  ;;  %v1592_v52 = vmul.f32 %v4977_v25, %v4828_v4  ;;  %v1506_v51 = vadd.f32 %v1502_v40, %v1485_v49  ;;  %v2280_v4 = vmul.f32 %v4977_v25, %v4930_v56  ;;  %s209_s10 = scalar_lea.vmem [#allocation10], %s5399_s18 }
 0x29c   : > { %2289 = vrot.lane.b32.xlu0 %v2286_v47, %s3167_s6  ;;  %2228 = vrot.lane.b32.xlu1 %v2225_v0, %s3167_s6  ;;  %v5055_v45 = vstv %s5005_s22  ;;  %v1566_v47 = vsel %vm607_vm8, %v1563_v53, %v1565_v50  ;;  %v1583_v49 = vsel %vm625_vm9, %v1580_v5, %v1582_v8  ;;  %v2341_v10 = vmul.f32 %v4924_v15, %v2340_v30  ;;  %s2914_s22 = sshll.u32 %s3211_s16, 7  ;;  %s3169_s16 = smov [#allocation10]  }
 0x29d   : > { %v1603_v44 = vadd.f32 %v1598_v39, %v1586_v9  ;;  %v5065_v6 = vmul.f32 %v4984_v31, %v5055_v45  ;;  %v2287_v16 = vrot.slane %v2280_v4, 4  ;;  %v1599_v32 = vrot.slane %v1592_v52, 4 }
 0x29e   : > { %v1709_v1 = vpop.permute.xlu0 %1708  ;;  %v1523_v24 = vpop.permute.xlu1 %1522  ;;  %v5100_v12 = vmul.f32 %v4984_v31, %v2375_v23  ;;  %v1633_v59 = vrot.slane %v1626_v33, 6  ;;  %v1617_v37 = vsel %vm660_vm10, %v1614_v34, %v1616_v46  ;;  %v2417_v8 = vstv %s5087_s27 }
 0x29f   : > { %v1620_v39 = vadd.f32 %v1615_v54, %v1603_v44  ;;  %v1527_v21 = vadd.f32 %v1523_v24, %v1506_v51  ;;  %v2362_v52 = vrot.slane %v5065_v6, 1  ;;  %v2322_v51 = vmul.f32 %v4977_v25, %v5013_v20 }
 0x2a0   : > { %2310 = vrot.lane.b32.xlu0 %v2307_v28, %s3167_s6  ;;  %2249 = vrot.lane.b32.xlu1 %v2246_v17, %s3167_s6  ;;  %v2288_v5 = vsel %vm214_vm0, %v2285_v35, %v2287_v16  ;;  %v1600_v18 = vsel %vm214_vm0, %v1597_v48, %v1599_v32  ;;  %v2383_v34 = vrot.slane %v5100_v12, 2  ;;  %v1634_v28 = vsel %vm678_vm11, %v1631_v26, %v1633_v59 }
 0x2a1   : > { %v1637_v56 = vadd.f32 %v1632_v62, %v1620_v39  ;;  %v1536_v54 = vadd.f32 %v1534_v38, %v1527_v21  ;;  %v2301_v62 = vmul.f32 %v4977_v25, %v4975_v63  ;;  %v5384_v38 = vld [vmem:[#allocation19_spill] sm:$0xff]  ;;  %v2355_v63 = vmul.f32 %v4924_v15, %v5055_v45 }
 0x2a2   : > { %v1730_v19 = vpop.permute.xlu0 %1729  ;;  %v5057_v0 = vpop.permute.xlu1 %1668  ;;  %v2329_v4 = vrot.slane %v2322_v51, 6  ;;  %v2396_v39 = vstv %s5069_s17  ;;  %v5135_v27 = vmul.f32 %v4984_v31, %v2417_v8  ;;  %v2357_v26 = vmul.f32 %v4977_v25, %v5055_v45  ;;  %s2703_s17 = sshll.u32 %s209_s10, 4  ;;  %s5247_s17 = int_to_ptr.vmem [resolvable:$true] %s2703_s17 }
 0x2a3   : > { %v1651_v22 = vadd.f32 %v5384_v38, %v1637_v56  ;;  %v1553_v40 = vadd.f32 %v1549_v2, %v1536_v54  ;;  %v2308_v44 = vrot.slane %v2301_v62, 5  ;;  %v2361_v20 = vrot.slane %v2355_v63, 1 }
 0x2a4   : > { %2331 = vrot.lane.b32.xlu0 %v2328_v14, %s3167_s6  ;;  %2270 = vrot.lane.b32.xlu1 %v2267_v43, %s3167_s6  ;;  %v5122_v21 = vmul.f32 %v4984_v31, %v2396_v39  ;;  %v2397_v50 = vmul.f32 %v4924_v15, %v2396_v39  ;;  %v2330_v54 = vsel %vm678_vm11, %v2327_v58, %v2329_v4  ;;  %v2425_v32 = vrot.slane %v5135_v27, 4 }
 0x2a5   : > { %v1672_v9 = vadd.f32 %v4968_v41, %v1651_v22  ;;  %v1570_v55 = vadd.f32 %v1566_v47, %v1553_v40  ;;  %v2363_v3 = vsel %vm589_vm7, %v2361_v20, %v2362_v52  ;;  %v2309_v48 = vsel %vm660_vm10, %v2306_v7, %v2308_v44  ;;  %v5386_v22 = vld [vmem:[#allocation20_spill] sm:$0xff] }
 0x2a6   : > { %v1751_v42 = vpop.permute.xlu0 %1750  ;;  %v1690_v53 = vpop.permute.xlu1 %1689  ;;  %v2404_v38 = vrot.slane %v5122_v21, 3  ;;  %v2418_v13 = vmul.f32 %v4924_v15, %v2417_v8  ;;  %v2403_v40 = vrot.slane %v2397_v50, 3  ;;  %v2342_v14 = vmul.f32 %v4984_v31, %v2340_v30 }
 0x2a7   : > { %v1693_v41 = vadd.f32 %v5007_v61, %v1672_v9  ;;  %v1587_v29 = vadd.f32 %v1583_v49, %v1570_v55  ;;  %v2376_v61 = vmul.f32 %v4924_v15, %v2375_v23  ;;  %v2364_v46 = vrot.slane %v2357_v26, 1 }
 0x2a8   : > { %2345 = vrot.lane.b32.xlu0 %v2341_v10, %s3168_s28  ;;  %2291 = vrot.lane.b32.xlu1 %v2288_v5, %s3167_s6  ;;  %v2438_v63 = vstv %s5118_s11  ;;  %v2378_v9 = vmul.f32 %v4977_v25, %v2375_v23  ;;  %v2424_v30 = vrot.slane %v2418_v13, 4  ;;  %v2459_v12 = vstv %s5139_s7  ;;  %s5245_s7 = scalar_lea.hbm %s5292_s3, %s2914_s22 }
 0x2a9   : > { %v1714_v24 = vadd.f32 %v1709_v1, %v1693_v41  ;;  %v1604_v35 = vadd.f32 %v1600_v18, %v1587_v29  ;;  %v2382_v60 = vrot.slane %v2376_v61, 2  ;;  %v2439_v51 = vmul.f32 %v4924_v15, %v2438_v63 }
 0x2aa   : > { %v1772_v17 = vpop.permute.xlu0 %1771  ;;  %v1711_v36 = vpop.permute.xlu1 %1710  ;;  %v2365_v29 = vsel %vm589_vm7, %v2362_v52, %v2364_v46  ;;  %v2385_v5 = vrot.slane %v2378_v9, 2  ;;  %v2461_v20 = vmul.f32 %v4984_v31, %v2459_v12  ;;  %v2399_v61 = vmul.f32 %v4977_v25, %v2396_v39  ;;  %v5387_v39 = vld [vmem:[#allocation23_spill] sm:$0xff] }
 0x2ab   : > { %v1621_v1 = vadd.f32 %v1617_v37, %v1604_v35  ;;  %v1735_v11 = vadd.f32 %v1730_v19, %v1714_v24  ;;  %v2384_v62 = vsel %vm607_vm8, %v2382_v60, %v2383_v34  ;;  %v2445_v37 = vrot.slane %v2439_v51, 5 }
 0x2ac   : > { %2366 = vrot.lane.b32.xlu0 %v2363_v3, %s3168_s28  ;;  %2312 = vrot.lane.b32.xlu1 %v2309_v48, %s3167_s6  ;;  %v2460_v35 = vmul.f32 %v4924_v15, %v2459_v12  ;;  %v2386_v52 = vsel %vm607_vm8, %v2383_v34, %v2385_v5  ;;  %v2406_v4 = vrot.slane %v2399_v61, 3  ;;  %v2462_v27 = vmul.f32 %v4977_v25, %v2459_v12 }
 0x2ad   : > { %v1638_v7 = vadd.f32 %v1634_v28, %v1621_v1  ;;  %v1756_v2 = vadd.f32 %v1751_v42, %v1735_v11  ;;  %v2405_v42 = vsel %vm625_vm9, %v2403_v40, %v2404_v38  ;;  %v2441_v28 = vmul.f32 %v4977_v25, %v2438_v63 }
 0x2ae   : > { %v1807_v33 = vpop.permute.xlu0 %1806  ;;  %v1732_v56 = vpop.permute.xlu1 %1731  ;;  %v2466_v11 = vrot.slane %v2460_v35, 6 }
 0x2af   : > { %v1652_v19 = vadd.f32 %v5385_v57, %v1638_v7  ;;  %v1777_v43 = vadd.f32 %v1772_v17, %v1756_v2  ;;  %v2407_v7 = vsel %vm625_vm9, %v2404_v38, %v2406_v4 }
 0x2b0   : > { %2387 = vrot.lane.b32.xlu0 %v2384_v62, %s3168_s28  ;;  %2333 = vrot.lane.b32.xlu1 %v2330_v54, %s3167_s6  ;;  %v2448_v54 = vrot.slane %v2441_v28, 5  ;;  %s5194_s6 = sld [smem:[#allocation8]] }
 0x2b1   : > { %v1673_v58 = vadd.f32 %v5057_v0, %v1652_v19  ;;  %v1791_v45 = vadd.f32 %v5386_v22, %v1777_v43  ;;  %v2440_v0 = vmul.f32 %v4984_v31, %v2438_v63  ;;  %v2467_v31 = vrot.slane %v2461_v20, 6 }
 0x2b2   : > { %v1828_v16 = vpop.permute.xlu0 %1827  ;;  %v1753_v47 = vpop.permute.xlu1 %1752  ;;  %v2469_v43 = vrot.slane %v2462_v27, 6 }
 0x2b3   : > { %v1694_v49 = vadd.f32 %v1690_v53, %v1673_v58  ;;  %v1812_v55 = vadd.f32 %v1807_v33, %v1791_v45  ;;  %v2426_v53 = vsel %vm214_vm0, %v2424_v30, %v2425_v32  ;;  %v2446_v59 = vrot.slane %v2440_v0, 5 }
 0x2b4   : > { %2408 = vrot.lane.b32.xlu0 %v2405_v42, %s3168_s28  ;;  %2347 = vrot.lane.b32.xlu1 %v2342_v14, %s3168_s28  ;;  %v2468_v34 = vsel %vm678_vm11, %v2466_v11, %v2467_v31  ;;  %v2470_v13 = vsel %vm678_vm11, %v2467_v31, %v2469_v43 }
 0x2b5   : > { %v1715_v10 = vadd.f32 %v1711_v36, %v1694_v49  ;;  %v5159_v44 = vadd.f32 %v1828_v16, %v1812_v55  ;;  %v2420_v36 = vmul.f32 %v4977_v25, %v2417_v8  ;;  %v2447_v48 = vsel %vm660_vm10, %v2445_v37, %v2446_v59 }
 0x2b6   : > { %v5162_v41 = vpop.permute.xlu0 %1848  ;;  %v1774_v23 = vpop.permute.xlu1 %1773  ;;  %v2449_v19 = vsel %vm660_vm10, %v2446_v59, %v2448_v54 }
 0x2b7   : > { %v1736_v18 = vadd.f32 %v1732_v56, %v1715_v10  ;;  %v2427_v2 = vrot.slane %v2420_v36, 4 }
 0x2b8   : > { %2429 = vrot.lane.b32.xlu0 %v2426_v53, %s3168_s28  ;;  %2368 = vrot.lane.b32.xlu1 %v2365_v29, %s3168_s28  ;;  %v1854_v53 = vadd.f32 %v5162_v41, %v5159_v44 }
 0x2b9   : > { %v1757_v24 = vadd.f32 %v1753_v47, %v1736_v18  ;;  %v2428_v56 = vsel %vm214_vm0, %v2425_v32, %v2427_v2  ;;  %vm2661_vm0 = vcmask 654336  }
 0x2ba   : > { %v1870_v17 = vpop.permute.xlu0 %1869  ;;  %v1809_v6 = vpop.permute.xlu1 %1808 }
 0x2bb   : > { %v1778_v3 = vadd.f32 %v1774_v23, %v1757_v24  ;;  %v1875_v12 = vadd.f32 %v1870_v17, %v1854_v53 }
 0x2bc   : > { %2450 = vrot.lane.b32.xlu0 %v2447_v48, %s3168_s28  ;;  %2389 = vrot.lane.b32.xlu1 %v2386_v52, %s3168_s28 }
 0x2bd   : > { %v1792_v1 = vadd.f32 %v5387_v39, %v1778_v3 }
 0x2be   : > { %v1891_v21 = vpop.permute.xlu0 %1890  ;;  %v1830_v15 = vpop.permute.xlu1 %1829 }
 0x2bf   : > { %v1813_v60 = vadd.f32 %v1809_v6, %v1792_v1  ;;  %v1896_v18 = vadd.f32 %v1891_v21, %v1875_v12 }
 0x2c0   : > { %2471 = vrot.lane.b32.xlu0 %v2468_v34, %s3168_s28  ;;  %2410 = vrot.lane.b32.xlu1 %v2407_v7, %s3168_s28 }
 0x2c1   : > { %v1834_v50 = vadd.f32 %v1830_v15, %v1813_v60 }
 0x2c2   : > { %v1912_v8 = vpop.permute.xlu0 %1911  ;;  %v1851_v33 = vpop.permute.xlu1 %1850 }
 0x2c3   : > { %v1917_v61 = vadd.f32 %v1912_v8, %v1896_v18  ;;  %v1855_v52 = vadd.f32 %v1851_v33, %v1834_v50 }
 0x2c4   : > { %2431 = vrot.lane.b32.xlu1 %v2428_v56, %s3168_s28 }
 0x2c6   : > { %v1926_v26 = vpop.permute.xlu0 %1925  ;;  %v1872_v57 = vpop.permute.xlu1 %1871 }
 0x2c7   : > { %v1931_v24 = vadd.f32 %v1926_v26, %v1917_v61  ;;  %v1876_v31 = vadd.f32 %v1872_v57, %v1855_v52 }
 0x2c8   : > { %2452 = vrot.lane.b32.xlu1 %v2449_v19, %s3168_s28 }
 0x2ca   : > { %v1947_v62 = vpop.permute.xlu0 %1946  ;;  %v1893_v38 = vpop.permute.xlu1 %1892 }
 0x2cb   : > { %v1952_v6 = vadd.f32 %v1947_v62, %v1931_v24  ;;  %v1897_v39 = vadd.f32 %v1893_v38, %v1876_v31 }
 0x2cc   : > { %2473 = vrot.lane.b32.xlu1 %v2470_v13, %s3168_s28  ;;  %s2905_s28 = sld [smem:[#allocation8 + $0x1]] }
 0x2ce   : > { %v1968_v58 = vpop.permute.xlu0 %1967  ;;  %v1914_v22 = vpop.permute.xlu1 %1913 }
 0x2cf   : > { %v1973_v36 = vadd.f32 %v1968_v58, %v1952_v6  ;;  %v1918_v11 = vadd.f32 %v1914_v22, %v1897_v39 }
 0x2d2   : > { %v1989_v45 = vpop.permute.xlu0 %1988  ;;  %v1928_v40 = vpop.permute.xlu1 %1927 }
 0x2d3   : > { %v1994_v4 = vadd.f32 %v1989_v45, %v1973_v36  ;;  %v1932_v21 = vadd.f32 %v1928_v40, %v1918_v11  ;;  %v2480_v11 = vstv %s5194_s6  ;;  %s2689_s6 = scalar_lea.sflag [#allocation5], %s3347_s9 }
 0x2d6   : > { %v2010_v25 = vpop.permute.xlu0 %2009  ;;  %v1949_v14 = vpop.permute.xlu1 %1948 }
 0x2d7   : > { %v2015_v1 = vadd.f32 %v2010_v25, %v1994_v4  ;;  %v1953_v34 = vadd.f32 %v1949_v14, %v1932_v21 }
 0x2da   : > { %v2031_v16 = vpop.permute.xlu0 %2030  ;;  %v1970_v47 = vpop.permute.xlu1 %1969 }
 0x2db   : > { %v2036_v17 = vadd.f32 %v2031_v16, %v2015_v1  ;;  %v1974_v2 = vadd.f32 %v1970_v47, %v1953_v34 }
 0x2de   : > { %v2052_v32 = vpop.permute.xlu0 %2051  ;;  %v1991_v46 = vpop.permute.xlu1 %1990 }
 0x2df   : > { %v2057_v15 = vadd.f32 %v2052_v32, %v2036_v17  ;;  %v1995_v56 = vadd.f32 %v1991_v46, %v1974_v2 }
 0x2e2   : > { %v2066_v63 = vpop.permute.xlu0 %2065  ;;  %v2012_v9 = vpop.permute.xlu1 %2011 }
 0x2e3   : > { %v2071_v7 = vadd.f32 %v2066_v63, %v2057_v15  ;;  %v2016_v27 = vadd.f32 %v2012_v9, %v1995_v56 }
 0x2e6   : > { %v2087_v49 = vpop.permute.xlu0 %2086  ;;  %v2033_v55 = vpop.permute.xlu1 %2032 }
 0x2e7   : > { %v2092_v8 = vadd.f32 %v2087_v49, %v2071_v7  ;;  %v2037_v43 = vadd.f32 %v2033_v55, %v2016_v27 }
 0x2ea   : > { %v2108_v42 = vpop.permute.xlu0 %2107  ;;  %v2054_v0 = vpop.permute.xlu1 %2053 }
 0x2eb   : > { %v2113_v54 = vadd.f32 %v2108_v42, %v2092_v8  ;;  %v2058_v38 = vadd.f32 %v2054_v0, %v2037_v43 }
 0x2ee   : > { %v2129_v30 = vpop.permute.xlu0 %2128  ;;  %v2068_v10 = vpop.permute.xlu1 %2067 }
 0x2ef   : > { %v2134_v26 = vadd.f32 %v2129_v30, %v2113_v54  ;;  %v2072_v45 = vadd.f32 %v2068_v10, %v2058_v38 }
 0x2f2   : > { %v2150_v51 = vpop.permute.xlu0 %2149  ;;  %v2089_v23 = vpop.permute.xlu1 %2088 }
 0x2f3   : > { %v2155_v62 = vadd.f32 %v2150_v51, %v2134_v26  ;;  %v2093_v25 = vadd.f32 %v2089_v23, %v2072_v45 }
 0x2f6   : > { %v2171_v29 = vpop.permute.xlu0 %2170  ;;  %v2110_v5 = vpop.permute.xlu1 %2109 }
 0x2f7   : > { %v2176_v13 = vadd.f32 %v2171_v29, %v2155_v62  ;;  %v2114_v32 = vadd.f32 %v2110_v5, %v2093_v25  ;;  %v5388_v25 = vld [vmem:[#allocation16_spill] sm:$0xff] }
 0x2fa   : > { %v2192_v59 = vpop.permute.xlu0 %2191  ;;  %v2131_v20 = vpop.permute.xlu1 %2130 }
 0x2fb   : > { %v2197_v40 = vadd.f32 %v2192_v59, %v2176_v13  ;;  %v2135_v46 = vadd.f32 %v2131_v20, %v2114_v32  ;;  %v5390_v32 = vmov 0.0  }
 0x2fe   : > { %v2206_v37 = vpop.permute.xlu0 %2205  ;;  %v2152_v35 = vpop.permute.xlu1 %2151 }
 0x2ff   : > { %v2211_v14 = vadd.f32 %v2206_v37, %v2197_v40  ;;  %v2156_v30 = vadd.f32 %v2152_v35, %v2135_v46 }
 0x302   : > { %v2227_v3 = vpop.permute.xlu0 %2226  ;;  %v2173_v48 = vpop.permute.xlu1 %2172 }
 0x303   : > { %v2232_v63 = vadd.f32 %v2227_v3, %v2211_v14  ;;  %v2177_v55 = vadd.f32 %v2173_v48, %v2156_v30 }
 0x306   : > { %v2248_v44 = vpop.permute.xlu0 %2247  ;;  %v2194_v41 = vpop.permute.xlu1 %2193 }
 0x307   : > { %v2253_v49 = vadd.f32 %v2248_v44, %v2232_v63  ;;  %v2198_v12 = vadd.f32 %v2194_v41, %v2177_v55 }
 0x30a   : > { %v2269_v28 = vpop.permute.xlu0 %2268  ;;  %v2208_v60 = vpop.permute.xlu1 %2207 }
 0x30b   : > { %v2274_v53 = vadd.f32 %v2269_v28, %v2253_v49  ;;  %v2212_v10 = vadd.f32 %v2208_v60, %v2198_v12  ;;  %v2484_v60 = vstv %s2905_s28  ;;  %s3073_s28 = scalar_lea.vmem %s5247_s17, 128 }
 0x30c   : > { %p3074_p13 = scmp.ne.s32.totalorder %s5247_s17, %s3073_s28 }
 0x30e   : > { %v2290_v50 = vpop.permute.xlu0 %2289  ;;  %v2229_v33 = vpop.permute.xlu1 %2228  ;;  %p3075_p5 = pnand %p3074_p13, %p5400_p7 }
 0x30f   : > { %v2295_v51 = vadd.f32 %v2290_v50, %v2274_v53  ;;  %v2233_v24 = vadd.f32 %v2229_v33, %v2212_v10 }
 0x310   : > { %p3076_p3 = pneg %p3075_p5 }
 0x312   : > { %v2311_v57 = vpop.permute.xlu0 %2310  ;;  %v2250_v19 = vpop.permute.xlu1 %2249 }
 0x313   : > { %v2316_v18 = vadd.f32 %v2311_v57, %v2295_v51  ;;  %v2254_v5 = vadd.f32 %v2250_v19, %v2233_v24 }
 0x316   : > { %v2332_v58 = vpop.permute.xlu0 %2331  ;;  %v2271_v22 = vpop.permute.xlu1 %2270 }
 0x317   : > { %v2337_v59 = vadd.f32 %v2332_v58, %v2316_v18  ;;  %v2275_v35 = vadd.f32 %v2271_v22, %v2254_v5 }
 0x31a   : > { %v2346_v16 = vpop.permute.xlu0 %2345  ;;  %v2292_v47 = vpop.permute.xlu1 %2291 }
 0x31b   : > { %v2351_v37 = vadd.f32 %v2346_v16, %v2337_v59  ;;  %v2296_v3 = vadd.f32 %v2292_v47, %v2275_v35  ;;  %v5389_v16 = vld [vmem:[#allocation17_spill] sm:$0xff] }
 0x31e   : > { %v2367_v9 = vpop.permute.xlu0 %2366  ;;  %v2313_v42 = vpop.permute.xlu1 %2312 }
 0x31f   : > { %v2372_v6 = vadd.f32 %v2367_v9, %v2351_v37  ;;  %v2317_v39 = vadd.f32 %v2313_v42, %v2296_v3 }
 0x322   : > { %v2388_v0 = vpop.permute.xlu0 %2387  ;;  %v2334_v29 = vpop.permute.xlu1 %2333 }
 0x323   : > { %v2393_v36 = vadd.f32 %v2388_v0, %v2372_v6  ;;  %v2338_v44 = vadd.f32 %v2334_v29, %v2317_v39 }
 0x326   : > { %v2409_v23 = vpop.permute.xlu0 %2408  ;;  %v2348_v61 = vpop.permute.xlu1 %2347 }
 0x327   : > { %v2414_v48 = vadd.f32 %v2409_v23, %v2393_v36  ;;  %v2352_v15 = vadd.f32 %v2348_v61, %v2338_v44 }
 0x32a   : > { %v2430_v20 = vpop.permute.xlu0 %2429  ;;  %v2369_v52 = vpop.permute.xlu1 %2368 }
 0x32b   : > { %v2435_v1 = vadd.f32 %v2430_v20, %v2414_v48  ;;  %v2373_v34 = vadd.f32 %v2369_v52, %v2352_v15 }
 0x32e   : > { %v2451_v31 = vpop.permute.xlu0 %2450  ;;  %v2390_v4 = vpop.permute.xlu1 %2389 }
 0x32f   : > { %v2456_v41 = vadd.f32 %v2451_v31, %v2435_v1  ;;  %v2394_v8 = vadd.f32 %v2390_v4, %v2373_v34 }
 0x332   : > { %v2472_v17 = vpop.permute.xlu0 %2471  ;;  %v2411_v21 = vpop.permute.xlu1 %2410 }
 0x333   : > { %v2477_v28 = vadd.f32 %v2472_v17, %v2456_v41  ;;  %v2415_v56 = vadd.f32 %v2411_v21, %v2394_v8 }
 0x335   : > { %v2481_v7 = vmul.f32 %v2480_v11, %v2477_v28 }
 0x336   : > { %v2432_v2 = vpop.permute.xlu1 %2431 }
 0x337   : > { %v2485_v50 = vadd.f32 %v2484_v60, %v2481_v7  ;;  %v2436_v27 = vadd.f32 %v2432_v2, %v2415_v56 }
 0x339   : > { %v2906_v33 = vmul.f32 -1.442695, %v2485_v50 }
 0x33a   : > { %v2453_v54 = vpop.permute.xlu1 %2452 }
 0x33b   : > { %3000 = vpow2.f32 %v2906_v33  ;;  %v2457_v26 = vadd.f32 %v2453_v54, %v2436_v27  ;;  %v5398_v27 = vld [vmem:[#allocation15_spill] sm:$0xff] }
 0x33e   : > { %v2474_v57 = vpop.permute.xlu1 %2473 }
 0x33f   : > { %v2478_v19 = vadd.f32 %v2474_v57, %v2457_v26  ;;  %v2676_v26 = vsub.s32 0, %v5398_v27 }
 0x341   : > { %v2482_v43 = vmul.f32 %v2480_v11, %v2478_v19 }
 0x343   : > { %v2486_v62 = vadd.f32 %v2484_v60, %v2482_v43 }
 0x345   : > { %v3001_v38 = vpop.eup %3000  ;;  %v2907_v13 = vmul.f32 -1.442695, %v2486_v62 }
 0x346   : > { %v2493_v58 = vadd.f32 1.0, %v3001_v38 }
 0x347   : > { %3002 = vpow2.f32 %v2907_v13 }
 0x348   : > { %3004 = vrcp.f32 %v2493_v58 }
 0x351   : > { %v3003_v22 = vpop.eup %3002 }
 0x352   : > { %v3005_v45 = vpop.eup %3004  ;;  %v2494_v40 = vadd.f32 1.0, %v3003_v22 }
 0x353   : > { %v2506_v14 = vrot.slane %v3005_v45, %v5388_v25  ;;  %v2499_v49 = vcombine.high %v3005_v45, %v5390_v32 }
 0x354   : > { %3006 = vrcp.f32 %v2494_v40  ;;  %v3016_v40 = vld [vmem:[%s3353_s26] sm:$0xff]  ;;  %s3077_s26 = sshll.u32 %s3169_s16, 4  ;;  %s3078_s26 = int_to_ptr.vmem [resolvable:$false] %s3077_s26 }
 0x355   : > { %v2521_v47 = vrot.slane %v2506_v14, %v5389_v16  ;;  %v2514_v46 = vcombine.high %v2506_v14, %v5390_v32  ;;  %v2513_v42 = vrot.slane %v2499_v49, %v5388_v25  ;;  %p3080_p12 = scmp.lt.s32.totalorder %s5247_s17, %s3078_s26 }
 0x357   : > { %v2544_v63 = vcombine.high %v2521_v47, %v5390_v32  ;;  %v2528_v9 = vrot.slane %v2514_v46, %v5389_v16  ;;  %v2536_v53 = vrot.slane %v2513_v42, %v5389_v16  ;;  %v2529_v23 = vcombine.high %v2513_v42, %v5390_v32 }
 0x359   : > { %2598 = vrot.lane.b32.xlu0 %v2544_v63, %s5391_s24  ;;  %v2545_v0 = vcombine.high %v2528_v9, %v5390_v32  ;;  %v2546_v10 = vcombine.high %v2536_v53, %v5390_v32  ;;  %v2543_v24 = vrot.slane %v2529_v23, %v5389_v16 }
 0x35b   : > { %v2547_v5 = vcombine.high %v2543_v24, %v5390_v32 }
 0x35d   : > { %2602 = vrot.lane.b32.xlu0 %v2528_v9, %s5392_s29 }
 0x35e   : > { %v3007_v30 = vpop.eup %3006 }
 0x35f   : > { %v2555_v55 = vrot.slane %v3007_v30, %v5388_v25  ;;  %v2548_v18 = vcombine.high %v3007_v30, %v5390_v32 }
 0x361   : > { %2610 = vrot.lane.b32.xlu0 %v2536_v53, %s5393_s30  ;;  %v2570_v51 = vrot.slane %v2555_v55, %v5389_v16  ;;  %v2563_v12 = vcombine.high %v2555_v55, %v5390_v32  ;;  %v2562_v61 = vrot.slane %v2548_v18, %v5388_v25 }
 0x363   : > { %v2593_v29 = vcombine.high %v2570_v51, %v5390_v32  ;;  %v2577_v59 = vrot.slane %v2563_v12, %v5389_v16  ;;  %v2585_v37 = vrot.slane %v2562_v61, %v5389_v16  ;;  %v2578_v52 = vcombine.high %v2562_v61, %v5390_v32 }
 0x365   : > { %2606 = vrot.lane.b32.xlu0 %v2545_v0, %s5394_s8  ;;  %2626 = vrot.lane.b32.xlu1 %v2593_v29, %s5391_s24  ;;  %v2594_v6 = vcombine.high %v2577_v59, %v5390_v32  ;;  %v2595_v20 = vcombine.high %v2585_v37, %v5390_v32  ;;  %v2592_v35 = vrot.slane %v2578_v52, %v5389_v16  ;;  %s3079_s24 = scalar_lea.vmem %s3078_s26, 256 }
 0x366   : > { %p3081_p0 = scmp.lt.s32.totalorder %s3079_s24, %s3073_s28 }
 0x367   : > { %v2596_v36 = vcombine.high %v2592_v35, %v5390_v32 }
 0x368   : > { %p3082_p1 = por %p3081_p0, %p3080_p12 }
 0x369   : > { %2614 = vrot.lane.b32.xlu0 %v2546_v10, %s5395_s5  ;;  %2630 = vrot.lane.b32.xlu1 %v2577_v59, %s5392_s29 }
 0x36a   : > { %p3083_p9 = pnand %p3082_p1, %p3076_p3 }
 0x36d   : > { %2618 = vrot.lane.b32.xlu0 %v2543_v24, %s5396_s20  ;;  %2638 = vrot.lane.b32.xlu1 %v2585_v37, %s5393_s30 }
 0x371   : > { %2622 = vrot.lane.b32.xlu0 %v2547_v5, %s5397_s25  ;;  %2634 = vrot.lane.b32.xlu1 %v2594_v6, %s5394_s8 }
 0x375   : > { %2642 = vrot.lane.b32.xlu1 %v2595_v20, %s5395_s5 }
 0x379   : > { %2646 = vrot.lane.b32.xlu1 %v2592_v35, %s5396_s20 }
 0x37d   : > { %2650 = vrot.lane.b32.xlu1 %v2596_v36, %s5397_s25 }
 0x3cb   : > { %v2599_v3 = vpop.permute.xlu0 %2598 }
 0x3cc   : > { %v2654_v21 = vsel %vm2653_vm12, %v2521_v47, %v2599_v3 }
 0x3cf   : > { %v2603_v48 = vpop.permute.xlu0 %2602 }
 0x3d0   : > { %v2656_v15 = vsel %vm2655_vm13, %v2654_v21, %v2603_v48 }
 0x3d3   : > { %v2611_v31 = vpop.permute.xlu0 %2610 }
 0x3d7   : > { %v2627_v4 = vpop.permute.xlu1 %2626  ;;  %v2607_v39 = vpop.permute.xlu0 %2606 }
 0x3d8   : > { %v2658_v60 = vsel %vm2657_vm14, %v2656_v15, %v2607_v39  ;;  %v2667_v34 = vsel %vm2653_vm12, %v2570_v51, %v2627_v4 }
 0x3d9   : > { %v2660_v8 = vsel %vm2659_vm15, %v2658_v60, %v2611_v31 }
 0x3db   : > { %v2631_v1 = vpop.permute.xlu1 %2630  ;;  %v2615_v44 = vpop.permute.xlu0 %2614 }
 0x3dc   : > { %v2668_v7 = vsel %vm2655_vm13, %v2667_v34, %v2631_v1  ;;  %v2662_v56 = vsel %vm2661_vm0, %v2660_v8, %v2615_v44 }
 0x3df   : > { %v2639_v41 = vpop.permute.xlu1 %2638  ;;  %v2619_v17 = vpop.permute.xlu0 %2618 }
 0x3e0   : > { %v2664_v54 = vsel %vm2663_vm1, %v2662_v56, %v2619_v17 }
 0x3e3   : > { %v2635_v11 = vpop.permute.xlu1 %2634  ;;  %v2623_v50 = vpop.permute.xlu0 %2622 }
 0x3e4   : > { %v2669_v2 = vsel %vm2657_vm14, %v2668_v7, %v2635_v11  ;;  %v2666_v19 = vsel %vm2665_vm2, %v2664_v54, %v2623_v50 }
 0x3e5   : > { %v2670_v57 = vsel %vm2659_vm15, %v2669_v2, %v2639_v41  ;;  %v2677_v58 = vrot.slane %v2666_v19, %v2676_v26 }
 0x3e7   : > { %v2643_v28 = vpop.permute.xlu1 %2642 }
 0x3e8   : > { %v2671_v43 = vsel %vm2661_vm0, %v2670_v57, %v2643_v28 }
 0x3eb   : > { %v2647_v33 = vpop.permute.xlu1 %2646 }
 0x3ec   : > { %v2672_v62 = vsel %vm2663_vm1, %v2671_v43, %v2647_v33 }
 0x3ef   : > { %v2651_v38 = vpop.permute.xlu1 %2650 }
 0x3f0   : > { %v2673_v13 = vsel %vm2665_vm2, %v2672_v62, %v2651_v38 }
 0x3f1   : > { %v2681_v22 = vrot.slane %v2673_v13, %v2676_v26 }
 0x3f3   : > { %v2684_v45 = vcombine.low %v2677_v58, %v2681_v22 }
 0x3f5   : > { %v2686_v25 = vmul.f32 %v3016_v40, %v2684_v45 }
 0x3f7   : > { %2687 = vst [vmem:[%s209_s10] sm:$0xff] %v2686_v25 }
 0x3f8   : > { %3086 = shalt.err (!%p3083_p9)
}
 0x3f9   : > { %s3087_s9 = scalar_lea.hbm %s5245_s7, 128  ;;  %s3091_s8 = scalar_lea.hbm %s5292_s3, 256 }
 0x3fa   : > { %p3088_p2 = scmp.ne.s32.totalorder %s5245_s7, %s3087_s9  ;;  %p3092_p8 = scmp.lt.u32.totalorder %s5245_s7, %s5292_s3 }
 0x3fb   : > { %p3093_p10 = scmp.lt.u32.totalorder %s3091_s8, %s3087_s9  ;;  %p3095_p13 = scmp.lt.u32.totalorder %s3087_s9, %s5245_s7 }
 0x3fc   : > { %p3089_p4 = pnand %p3088_p2, %p5400_p7 }
 0x3fd   : > { %p3094_p11 = por %p3093_p10, %p3092_p8 }
 0x3fe   : > { %p3090_p6 = pneg %p3089_p4 }
 0x3ff   : > { %p3096_p5 = por %p3095_p13, %p3094_p11 }
 0x401   : > { %p3097_p3 = pnand %p3096_p5, %p3090_p6 }
 0x403   : > { %3100 = shalt.err (!%p3097_p3)
}
 0x404   : > { %2925 = dma.vmem_to_hbm [thread:$0]  (%p5400_p7), %s5247_s17, 128, %s5245_s7, %s2689_s6  }
 0x405 PF: > { %s2715_s25 = sand.u32 1, %s3135_s12   ;;  %p5401_p12 = scmp.ne.s32.totalorder %s5332_s19, 0 }
 0x406   : > { %p5402_p0 = scmp.ge.s32.totalorder %s3147_s15, 2  ;;  %s2716_s22 = scalar_lea.sflag [#allocation5], %s2715_s25 }
 0x408   : > { %p2939_p1 = pnand %p5402_p0, %p5401_p12 }
 0x40a   : > { %3130 = dma.done.wait (!%p2939_p1), %s2716_s22, 128  }
 0x40b   : > { %3132 = vsyncadd (!%p2939_p1), %s2716_s22, 4294967168  ;;  %p18_p9 = scmp.ge.s32.totalorder %s3238_s21, 4   ;;  %s5403_s12 = smov %s3139_s13 }
 0x40c   : > { %s5404_s13 = smov %s3143_s14  ;;  %s5405_s14 = smov %s3289_s4 }
 0x40d   : > { %s5406_s15 = smov %s3238_s21  ;;  %20 = sbr.rel (!%p18_p9) target bundleno = 7 (0x7), region = 87 }
 0x414   :  { %2721 = vsyncpa [#allocation4], 1 }
 0x415   :  { %2723 = vsyncpa [#allocation4 + $0x1], 1 }
 0x416   :  { %2724 = vsyncpa [#allocation5], 1 }
 0x417   :  { %2726 = vsyncpa [#allocation5 + $0x1], 1 }
 0x418   :  { %2727 = vsyncpa [#allocation6], 1 }
 0x419   :  { %2729 = vsyncpa [#allocation6 + $0x1], 1 }
 0x41a   :  { %2730 = vsyncpa [#allocation9], 1 }

</bundles_post_ra>
